<compile_context>
chip_gen: v7x
topology: tpu7x:2x2x1
jax: 0.10.0
libtpu: 0.0.40
codegen_flags: <defaults>
</compile_context>

<pallas_src>
import numpy as np
import jax
import jax.numpy as jnp
from jax.experimental import pallas as pl
from jax.experimental.pallas import tpu as pltpu

# ----------------------------------------------------------------------------
# Configuration (DecoderGAVP(connectome(extent=7), shape=[8, 4], kernel_size=3,
#                p_dropout=0.5, batch_norm=True, n_out_features=2,
#                normalize_last=True, activation='Softplus'))
# ----------------------------------------------------------------------------
N_SAMPLES = 2
N_FRAMES = 4
IN_CHANNELS = 4                    # len(connectome.output_cell_types)
SHAPE = [8, 4]                     # base: Cin->8, decoder: 8 -> out_channels(+1)
KERNEL_SIZE = 3                    # must be odd
K = KERNEL_SIZE
PAD = (KERNEL_SIZE - 1) // 2
N_OUT_FEATURES = 2
OUT_CHANNELS_BASE = SHAPE[-1]                       # _out_channels = 4
OUT_CHANNELS = OUT_CHANNELS_BASE * N_OUT_FEATURES   # 8
DEC_CHANNELS = OUT_CHANNELS + 1                     # normalize_last -> +1 channel
RADIUS = 7                         # connectome.config.extent
BN_EPS = 1e-5
C1 = SHAPE[0]
CIN_PAD = 8                        # pad Cin 4->8 so f32 tap slices are tile-aligned


def get_hex_coords(radius):
    us, vs = [], []
    for u in range(-radius, radius + 1):
        for v in range(max(-radius, -u - radius), min(radius, -u + radius) + 1):
            us.append(u)
            vs.append(v)
    return np.array(us, np.int32), np.array(vs, np.int32)


U, V = get_hex_coords(RADIUS)
U = U - U.min()
V = V - V.min()
H = int(U.max() + 1)               # 2*RADIUS + 1 = 15
W = int(V.max() + 1)               # 15
N_HEX = len(U)                     # 169
INV_NHEX = 1.0 / N_HEX

HP = H + 2 * PAD                   # padded height (17)
WP = W + 2 * PAD                   # padded width  (17)
HPWP = HP * WP                     # 289 rows per image (flattened padded grid)

# Zero frame around the flattened-batched base activation so every decoder tap
# is a static in-range lane slice; the +/-1 column taps wrap across rows at
# j = WP-1 and across image boundaries, which is benign ONLY because those rows
# are vmask-zeroed (base activation) and never pooled (decoder output).
LEAD = 24
TRAIL = 24
assert LEAD % 8 == 0 and TRAIL % 8 == 0
assert LEAD >= PAD * WP + PAD      # decoder taps reach back at most PAD*WP+PAD = 18
assert TRAIL >= PAD * WP + PAD
# trailing zero frame on the raw input (base-conv taps reach forward <= (K-1)*(WP+1))
X_TRAIL = 40
assert X_TRAIL >= (K - 1) * WP + (K - 1)


def _softplus(x):
    # numerically-stable log(1 + exp(x)) using only exp/log (Mosaic-friendly)
    return jnp.maximum(x, 0.0) + jnp.log(1.0 + jnp.exp(-jnp.abs(x)))


# ----------------------------------------------------------------------------
# Pallas kernel: whole batch in one grid step, lane-major layout.
# Lane index: l = b*HPWP + i*WP + j  (flattened padded grid per image, images
# stacked contiguously).  Channels sit on sublanes, spatial*batch on lanes.
# ----------------------------------------------------------------------------
def _make_kernel(bhw):
    # base-conv taps read the input at lane  r + dy*WP + dx   (r = output row)
    base_offs = [dy * WP + dx for dy in range(K) for dx in range(K)]
    # decoder taps read the base activation at lane  r + (dy-PAD)*WP + (dx-PAD)
    dec_offs = [(dy - PAD) * WP + (dx - PAD) for dy in range(K) for dx in range(K)]

    def kernel(x_ref, w1_ref, shift_ref, w2_ref, b2_ref, vmask_ref, pool_ref,
               out_ref):
        # x_ref:     (CIN_PAD, bhw + X_TRAIL) f32   relu'd, hex-scattered, padded input
        # w1_ref:    (C1, K*K*CIN_PAD)        bf16  BN-scale-folded hex-masked base weights
        # shift_ref: (C1, 1)                  f32   folded conv bias + BN shift
        # w2_ref:    (DEC_CHANNELS, K*K*C1)   bf16  hex-masked decoder weights (tap-major)
        # b2_ref:    (DEC_CHANNELS, 1)        f32
        # vmask_ref: (1, bhw)                 f32   validity (i<H and j<W) per lane
        # pool_ref:  (bhw, B)                 bf16  1.0 at (hexal row of image b, b)
        # out_ref:   (OUT_CHANNELS, B)        f32

        # ---- base: in-kernel im2col (9 lane-shifted views stacked on sublanes,
        #      tile-aligned since CIN_PAD=8) + ONE bf16 MXU matmul --------------
        x_all = x_ref[...]
        xcol = jnp.concatenate([x_all[:, off:off + bhw] for off in base_offs],
                               axis=0).astype(jnp.bfloat16)      # (K*K*CIN_PAD, bhw)
        acc1 = jnp.dot(w1_ref[...], xcol,
                       preferred_element_type=jnp.float32)       # (C1, bhw) f32

        # ---- BatchNorm (eval, scale folded into w1) + Softplus; Dropout = id --
        # vmask zeroes padding rows so the decoder sees proper per-image zero pad.
        h = _softplus(acc1 + shift_ref[...]) * vmask_ref[...]    # (C1, bhw)

        # ---- zero frame -> every decoder tap is an in-range static lane slice -
        g = jnp.concatenate([jnp.zeros((C1, LEAD), jnp.float32), h,
                             jnp.zeros((C1, TRAIL), jnp.float32)], axis=1)

        # ---- decoder hex-conv: all 9 taps fused into ONE bf16 MXU matmul ------
        h2col = jnp.concatenate([g[:, LEAD + off:LEAD + off + bhw]
                                 for off in dec_offs],
                                axis=0).astype(jnp.bfloat16)     # (K*K*C1, bhw)
        z = jnp.dot(w2_ref[...], h2col,
                    preferred_element_type=jnp.float32) + b2_ref[...]

        # ---- normalize_last: out[:C] / (softplus(out[C:]) + 1) via EUP rcp ----
        num = z[:OUT_CHANNELS, :]
        den = _softplus(z[OUT_CHANNELS:OUT_CHANNELS + 1, :]) + 1.0
        y = num * pl.reciprocal(den, approx=True)                # (OUT_CHANNELS, bhw)

        # ---- head: hexal gather + per-image GlobalAvgPool as ONE bf16 matmul --
        # (pool entries are exactly 1.0; exact 1/N_HEX applied in f32 after dot)
        out_ref[...] = jnp.dot(y.astype(jnp.bfloat16), pool_ref[...],
                               preferred_element_type=jnp.float32) * INV_NHEX

    return kernel


# ----------------------------------------------------------------------------
# Wrapper: minimal JAX glue (relu, hexal scatter, padding) + single pallas_call
# ----------------------------------------------------------------------------
def decoder_gavp_forward(x_hex, kparams):
    w1k, shift, w2k, b2k, vmask, poolsel = kparams
    n, f, cin, n_hex = x_hex.shape
    b = n * f
    bhw = b * HPWP

    # relu + scatter hexals onto the cartesian map (tiny arrays, plain JAX),
    # already in lane-major (channels-leading) order.
    x = jnp.maximum(x_hex, 0.0)
    x = jnp.transpose(x, (2, 0, 1, 3)).reshape(cin, b, n_hex)        # (Cin,B,NHEX)
    x_map = jnp.zeros((cin, b, H, W), jnp.float32).at[:, :, U, V].set(x)
    # pad channels 4->CIN_PAD and spatial by PAD, flatten per-image padded grids
    x_pad = jnp.pad(x_map, ((0, CIN_PAD - cin), (0, 0), (PAD, PAD), (PAD, PAD)))
    x_flat = x_pad.reshape(CIN_PAD, bhw)
    x_flat = jnp.pad(x_flat, ((0, 0), (0, X_TRAIL)))                 # trailing zeros

    kernel = _make_kernel(bhw)
    out = pl.pallas_call(
        kernel,
        out_shape=jax.ShapeDtypeStruct((OUT_CHANNELS, b), jnp.float32),
        grid_spec=pltpu.PrefetchScalarGridSpec(
            num_scalar_prefetch=0,
            grid=(1,),
            in_specs=[
                pl.BlockSpec(x_flat.shape, lambda i: (0, 0)),
                pl.BlockSpec(w1k.shape, lambda i: (0, 0)),
                pl.BlockSpec(shift.shape, lambda i: (0, 0)),
                pl.BlockSpec(w2k.shape, lambda i: (0, 0)),
                pl.BlockSpec(b2k.shape, lambda i: (0, 0)),
                pl.BlockSpec(vmask.shape, lambda i: (0, 0)),
                pl.BlockSpec(poolsel.shape, lambda i: (0, 0)),
            ],
            out_specs=pl.BlockSpec((OUT_CHANNELS, b), lambda i: (0, 0)),
        ),
        compiler_params=pltpu.CompilerParams(dimension_semantics=("arbitrary",)),
    )(x_flat, w1k, shift, w2k, b2k, vmask, poolsel)

    out = out.T.reshape(n, f, OUT_CHANNELS)                          # (B, C) -> ...
    return out.reshape(n, f, OUT_CHANNELS_BASE, N_OUT_FEATURES)


# ----------------------------------------------------------------------------
# Pure-JAX reference (faithful to the PyTorch forward, eval mode)
# ----------------------------------------------------------------------------
def reference_forward(x_hex, raw):
    w1, b1, gamma, beta, rmean, rvar, w2, b2 = raw
    n, f, cin, _ = x_hex.shape
    x = jnp.maximum(x_hex, 0.0)
    x_map = jnp.zeros((n, f, cin, H, W), jnp.float32).at[:, :, :, U, V].set(x)
    x_map = x_map.reshape(-1, cin, H, W)
    dn = ('NCHW', 'OIHW', 'NCHW')
    y = jax.lax.conv_general_dilated(x_map, w1, (1, 1),
                                     [(PAD, PAD), (PAD, PAD)],
                                     dimension_numbers=dn)
    y = y + b1[None, :, None, None]
    y = ((y - rmean[None, :, None, None]) / jnp.sqrt(rvar + BN_EPS)[None, :, None, None]
         * gamma[None, :, None, None] + beta[None, :, None, None])
    y = _softplus(y)
    z = jax.lax.conv_general_dilated(y, w2, (1, 1),
                                     [(PAD, PAD), (PAD, PAD)],
                                     dimension_numbers=dn)
    z = z + b2[None, :, None, None]
    out = z[:, :OUT_CHANNELS] / (_softplus(z[:, OUT_CHANNELS:]) + 1.0)
    out = out.reshape(n, f, OUT_CHANNELS, H, W)[:, :, :, U, V]
    out = out.mean(-1)
    return out.reshape(n, f, OUT_CHANNELS_BASE, N_OUT_FEATURES)


if __name__ == "__main__":
    # ---- deterministic parameter init (mirrors module __init__ shapes) -------
    ks = jax.random.split(jax.random.PRNGKey(0), 8)

    # hexagonal mask over the KxK filter (Conv2dHexSpace)
    ku, kv = get_hex_coords(KERNEL_SIZE // 2)
    ku = ku - ku.min()
    kv = kv - kv.min()
    kmask = np.zeros((KERNEL_SIZE, KERNEL_SIZE), np.float32)
    kmask[ku, kv] = 1.0
    kmask = jnp.asarray(kmask)

    w1 = 0.1 * jax.random.normal(ks[0], (C1, IN_CHANNELS, K, K),
                                 jnp.float32) * kmask[None, None]
    b1 = 0.1 * jax.random.normal(ks[1], (C1,), jnp.float32)
    gamma = 1.0 + 0.1 * jax.random.normal(ks[2], (C1,), jnp.float32)
    beta = 0.1 * jax.random.normal(ks[3], (C1,), jnp.float32)
    rmean = 0.1 * jax.random.normal(ks[4], (C1,), jnp.float32)
    rvar = 0.5 + 0.2 * jnp.abs(jax.random.normal(ks[5], (C1,), jnp.float32))
    w2 = 0.1 * jax.random.normal(ks[6], (DEC_CHANNELS, C1, K, K),
                                 jnp.float32) * kmask[None, None]
    b2 = 0.1 * jax.random.normal(ks[7], (DEC_CHANNELS,), jnp.float32)

    # ---- fold params into the lane-major kernel layout ------------------------
    scale = gamma / jnp.sqrt(rvar + BN_EPS)                     # BN scale (eval)
    # fold BN scale into the base conv weights (tap-major columns, Cin padded to 8)
    w1k = jnp.transpose(w1 * scale[:, None, None, None], (0, 2, 3, 1))   # (C1,K,K,Cin)
    w1k = jnp.pad(w1k, ((0, 0), (0, 0), (0, 0), (0, CIN_PAD - IN_CHANNELS)))
    w1k = w1k.reshape(C1, K * K * CIN_PAD).astype(jnp.bfloat16)          # MXU operand
    shift = ((b1 - rmean) * scale + beta).reshape(C1, 1)                 # f32 epilogue
    w2k = jnp.transpose(w2, (0, 2, 3, 1)).reshape(DEC_CHANNELS, K * K * C1)
    w2k = w2k.astype(jnp.bfloat16)                                       # MXU operand
    b2k = b2.reshape(DEC_CHANNELS, 1)

    b_total = N_SAMPLES * N_FRAMES
    bhw = b_total * HPWP
    # validity mask: lane l = b*HPWP + i*WP + j is valid iff i < H and j < W
    vm = np.zeros((HP, WP), np.float32)
    vm[:H, :W] = 1.0
    vmask = jnp.asarray(np.tile(vm.reshape(-1), b_total).reshape(1, bhw))
    # hexal-selection / per-image pooling matrix with exact 1.0 entries (bf16)
    pm = np.zeros((bhw, b_total), np.float32)
    hexrows = U.astype(np.int64) * WP + V.astype(np.int64)
    for bi in range(b_total):
        pm[bi * HPWP + hexrows, bi] = 1.0
    poolsel = jnp.asarray(pm, dtype=jnp.bfloat16)                        # (bhw, B)

    kparams = (w1k, shift, w2k, b2k, vmask, poolsel)
    raw = (w1, b1, gamma, beta, rmean, rvar, w2, b2)

    # ---- synthetic input: (n_samples, n_frames, in_channels, n_hexals) -------
    x_hex = jax.random.normal(jax.random.PRNGKey(1),
                              (N_SAMPLES, N_FRAMES, IN_CHANNELS, N_HEX), jnp.float32)

    out = jax.jit(decoder_gavp_forward)(x_hex, kparams)
    out = jax.block_until_ready(out)

    ref = reference_forward(x_hex, raw)
    ref = jax.block_until_ready(ref)

    assert out.shape == (N_SAMPLES, N_FRAMES, OUT_CHANNELS_BASE, N_OUT_FEATURES)
    np.testing.assert_allclose(np.asarray(out), np.asarray(ref), rtol=1e-1, atol=2e-2)
    print("KERNEL_OK")
</pallas_src>

<mosaic_0001>
module attributes {stable_mosaic.version = 11 : i64} {
  func.func @kernel(%arg0: i32, %arg1: memref<8x2352xf32, #tpu.memory_space<vmem>>, %arg2: memref<8x72xbf16, #tpu.memory_space<vmem>>, %arg3: memref<8x1xf32, #tpu.memory_space<vmem>>, %arg4: memref<9x72xbf16, #tpu.memory_space<vmem>>, %arg5: memref<9x1xf32, #tpu.memory_space<vmem>>, %arg6: memref<1x2312xf32, #tpu.memory_space<vmem>>, %arg7: memref<2312x8xbf16, #tpu.memory_space<vmem>>, %arg8: memref<8x8xf32, #tpu.memory_space<vmem>>) attributes {dimension_semantics = [#tpu.dimension_semantics<arbitrary>], iteration_bounds = array<i64: 1>, scalar_prefetch = 0 : i64, scratch_operands = 0 : i64, tpu.core_type = #tpu.core_type<tc>, window_params = [{pipeline_mode = #tpu.pipeline_mode<synchronous>, transform_indices = @transform_0, window_bounds = array<i64: 8, 2352>}, {pipeline_mode = #tpu.pipeline_mode<synchronous>, transform_indices = @transform_1, window_bounds = array<i64: 8, 72>}, {pipeline_mode = #tpu.pipeline_mode<synchronous>, transform_indices = @transform_2, window_bounds = array<i64: 8, 1>}, {pipeline_mode = #tpu.pipeline_mode<synchronous>, transform_indices = @transform_3, window_bounds = array<i64: 9, 72>}, {pipeline_mode = #tpu.pipeline_mode<synchronous>, transform_indices = @transform_4, window_bounds = array<i64: 9, 1>}, {pipeline_mode = #tpu.pipeline_mode<synchronous>, transform_indices = @transform_5, window_bounds = array<i64: 1, 2312>}, {pipeline_mode = #tpu.pipeline_mode<synchronous>, transform_indices = @transform_6, window_bounds = array<i64: 2312, 8>}, {pipeline_mode = #tpu.pipeline_mode<synchronous>, transform_indices = @transform_7, window_bounds = array<i64: 8, 8>}]} {
    %c0 = arith.constant 0 : index
    %c0_0 = arith.constant 0 : index
    %0 = vector.load %arg1[%c0, %c0_0] : memref<8x2352xf32, #tpu.memory_space<vmem>>, vector<8x2352xf32>
    %1 = vector.extract_strided_slice %0 {offsets = [0, 0], sizes = [8, 2312], strides = [1, 1]} : vector<8x2352xf32> to vector<8x2312xf32>
    %2 = vector.extract_strided_slice %0 {offsets = [0, 1], sizes = [8, 2312], strides = [1, 1]} : vector<8x2352xf32> to vector<8x2312xf32>
    %3 = vector.extract_strided_slice %0 {offsets = [0, 2], sizes = [8, 2312], strides = [1, 1]} : vector<8x2352xf32> to vector<8x2312xf32>
    %4 = vector.extract_strided_slice %0 {offsets = [0, 17], sizes = [8, 2312], strides = [1, 1]} : vector<8x2352xf32> to vector<8x2312xf32>
    %5 = vector.extract_strided_slice %0 {offsets = [0, 18], sizes = [8, 2312], strides = [1, 1]} : vector<8x2352xf32> to vector<8x2312xf32>
    %6 = vector.extract_strided_slice %0 {offsets = [0, 19], sizes = [8, 2312], strides = [1, 1]} : vector<8x2352xf32> to vector<8x2312xf32>
    %7 = vector.extract_strided_slice %0 {offsets = [0, 34], sizes = [8, 2312], strides = [1, 1]} : vector<8x2352xf32> to vector<8x2312xf32>
    %8 = vector.extract_strided_slice %0 {offsets = [0, 35], sizes = [8, 2312], strides = [1, 1]} : vector<8x2352xf32> to vector<8x2312xf32>
    %9 = vector.extract_strided_slice %0 {offsets = [0, 36], sizes = [8, 2312], strides = [1, 1]} : vector<8x2352xf32> to vector<8x2312xf32>
    %10 = tpu.concatenate %1, %2, %3, %4, %5, %6, %7, %8, %9 in 0 : vector<8x2312xf32>, vector<8x2312xf32>, vector<8x2312xf32>, vector<8x2312xf32>, vector<8x2312xf32>, vector<8x2312xf32>, vector<8x2312xf32>, vector<8x2312xf32>, vector<8x2312xf32> -> vector<72x2312xf32>
    %11 = arith.truncf %10 : vector<72x2312xf32> to vector<72x2312xbf16>
    %c0_1 = arith.constant 0 : index
    %c0_2 = arith.constant 0 : index
    %12 = vector.load %arg2[%c0_1, %c0_2] : memref<8x72xbf16, #tpu.memory_space<vmem>>, vector<8x72xbf16>
    %cst = arith.constant dense<0.000000e+00> : vector<8x2312xf32>
    %13 = tpu.matmul %12, %11, %cst {dimension_numbers = #tpu.dot_dimension_numbers<[1], [0], [0], [1], [0, 0, 1, 1], [], []>} : vector<8x72xbf16>, vector<72x2312xbf16>, vector<8x2312xf32> -> vector<8x2312xf32>
    %c0_3 = arith.constant 0 : index
    %c0_4 = arith.constant 0 : index
    %14 = vector.load %arg3[%c0_3, %c0_4] : memref<8x1xf32, #tpu.memory_space<vmem>>, vector<8x1xf32>
    %15 = vector.broadcast %14 : vector<8x1xf32> to vector<8x2312xf32>
    %16 = arith.addf %13, %15 : vector<8x2312xf32>
    %cst_5 = arith.constant 0.000000e+00 : f32
    %17 = vector.broadcast %cst_5 : f32 to vector<8x2312xf32>
    %18 = arith.maximumf %16, %17 : vector<8x2312xf32>
    %19 = math.absf %16 : vector<8x2312xf32>
    %cst_6 = arith.constant 0.000000e+00 : f32
    %20 = vector.broadcast %cst_6 : f32 to vector<8x2312xf32>
    %21 = arith.subf %20, %19 : vector<8x2312xf32>
    %22 = math.exp %21 : vector<8x2312xf32>
    %cst_7 = arith.constant 1.000000e+00 : f32
    %23 = vector.broadcast %cst_7 : f32 to vector<8x2312xf32>
    %24 = arith.addf %23, %22 : vector<8x2312xf32>
    %25 = math.log %24 : vector<8x2312xf32>
    %26 = arith.addf %18, %25 : vector<8x2312xf32>
    %c0_8 = arith.constant 0 : index
    %c0_9 = arith.constant 0 : index
    %27 = vector.load %arg6[%c0_8, %c0_9] : memref<1x2312xf32, #tpu.memory_space<vmem>>, vector<1x2312xf32>
    %28 = vector.broadcast %27 : vector<1x2312xf32> to vector<8x2312xf32>
    %29 = arith.mulf %26, %28 : vector<8x2312xf32>
    %cst_10 = arith.constant 0.000000e+00 : f32
    %30 = vector.broadcast %cst_10 : f32 to vector<8x24xf32>
    %cst_11 = arith.constant 0.000000e+00 : f32
    %31 = vector.broadcast %cst_11 : f32 to vector<8x24xf32>
    %32 = tpu.concatenate %30, %29, %31 in 1 : vector<8x24xf32>, vector<8x2312xf32>, vector<8x24xf32> -> vector<8x2360xf32>
    %33 = vector.extract_strided_slice %32 {offsets = [0, 6], sizes = [8, 2312], strides = [1, 1]} : vector<8x2360xf32> to vector<8x2312xf32>
    %34 = vector.extract_strided_slice %32 {offsets = [0, 7], sizes = [8, 2312], strides = [1, 1]} : vector<8x2360xf32> to vector<8x2312xf32>
    %35 = vector.extract_strided_slice %32 {offsets = [0, 8], sizes = [8, 2312], strides = [1, 1]} : vector<8x2360xf32> to vector<8x2312xf32>
    %36 = vector.extract_strided_slice %32 {offsets = [0, 23], sizes = [8, 2312], strides = [1, 1]} : vector<8x2360xf32> to vector<8x2312xf32>
    %37 = vector.extract_strided_slice %32 {offsets = [0, 24], sizes = [8, 2312], strides = [1, 1]} : vector<8x2360xf32> to vector<8x2312xf32>
    %38 = vector.extract_strided_slice %32 {offsets = [0, 25], sizes = [8, 2312], strides = [1, 1]} : vector<8x2360xf32> to vector<8x2312xf32>
    %39 = vector.extract_strided_slice %32 {offsets = [0, 40], sizes = [8, 2312], strides = [1, 1]} : vector<8x2360xf32> to vector<8x2312xf32>
    %40 = vector.extract_strided_slice %32 {offsets = [0, 41], sizes = [8, 2312], strides = [1, 1]} : vector<8x2360xf32> to vector<8x2312xf32>
    %41 = vector.extract_strided_slice %32 {offsets = [0, 42], sizes = [8, 2312], strides = [1, 1]} : vector<8x2360xf32> to vector<8x2312xf32>
    %42 = tpu.concatenate %33, %34, %35, %36, %37, %38, %39, %40, %41 in 0 : vector<8x2312xf32>, vector<8x2312xf32>, vector<8x2312xf32>, vector<8x2312xf32>, vector<8x2312xf32>, vector<8x2312xf32>, vector<8x2312xf32>, vector<8x2312xf32>, vector<8x2312xf32> -> vector<72x2312xf32>
    %43 = arith.truncf %42 : vector<72x2312xf32> to vector<72x2312xbf16>
    %c0_12 = arith.constant 0 : index
    %c0_13 = arith.constant 0 : index
    %44 = vector.load %arg4[%c0_12, %c0_13] : memref<9x72xbf16, #tpu.memory_space<vmem>>, vector<9x72xbf16>
    %cst_14 = arith.constant dense<0.000000e+00> : vector<9x2312xf32>
    %45 = tpu.matmul %44, %43, %cst_14 {dimension_numbers = #tpu.dot_dimension_numbers<[1], [0], [0], [1], [0, 0, 1, 1], [], []>} : vector<9x72xbf16>, vector<72x2312xbf16>, vector<9x2312xf32> -> vector<9x2312xf32>
    %c0_15 = arith.constant 0 : index
    %c0_16 = arith.constant 0 : index
    %46 = vector.load %arg5[%c0_15, %c0_16] : memref<9x1xf32, #tpu.memory_space<vmem>>, vector<9x1xf32>
    %47 = vector.broadcast %46 : vector<9x1xf32> to vector<9x2312xf32>
    %48 = arith.addf %45, %47 : vector<9x2312xf32>
    %49 = vector.extract_strided_slice %48 {offsets = [0, 0], sizes = [8, 2312], strides = [1, 1]} : vector<9x2312xf32> to vector<8x2312xf32>
    %50 = vector.extract_strided_slice %48 {offsets = [8, 0], sizes = [1, 2312], strides = [1, 1]} : vector<9x2312xf32> to vector<1x2312xf32>
    %cst_17 = arith.constant 0.000000e+00 : f32
    %51 = vector.broadcast %cst_17 : f32 to vector<1x2312xf32>
    %52 = arith.maximumf %50, %51 : vector<1x2312xf32>
    %53 = math.absf %50 : vector<1x2312xf32>
    %cst_18 = arith.constant 0.000000e+00 : f32
    %54 = vector.broadcast %cst_18 : f32 to vector<1x2312xf32>
    %55 = arith.subf %54, %53 : vector<1x2312xf32>
    %56 = math.exp %55 : vector<1x2312xf32>
    %cst_19 = arith.constant 1.000000e+00 : f32
    %57 = vector.broadcast %cst_19 : f32 to vector<1x2312xf32>
    %58 = arith.addf %57, %56 : vector<1x2312xf32>
    %59 = math.log %58 : vector<1x2312xf32>
    %60 = arith.addf %52, %59 : vector<1x2312xf32>
    %cst_20 = arith.constant 1.000000e+00 : f32
    %61 = vector.broadcast %cst_20 : f32 to vector<1x2312xf32>
    %62 = arith.addf %60, %61 : vector<1x2312xf32>
    %63 = tpu.reciprocal %62 {approx = true} : vector<1x2312xf32> -> vector<1x2312xf32>
    %64 = vector.broadcast %63 : vector<1x2312xf32> to vector<8x2312xf32>
    %65 = arith.mulf %49, %64 : vector<8x2312xf32>
    %66 = arith.truncf %65 : vector<8x2312xf32> to vector<8x2312xbf16>
    %c0_21 = arith.constant 0 : index
    %c0_22 = arith.constant 0 : index
    %67 = vector.load %arg7[%c0_21, %c0_22] : memref<2312x8xbf16, #tpu.memory_space<vmem>>, vector<2312x8xbf16>
    %cst_23 = arith.constant dense<0.000000e+00> : vector<8x8xf32>
    %68 = tpu.matmul %66, %67, %cst_23 {dimension_numbers = #tpu.dot_dimension_numbers<[1], [0], [0], [1], [0, 0, 1, 1], [], []>} : vector<8x2312xbf16>, vector<2312x8xbf16>, vector<8x8xf32> -> vector<8x8xf32>
    %cst_24 = arith.constant 5.917160e-03 : f32
    %69 = vector.broadcast %cst_24 : f32 to vector<8x8xf32>
    %70 = arith.mulf %68, %69 : vector<8x8xf32>
    %c0_25 = arith.constant 0 : index
    %c0_26 = arith.constant 0 : index
    %71 = vector.load %arg8[%c0_25, %c0_26] : memref<8x8xf32, #tpu.memory_space<vmem>>, vector<8x8xf32>
    tpu.vector_store %arg8[%c0_25, %c0_26], %70 {strides = array<i32>} : memref<8x8xf32, #tpu.memory_space<vmem>>, vector<8x8xf32>,
    return
  }
  func.func @transform_0(%arg0: i32) -> (i32, i32) {
    %c0_i32 = arith.constant 0 : i32
    %c0_i32_0 = arith.constant 0 : i32
    %c0_i32_1 = arith.constant 0 : i32
    return %c0_i32, %c0_i32_0 : i32, i32
  }
  func.func @transform_1(%arg0: i32) -> (i32, i32) {
    %c0_i32 = arith.constant 0 : i32
    %c0_i32_0 = arith.constant 0 : i32
    %c0_i32_1 = arith.constant 0 : i32
    return %c0_i32, %c0_i32_0 : i32, i32
  }
  func.func @transform_2(%arg0: i32) -> (i32, i32) {
    %c0_i32 = arith.constant 0 : i32
    %c0_i32_0 = arith.constant 0 : i32
    %c0_i32_1 = arith.constant 0 : i32
    return %c0_i32, %c0_i32_0 : i32, i32
  }
  func.func @transform_3(%arg0: i32) -> (i32, i32) {
    %c0_i32 = arith.constant 0 : i32
    %c0_i32_0 = arith.constant 0 : i32
    %c0_i32_1 = arith.constant 0 : i32
    return %c0_i32, %c0_i32_0 : i32, i32
  }
  func.func @transform_4(%arg0: i32) -> (i32, i32) {
    %c0_i32 = arith.constant 0 : i32
    %c0_i32_0 = arith.constant 0 : i32
    %c0_i32_1 = arith.constant 0 : i32
    return %c0_i32, %c0_i32_0 : i32, i32
  }
  func.func @transform_5(%arg0: i32) -> (i32, i32) {
    %c0_i32 = arith.constant 0 : i32
    %c0_i32_0 = arith.constant 0 : i32
    %c0_i32_1 = arith.constant 0 : i32
    return %c0_i32, %c0_i32_0 : i32, i32
  }
  func.func @transform_6(%arg0: i32) -> (i32, i32) {
    %c0_i32 = arith.constant 0 : i32
    %c0_i32_0 = arith.constant 0 : i32
    %c0_i32_1 = arith.constant 0 : i32
    return %c0_i32, %c0_i32_0 : i32, i32
  }
  func.func @transform_7(%arg0: i32) -> (i32, i32) {
    %c0_i32 = arith.constant 0 : i32
    %c0_i32_0 = arith.constant 0 : i32
    %c0_i32_1 = arith.constant 0 : i32
    return %c0_i32, %c0_i32_0 : i32, i32
  }
}

</mosaic_0001>

<bundles_post_ra>
// kernel: decoder_gavp_forward.1
= control target key start
LH: loop header
LB: loop body
LE: loop exit
PB: predicated region body
PF: predicated region fallthrough
CT: control target
= control target key end

     0   :  { %s6733_s9 = smov 126   ;;  %s6734_s10 = smov 127   ;;  %v9545_v10 = vmov 0   ;;  %vm103_vm0 = vcmask 1039360   ;;  %vm255_vm1 = vcmask 908288   ;;  %vm179_vm2 = vcmask 1031168   ;;  %s9535_s0 = inlined_call_operand.vmem [shape: f32[8,2352], index: 0, kind: input, shape index: {}]   ;;  %s9536_s1 = inlined_call_operand.vmem [shape: bf16[8,72], index: 1, kind: input, shape index: {}]   ;;  %s9537_s2 = inlined_call_operand.vmem [shape: f32[8,1], index: 2, kind: input, shape index: {}]   ;;  %s9538_s5 = inlined_call_operand.vmem [shape: f32[1,2312], index: 5, kind: input, shape index: {}]   ;;  %s9539_s3 = inlined_call_operand.vmem [shape: bf16[9,72], index: 3, kind: input, shape index: {}]   ;;  %s9540_s4 = inlined_call_operand.vmem [shape: f32[9,1], index: 4, kind: input, shape index: {}]   ;;  %s9541_s6 = inlined_call_operand.vmem [shape: bf16[2312,8], index: 6, kind: input, shape index: {}]   ;;  %s9542_s7 = inlined_call_operand.vmem [shape: f32[8,8], index: 7, kind: output, shape index: {}]  }
   0x1   :  { %v6789_v0 = vld [vmem:[%s9535_s0 + $0x8] sm:$0xff]  ;;  %v6794_v1 = vld [vmem:[%s9535_s0 + $0x10] sm:$0xff]  ;;  %v6799_v2 = vld [vmem:[%s9535_s0] sm:$0xff]  ;;  %s6735_s11 = smov 111   ;;  %s6736_s12 = smov 109   ;;  %869 = vmatprep.mubr.bf16.mxu1 %v9545_v10  ;;  %951 = vmatprep.mubr.bf16.mxu0 %v9545_v10  ;;  %vm407_vm3 = vcmask 891904  }
   0x2   :  { %v5637_v3 = vpack.i.bf16 %v6794_v1, %v6789_v0  ;;  %v6806_v4 = vld [vmem:[%s9535_s0 + $0x18] sm:$0xff]  ;;  %s6737_s13 = smov 110   ;;  %s6738_s14 = smov 93   ;;  %v5697_v7 = vpack.i.bf16 %v6789_v0, %v6799_v2  ;;  %v6831_v8 = vld [vmem:[%s9535_s0 + $0x20] sm:$0xff]  ;;  %v6836_v9 = vld [vmem:[%s9535_s0 + $0x28] sm:$0xff]  ;;  %5987 = vset.pattern.permute.xlu0 %v9545_v10  ;;  %6393 = vset.pattern.permute.xlu1 %v9545_v10  ;;  %vm331_vm4 = vcmask 900096  }
   0x3   :  { %v5632_v5 = vpack.i.bf16 %v6806_v4, %v6799_v2  ;;  %s6739_s15 = smov 94   ;;  %v5702_v6 = vpack.i.bf16 %v6806_v4, %v6794_v1  ;;  %s6741_s20 = smov 92   ;;  %v5712_v11 = vpack.i.bf16 %v6836_v9, %v6831_v8  ;;  %v6855_v12 = vld [vmem:[%s9535_s0 + $0x40] sm:$0xff]  ;;  %v6860_v13 = vld [vmem:[%s9535_s0 + $0x48] sm:$0xff]  ;;  %v6865_v14 = vld [vmem:[%s9535_s0 + $0x30] sm:$0xff]  ;;  %vm559_vm5 = vcmask 760832  }
   0x4   :  { %5638 = vrot.lane.b32.xlu1 %v5637_v3, %s6733_s9  ;;  %5628 = vrot.lane.b32.xlu0 %v5637_v3, %s6734_s10  ;;  %v6870_v15 = vld [vmem:[%s9535_s0 + $0x38] sm:$0xff]  ;;  %v5752_v16 = vpack.i.bf16 %v6860_v13, %v6855_v12  ;;  %v6895_v18 = vld [vmem:[%s9535_s0 + $0x60] sm:$0xff]  ;;  %vm483_vm6 = vcmask 769024   ;;  %vm635_vm7 = vcmask 752640   ;;  %vm779_vm8 = vcmask 1043456   ;;  %s6744_s26 = smov 24  }
   0x5   :  { %v5747_v17 = vpack.i.bf16 %v6870_v15, %v6865_v14  ;;  %v6900_v19 = vld [vmem:[%s9535_s0 + $0x68] sm:$0xff]  ;;  %v6905_v20 = vld [vmem:[%s9535_s0 + $0x50] sm:$0xff]  ;;  %v6910_v21 = vld [vmem:[%s9535_s0 + $0x58] sm:$0xff]  ;;  %vm775_vm9 = vcmask 588800   ;;  %vm6743_vm10 = vmmov 0   ;;  %vm1594_vm11 = vcmask 195584  }
   0x6   :  { %v5832_v22 = vpack.i.bf16 %v6900_v19, %v6895_v18  ;;  %v5827_v23 = vpack.i.bf16 %v6910_v21, %v6905_v20  ;;  %v43_v24 = vld [vmem:[%s9535_s0 + $0x80] sm:$0xff]  ;;  %v44_v25 = vld [vmem:[%s9535_s0 + $0x88] sm:$0xff]  ;;  %v6941_v26 = vld [vmem:[%s9535_s0 + $0x70] sm:$0xff]  ;;  %vm1633_vm12 = vcmask 261120   ;;  %vm2636_vm13 = vcmask 998400  }
   0x7   :  { %v6946_v27 = vld [vmem:[%s9535_s0 + $0x78] sm:$0xff]  ;;  %v6950_v28 = vpack.i.bf16 %v44_v25, %v43_v24  ;;  %vm4770_vm14 = vcmask 64512  }
   0x8   :  { %5643 = vrot.lane.b32.xlu1 %v5637_v3, %s6735_s11  ;;  %5633 = vrot.lane.b32.xlu0 %v5632_v5, %s6734_s10  ;;  %v6954_v29 = vpack.i.bf16 %v6946_v27, %v6941_v26 }
   0xc   :  { %5653 = vrot.lane.b32.xlu1 %v5632_v5, %s6735_s11  ;;  %5648 = vrot.lane.b32.xlu0 %v5632_v5, %s6733_s9 }
  0x10   :  { %5663 = vrot.lane.b32.xlu1 %v5637_v3, %s6736_s12  ;;  %5658 = vrot.lane.b32.xlu0 %v5637_v3, %s6737_s13 }
  0x14   :  { %5673 = vrot.lane.b32.xlu1 %v5632_v5, %s6736_s12  ;;  %5668 = vrot.lane.b32.xlu0 %v5632_v5, %s6737_s13 }
  0x18   :  { %5683 = vrot.lane.b32.xlu1 %v5637_v3, %s6738_s14  ;;  %5678 = vrot.lane.b32.xlu0 %v5637_v3, %s6739_s15 }
  0x1c   :  { %5693 = vrot.lane.b32.xlu1 %v5632_v5, %s6738_s14  ;;  %5688 = vrot.lane.b32.xlu0 %v5632_v5, %s6739_s15 }
  0x20   :  { %5703 = vrot.lane.b32.xlu1 %v5702_v6, %s6741_s20  ;;  %5698 = vrot.lane.b32.xlu0 %v5697_v7, %s6741_s20 }
  0x24   :  { %5713 = vrot.lane.b32.xlu1 %v5712_v11, %s6733_s9  ;;  %5708 = vrot.lane.b32.xlu0 %v5712_v11, %s6734_s10 }
  0x28   :  { %5723 = vrot.lane.b32.xlu1 %v5712_v11, %s6737_s13  ;;  %5718 = vrot.lane.b32.xlu0 %v5712_v11, %s6735_s11 }
  0x2c   :  { %5733 = vrot.lane.b32.xlu1 %v5712_v11, %s6739_s15  ;;  %5728 = vrot.lane.b32.xlu0 %v5712_v11, %s6736_s12 }
  0x30   :  { %5743 = vrot.lane.b32.xlu1 %v5712_v11, %s6741_s20  ;;  %5738 = vrot.lane.b32.xlu0 %v5712_v11, %s6738_s14 }
  0x34   :  { %5753 = vrot.lane.b32.xlu1 %v5752_v16, %s6734_s10  ;;  %5748 = vrot.lane.b32.xlu0 %v5747_v17, %s6734_s10 }
  0x38   :  { %5763 = vrot.lane.b32.xlu1 %v5752_v16, %s6733_s9  ;;  %5758 = vrot.lane.b32.xlu0 %v5747_v17, %s6733_s9 }
  0x3c   :  { %5773 = vrot.lane.b32.xlu1 %v5752_v16, %s6735_s11  ;;  %5768 = vrot.lane.b32.xlu0 %v5747_v17, %s6735_s11 }
  0x40   :  { %5783 = vrot.lane.b32.xlu1 %v5752_v16, %s6737_s13  ;;  %5778 = vrot.lane.b32.xlu0 %v5747_v17, %s6737_s13 }
  0x44   :  { %5793 = vrot.lane.b32.xlu1 %v5752_v16, %s6736_s12  ;;  %5788 = vrot.lane.b32.xlu0 %v5747_v17, %s6736_s12 }
  0x48   :  { %5803 = vrot.lane.b32.xlu1 %v5752_v16, %s6739_s15  ;;  %5798 = vrot.lane.b32.xlu0 %v5747_v17, %s6739_s15 }
  0x4c   :  { %5813 = vrot.lane.b32.xlu1 %v5752_v16, %s6738_s14  ;;  %5808 = vrot.lane.b32.xlu0 %v5747_v17, %s6738_s14 }
  0x50   :  { %5823 = vrot.lane.b32.xlu1 %v5752_v16, %s6741_s20  ;;  %5818 = vrot.lane.b32.xlu0 %v5747_v17, %s6741_s20 }
  0x54   :  { %5833 = vrot.lane.b32.xlu1 %v5832_v22, %s6734_s10  ;;  %5828 = vrot.lane.b32.xlu0 %v5827_v23, %s6734_s10 }
  0x58   :  { %5843 = vrot.lane.b32.xlu1 %v5832_v22, %s6733_s9  ;;  %5838 = vrot.lane.b32.xlu0 %v5827_v23, %s6733_s9 }
  0x5c   :  { %5853 = vrot.lane.b32.xlu1 %v5832_v22, %s6735_s11  ;;  %5848 = vrot.lane.b32.xlu0 %v5827_v23, %s6735_s11 }
  0x60   :  { %5863 = vrot.lane.b32.xlu1 %v5832_v22, %s6737_s13  ;;  %5858 = vrot.lane.b32.xlu0 %v5827_v23, %s6737_s13 }
  0x64   :  { %5873 = vrot.lane.b32.xlu1 %v5832_v22, %s6736_s12  ;;  %5868 = vrot.lane.b32.xlu0 %v5827_v23, %s6736_s12 }
  0x68   :  { %5883 = vrot.lane.b32.xlu1 %v5832_v22, %s6739_s15  ;;  %5878 = vrot.lane.b32.xlu0 %v5827_v23, %s6739_s15 }
  0x6c   :  { %5893 = vrot.lane.b32.xlu1 %v5832_v22, %s6738_s14  ;;  %5888 = vrot.lane.b32.xlu0 %v5827_v23, %s6738_s14 }
  0x70   :  { %5903 = vrot.lane.b32.xlu1 %v5832_v22, %s6741_s20  ;;  %5898 = vrot.lane.b32.xlu0 %v5827_v23, %s6741_s20 }
  0x74   :  { %5913 = vrot.lane.b32.xlu1 %v6950_v28, %s6734_s10  ;;  %5908 = vrot.lane.b32.xlu0 %v6954_v29, %s6734_s10 }
  0x76   :  { %v6960_v30 = vpop.permute.xlu1 %5638  ;;  %v6962_v31 = vpop.permute.xlu0 %5628 }
  0x77   :  { %v5631_v32 = vunpack.i.h.bf16 %v6962_v31  ;;  %v5630_v33 = vunpack.i.l.bf16 %v6962_v31  ;;  %v5641_v34 = vunpack.i.h.bf16 %v6960_v30  ;;  %v5640_v35 = vunpack.i.l.bf16 %v6960_v30 }
  0x78   :  { %5923 = vrot.lane.b32.xlu1 %v6950_v28, %s6733_s9  ;;  %5918 = vrot.lane.b32.xlu0 %v6954_v29, %s6733_s9 }
  0x79   :  { %v105_v36 = vsel %vm103_vm0, %v5630_v33, %v5631_v32  ;;  %v181_v44 = vsel %vm179_vm2, %v5640_v35, %v5641_v34 }
  0x7a   :  { %v6975_v37 = vpop.permute.xlu1 %5643  ;;  %v6977_v38 = vpop.permute.xlu0 %5633  ;;  %v674_v39 = vpack.c.bf16 %v105_v36, %v6789_v0 }
  0x7b   :  { %v5646_v40 = vunpack.i.h.bf16 %v6975_v37  ;;  %v5645_v41 = vunpack.i.l.bf16 %v6975_v37  ;;  %v5635_v42 = vunpack.i.l.bf16 %v6977_v38 }
  0x7c   :  { %837 = vmatprep.subr.bf16.mxu1 %v674_v39  ;;  %5933 = vrot.lane.b32.xlu1 %v6950_v28, %s6735_s11 }
  0x7d   :  { %5928 = vrot.lane.b32.xlu0 %v6954_v29, %s6735_s11  ;;  %v104_v43 = vsel %vm103_vm0, %v5635_v42, %v5630_v33  ;;  %v257_v45 = vsel %vm255_vm1, %v5645_v41, %v5646_v40 }
  0x7e   :  { %v6994_v46 = vpop.permute.xlu1 %5653  ;;  %v6996_v47 = vpop.permute.xlu0 %5648  ;;  %v673_v48 = vpack.c.bf16 %v104_v43, %v6799_v2  ;;  %v693_v49 = vpack.c.bf16 %v257_v45, %v181_v44  ;;  %v7068_v44 = vld [vmem:[%s9535_s0 + $0x90] sm:$0xff] }
  0x7f   :  { %v5655_v50 = vunpack.i.l.bf16 %v6994_v46  ;;  %v5650_v51 = vunpack.i.l.bf16 %v6996_v47 }
  0x80   :  { %5943 = vrot.lane.b32.xlu1 %v6950_v28, %s6737_s13  ;;  %838 = vmatpush1.bf16.msra.mxu1 %v673_v48 }
  0x81   :  { %5938 = vrot.lane.b32.xlu0 %v6954_v29, %s6737_s13  ;;  %839 = vmatprep.subr.bf16.mxu1 %v693_v49  ;;  %v180_v52 = vsel %vm179_vm2, %v5650_v51, %v5640_v35  ;;  %v256_v55 = vsel %vm255_vm1, %v5655_v50, %v5645_v41 }
  0x82   :  { %v7006_v53 = vpop.permute.xlu1 %5663  ;;  %v7008_v54 = vpop.permute.xlu0 %5658  ;;  %v692_v60 = vpack.c.bf16 %v256_v55, %v180_v52 }
  0x83   :  { %v5666_v56 = vunpack.i.h.bf16 %v7006_v53  ;;  %v5665_v57 = vunpack.i.l.bf16 %v7006_v53  ;;  %v5661_v58 = vunpack.i.h.bf16 %v7008_v54  ;;  %v5660_v59 = vunpack.i.l.bf16 %v7008_v54 }
  0x84   :  { %5953 = vrot.lane.b32.xlu1 %v6950_v28, %s6736_s12  ;;  %840 = vmatpush1.bf16.msra.mxu1 %v692_v60 }
  0x85   :  { %5948 = vrot.lane.b32.xlu0 %v6954_v29, %s6736_s12  ;;  %v333_v61 = vsel %vm331_vm4, %v5660_v59, %v5661_v58  ;;  %v409_v62 = vsel %vm407_vm3, %v5665_v57, %v5666_v56 }
  0x86   :  { %v7025_v63 = vpop.permute.xlu1 %5673  ;;  %v7027_v0 = vpop.permute.xlu0 %5668  ;;  %v712_v2 = vpack.c.bf16 %v409_v62, %v333_v61 }
  0x87   :  { %v5675_v3 = vunpack.i.l.bf16 %v7025_v63  ;;  %v5670_v5 = vunpack.i.l.bf16 %v7027_v0 }
  0x88   :  { %5963 = vrot.lane.b32.xlu1 %v6950_v28, %s6739_s15  ;;  %841 = vmatprep.subr.bf16.mxu1 %v712_v2 }
  0x89   :  { %5958 = vrot.lane.b32.xlu0 %v6954_v29, %s6739_s15  ;;  %v332_v6 = vsel %vm331_vm4, %v5670_v5, %v5660_v59  ;;  %v408_v7 = vsel %vm407_vm3, %v5675_v3, %v5665_v57 }
  0x8a   :  { %v7037_v11 = vpop.permute.xlu1 %5683  ;;  %v7039_v16 = vpop.permute.xlu0 %5678  ;;  %v711_v17 = vpack.c.bf16 %v408_v7, %v332_v6  ;;  %v5651_v7 = vunpack.i.h.bf16 %v6996_v47 }
  0x8b   :  { %v5686_v22 = vunpack.i.h.bf16 %v7037_v11  ;;  %v5685_v23 = vunpack.i.l.bf16 %v7037_v11  ;;  %v5681_v24 = vunpack.i.h.bf16 %v7039_v16  ;;  %v5680_v25 = vunpack.i.l.bf16 %v7039_v16 }
  0x8c   :  { %5973 = vrot.lane.b32.xlu1 %v6950_v28, %s6738_s14  ;;  %842 = vmatpush1.bf16.msra.mxu1 %v711_v17 }
  0x8d   :  { %5968 = vrot.lane.b32.xlu0 %v6954_v29, %s6738_s14  ;;  %v485_v33 = vsel %vm483_vm6, %v5680_v25, %v5681_v24  ;;  %v561_v35 = vsel %vm559_vm5, %v5685_v23, %v5686_v22 }
  0x8e   :  { %v7055_v36 = vpop.permute.xlu1 %5693  ;;  %v7057_v39 = vpop.permute.xlu0 %5688  ;;  %v731_v41 = vpack.c.bf16 %v561_v35, %v485_v33  ;;  %v5676_v35 = vunpack.i.h.bf16 %v7025_v63 }
  0x8f   :  { %v5695_v42 = vunpack.i.l.bf16 %v7055_v36  ;;  %v5690_v43 = vunpack.i.l.bf16 %v7057_v39 }
  0x90   :  { %5983 = vrot.lane.b32.xlu1 %v6950_v28, %s6741_s20  ;;  %843 = vmatprep.subr.bf16.mxu1 %v731_v41  ;;  %v5671_v41 = vunpack.i.h.bf16 %v7027_v0 }
  0x91   :  { %5978 = vrot.lane.b32.xlu0 %v6954_v29, %s6741_s20  ;;  %v484_v45 = vsel %vm483_vm6, %v5690_v43, %v5680_v25  ;;  %v560_v48 = vsel %vm559_vm5, %v5695_v42, %v5685_v23  ;;  %v5636_v29 = vunpack.i.h.bf16 %v6977_v38  ;;  %v5656_v38 = vunpack.i.h.bf16 %v6994_v46  ;;  %v7104_v46 = vld [vmem:[%s9536_s1] sm:$0xf] }
  0x92   :  { %v7072_v49 = vpop.permute.xlu1 %5703  ;;  %v5699_v50 = vpop.permute.xlu0 %5698  ;;  %v730_v51 = vpack.c.bf16 %v560_v48, %v484_v45  ;;  %v410_v43 = vsel %vm407_vm3, %v5666_v56, %v5676_v35  ;;  %v334_v45 = vsel %vm331_vm4, %v5661_v58, %v5671_v41  ;;  %v5696_v48 = vunpack.i.h.bf16 %v7055_v36 }
  0x93   :  { %v5705_v28 = vunpack.i.l.bf16 %v7072_v49  ;;  %v5701_v52 = vunpack.i.h.bf16 %v5699_v50  ;;  %v5700_v55 = vunpack.i.l.bf16 %v5699_v50  ;;  %v106_v6 = vsel %vm103_vm0, %v5631_v32, %v5636_v29 }
  0x94   :  { %177 = vrot.lane.b32.xlu1 %v7068_v44, %s6733_s9  ;;  %844 = vmatpush1.bf16.msra.mxu1 %v730_v51  ;;  %v258_v33 = vsel %vm255_vm1, %v5646_v40, %v5656_v38  ;;  %v675_v42 = vpack.c.bf16 %v106_v6, %v6794_v1  ;;  %v5691_v51 = vunpack.i.h.bf16 %v7057_v39  ;;  %v5706_v56 = vunpack.i.h.bf16 %v7072_v49 }
  0x95   :  { %101 = vrot.lane.b32.xlu0 %v7068_v44, %s6734_s10  ;;  %v637_v57 = vsel %vm635_vm7, %v5701_v52, %v5705_v28  ;;  %v636_v59 = vsel %vm635_vm7, %v5700_v55, %v5701_v52  ;;  %v769_v55 = vld [vmem:[%s9537_s2] sm:$0xff] }
  0x96   :  { %v7084_v60 = vpop.permute.xlu1 %5713  ;;  %v7086_v61 = vpop.permute.xlu0 %5708  ;;  %v750_v62 = vpack.c.bf16 %v637_v57, %v637_v57  ;;  %v749_v2 = vpack.c.bf16 %v636_v59, %v636_v59 }
  0x97   :  { %v5710_v3 = vunpack.i.l.bf16 %v7086_v61  ;;  %v5715_v17 = vunpack.i.l.bf16 %v7084_v60  ;;  %v5711_v59 = vunpack.i.h.bf16 %v7086_v61 }
  0x98   :  { %329 = vrot.lane.b32.xlu1 %v7068_v44, %s6737_s13  ;;  %5183 = vmatprep.subr.msk.bf16.mxu1 %vm779_vm8, %v750_v62  ;;  %v781_v5 = vsel %vm779_vm8, %v749_v2, 0  ;;  %v713_v62 = vpack.c.bf16 %v410_v43, %v334_v45  ;;  %v562_v2 = vsel %vm559_vm5, %v5686_v22, %v5696_v48  ;;  %v638_v22 = vsel %vm635_vm7, %v5705_v28, %v5706_v56 }
  0x99   :  { %253 = vrot.lane.b32.xlu0 %v7068_v44, %s6735_s11  ;;  %846 = vmatpush1.bf16.msra.mxu1 %v781_v5  ;;  %v107_v23 = vsel %vm103_vm0, %v5636_v29, %v5710_v3  ;;  %v183_v40 = vsel %vm179_vm2, %v5651_v7, %v5715_v17  ;;  %v5716_v43 = vunpack.i.h.bf16 %v7084_v60 }
  0x9a   :  { %v7109_v31 = vpop.permute.xlu1 %5723  ;;  %v7111_v32 = vpop.permute.xlu0 %5718  ;;  %v676_v47 = vpack.c.bf16 %v107_v23, %v6806_v4  ;;  %v182_v4 = vsel %vm179_vm2, %v5641_v34, %v5651_v7 }
  0x9b   :  { %v5720_v25 = vunpack.i.l.bf16 %v7111_v32  ;;  %v5725_v37 = vunpack.i.l.bf16 %v7109_v31  ;;  %v694_v50 = vpack.c.bf16 %v258_v33, %v182_v4 }
  0x9c   :  { %481 = vrot.lane.b32.xlu1 %v7068_v44, %s6739_s15  ;;  %5184 = vmatmul.mubr.msk.bf16.vlgmr.msra.gmra.mrb[0].mxu1 %vm775_vm9, %v7104_v46 }
  0x9d   :  { %405 = vrot.lane.b32.xlu0 %v7068_v44, %s6736_s12  ;;  %878 = vmatprep.subr.bf16.mxu1 %v676_v47  ;;  %v259_v63 = vsel %vm255_vm1, %v5656_v38, %v5720_v25  ;;  %v335_v53 = vsel %vm331_vm4, %v5671_v41, %v5725_v37  ;;  %v486_v38 = vsel %vm483_vm6, %v5681_v24, %v5691_v51 }
  0x9e   :  { %879 = vmatpush1.bf16.msra.mxu1 %v675_v42  ;;  %v7137_v1 = vpop.permute.xlu1 %5733  ;;  %v7139_v30 = vpop.permute.xlu0 %5728  ;;  %v695_v34 = vpack.c.bf16 %v259_v63, %v183_v40  ;;  %910 = vmatprep.mubr.bf16.mxu1 %v9545_v10  ;;  %v108_v41 = vsel %vm103_vm0, %v5710_v3, %v5711_v59  ;;  %v751_v40 = vpack.c.bf16 %v638_v22, %v638_v22  ;;  %v5721_v3 = vunpack.i.h.bf16 %v7111_v32 }
  0x9f   :  { %v5730_v0 = vunpack.i.l.bf16 %v7139_v30  ;;  %v5735_v52 = vunpack.i.l.bf16 %v7137_v1  ;;  %v677_v61 = vpack.c.bf16 %v108_v41, %v6831_v8  ;;  %v5731_v22 = vunpack.i.h.bf16 %v7139_v30 }
  0xa0   :  { %633 = vrot.lane.b32.xlu1 %v7068_v44, %s6741_s20  ;;  %880 = vmatprep.subr.bf16.mxu1 %v695_v34  ;;  %v5726_v41 = vunpack.i.h.bf16 %v7109_v31 }
  0xa1   :  { %557 = vrot.lane.b32.xlu0 %v7068_v44, %s6738_s14  ;;  %v411_v54 = vsel %vm407_vm3, %v5676_v35, %v5730_v0  ;;  %v487_v5 = vsel %vm483_vm6, %v5691_v51, %v5735_v52  ;;  %v732_v35 = vpack.c.bf16 %v562_v2, %v486_v38 }
  0xa2   :  { %881 = vmatpush1.bf16.msra.mxu1 %v694_v50  ;;  %v7163_v58 = vpop.permute.xlu1 %5743  ;;  %v7165_v36 = vpop.permute.xlu0 %5738  ;;  %v714_v39 = vpack.c.bf16 %v411_v54, %v335_v53  ;;  %v336_v30 = vsel %vm331_vm4, %v5725_v37, %v5726_v41 }
  0xa3   :  { %v5745_v29 = vunpack.i.l.bf16 %v7163_v58  ;;  %v5740_v57 = vunpack.i.l.bf16 %v7165_v36 }
  0xa4   :  { %882 = vmatprep.subr.bf16.mxu1 %v714_v39 }
  0xa5   :  { %v563_v6 = vsel %vm559_vm5, %v5696_v48, %v5740_v57  ;;  %772 = vperm.xlu0 %5987, %v769_v55   ;;  %v639_v16 = vsel %vm635_vm7, %v5706_v56, %v5745_v29 }
  0xa6   :  { %883 = vmatpush1.bf16.msra.mxu1 %v713_v62  ;;  %v7185_v7 = vpop.permute.xlu1 %5753  ;;  %v5749_v23 = vpop.permute.xlu0 %5748  ;;  %v733_v11 = vpack.c.bf16 %v563_v6, %v487_v5  ;;  %v752_v42 = vpack.c.bf16 %v639_v16, %v639_v16 }
  0xa7   :  { %v5755_v24 = vunpack.i.l.bf16 %v7185_v7  ;;  %v5751_v47 = vunpack.i.h.bf16 %v5749_v23  ;;  %v5750_v33 = vunpack.i.l.bf16 %v5749_v23 }
  0xa8   :  { %884 = vmatprep.subr.bf16.mxu1 %v733_v11 }
  0xa9   :  { %v109_v4 = vsel %vm103_vm0, %v5711_v59, %v5750_v33  ;;  %v111_v34 = vsel %vm103_vm0, %v5751_v47, %v5755_v24  ;;  %v110_v50 = vsel %vm103_vm0, %v5750_v33, %v5751_v47  ;;  %v184_v59 = vsel %vm179_vm2, %v5715_v17, %v5716_v43 }
  0xaa   :  { %885 = vmatpush1.bf16.msra.mxu1 %v732_v35  ;;  %v7198_v63 = vpop.permute.xlu1 %5763  ;;  %v5759_v49 = vpop.permute.xlu0 %5758  ;;  %v678_v28 = vpack.c.bf16 %v109_v4, %v6836_v9  ;;  %v787_v9 = vsel %vm779_vm8, %v751_v40, 0  ;;  %v680_v53 = vpack.c.bf16 %v111_v34, %v6870_v15  ;;  %v679_v2 = vpack.c.bf16 %v110_v50, %v6865_v14 }
  0xab   :  { %5185 = vmatprep.subr.msk.bf16.mxu1 %vm779_vm8, %v752_v42  ;;  %v5761_v45 = vunpack.i.h.bf16 %v5759_v49  ;;  %v5760_v48 = vunpack.i.l.bf16 %v5759_v49  ;;  %v5765_v51 = vunpack.i.l.bf16 %v7198_v63  ;;  %v260_v15 = vsel %vm255_vm1, %v5720_v25, %v5721_v3 }
  0xac   :  { %919 = vmatprep.subr.bf16.mxu0 %v678_v28  ;;  %v696_v16 = vpack.c.bf16 %v260_v15, %v184_v59  ;;  %v5746_v59 = vunpack.i.h.bf16 %v7163_v58 }
  0xad   :  { %920 = vmatpush1.bf16.msra.mxu0 %v677_v61  ;;  %v186_v62 = vsel %vm179_vm2, %v5760_v48, %v5761_v45  ;;  %v185_v38 = vsel %vm179_vm2, %v5716_v43, %v5760_v48  ;;  %v187_v60 = vsel %vm179_vm2, %v5761_v45, %v5765_v51  ;;  %v412_v61 = vsel %vm407_vm3, %v5730_v0, %v5731_v22 }
  0xae   :  { %887 = vmatpush1.bf16.msra.mxu1 %v787_v9  ;;  %v7212_v54 = vpop.permute.xlu1 %5773  ;;  %v5769_v56 = vpop.permute.xlu0 %5768 }
  0xaf   :  { %v5775_v8 = vunpack.i.l.bf16 %v7212_v54  ;;  %v5771_v39 = vunpack.i.h.bf16 %v5769_v56  ;;  %v5770_v55 = vunpack.i.l.bf16 %v5769_v56  ;;  %960 = vmatprep.subr.bf16.mxu1 %v680_v53 }
  0xb1   :  { %v262_v5 = vsel %vm255_vm1, %v5770_v55, %v5771_v39  ;;  %5186 = vmatmul.mubr.msk.bf16.vlgmr.msra.gmra.mrb[4].mxu1 %vm775_vm9, %v7104_v46  ;;  %v261_v6 = vsel %vm255_vm1, %v5721_v3, %v5770_v55  ;;  %v263_v14 = vsel %vm255_vm1, %v5771_v39, %v5775_v8  ;;  %v715_v55 = vpack.c.bf16 %v412_v61, %v336_v30 }
  0xb2   :  { %961 = vmatpush1.bf16.msra.mxu1 %v679_v2  ;;  %v7234_v17 = vpop.permute.xlu1 %5783  ;;  %v5779_v32 = vpop.permute.xlu0 %5778  ;;  %v697_v25 = vpack.c.bf16 %v261_v6, %v185_v38  ;;  %v699_v23 = vpack.c.bf16 %v263_v14, %v187_v60  ;;  %v698_v11 = vpack.c.bf16 %v262_v5, %v186_v62  ;;  %992 = vmatprep.mubr.bf16.mxu1 %v9545_v10  ;;  %v5741_v62 = vunpack.i.h.bf16 %v7165_v36 }
  0xb3   :  { %v5781_v47 = vunpack.i.h.bf16 %v5779_v32  ;;  %v5780_v33 = vunpack.i.l.bf16 %v5779_v32  ;;  %v5785_v35 = vunpack.i.l.bf16 %v7234_v17  ;;  %v5736_v5 = vunpack.i.h.bf16 %v7137_v1 }
  0xb4   :  { %921 = vmatprep.subr.bf16.mxu0 %v697_v25  ;;  %962 = vmatprep.subr.bf16.mxu1 %v699_v23  ;;  %v564_v23 = vsel %vm559_vm5, %v5740_v57, %v5741_v62  ;;  %v5756_v61 = vunpack.i.h.bf16 %v7185_v7 }
  0xb5   :  { %922 = vmatpush1.bf16.msra.mxu0 %v696_v16  ;;  %v338_v34 = vsel %vm331_vm4, %v5780_v33, %v5781_v47  ;;  %v337_v43 = vsel %vm331_vm4, %v5726_v41, %v5780_v33  ;;  %v339_v48 = vsel %vm331_vm4, %v5781_v47, %v5785_v35  ;;  %v488_v58 = vsel %vm483_vm6, %v5735_v52, %v5736_v5 }
  0xb6   :  { %963 = vmatpush1.bf16.msra.mxu1 %v698_v11  ;;  %v7240_v42 = vpop.permute.xlu1 %5793  ;;  %v5789_v4 = vpop.permute.xlu0 %5788  ;;  %v640_v11 = vsel %vm635_vm7, %v5745_v29, %v5746_v59 }
  0xb7   :  { %v5795_v40 = vunpack.i.l.bf16 %v7240_v42  ;;  %v5791_v49 = vunpack.i.h.bf16 %v5789_v4  ;;  %v5790_v28 = vunpack.i.l.bf16 %v5789_v4 }
  0xb9   :  { %v414_v3 = vsel %vm407_vm3, %v5790_v28, %v5791_v49  ;;  %v413_v45 = vsel %vm407_vm3, %v5731_v22, %v5790_v28  ;;  %v415_v50 = vsel %vm407_vm3, %v5791_v49, %v5795_v40 }
  0xba   :  { %v7256_v9 = vpop.permute.xlu1 %5803  ;;  %v5799_v53 = vpop.permute.xlu0 %5798  ;;  %v716_v56 = vpack.c.bf16 %v413_v45, %v337_v43  ;;  %v718_v39 = vpack.c.bf16 %v415_v50, %v339_v48  ;;  %v717_v0 = vpack.c.bf16 %v414_v3, %v338_v34  ;;  %v734_v43 = vpack.c.bf16 %v564_v23, %v488_v58 }
  0xbb   :  { %v5801_v2 = vunpack.i.h.bf16 %v5799_v53  ;;  %v5800_v38 = vunpack.i.l.bf16 %v5799_v53  ;;  %v5805_v15 = vunpack.i.l.bf16 %v7256_v9  ;;  %v753_v3 = vpack.c.bf16 %v640_v11, %v640_v11 }
  0xbc   :  { %923 = vmatprep.subr.bf16.mxu0 %v716_v56  ;;  %964 = vmatprep.subr.bf16.mxu1 %v718_v39 }
  0xbd   :  { %924 = vmatpush1.bf16.msra.mxu0 %v715_v55  ;;  %965 = vmatpush1.bf16.msra.mxu1 %v717_v0  ;;  %v490_v32 = vsel %vm483_vm6, %v5800_v38, %v5801_v2  ;;  %v489_v25 = vsel %vm483_vm6, %v5736_v5, %v5800_v38  ;;  %v491_v47 = vsel %vm483_vm6, %v5801_v2, %v5805_v15 }
  0xbe   :  { %v7265_v6 = vpop.permute.xlu1 %5813  ;;  %v5809_v31 = vpop.permute.xlu0 %5808 }
  0xbf   :  { %v5815_v37 = vunpack.i.l.bf16 %v7265_v6  ;;  %v5811_v60 = vunpack.i.h.bf16 %v5809_v31  ;;  %v5810_v14 = vunpack.i.l.bf16 %v5809_v31 }
  0xc1   :  { %v566_v16 = vsel %vm559_vm5, %v5810_v14, %v5811_v60  ;;  %v565_v22 = vsel %vm559_vm5, %v5741_v62, %v5810_v14  ;;  %v567_v33 = vsel %vm559_vm5, %v5811_v60, %v5815_v37  ;;  %v793_v62 = vsel %vm779_vm8, %v753_v3, 0 }
  0xc2   :  { %v7284_v41 = vpop.permute.xlu1 %5823  ;;  %v5819_v36 = vpop.permute.xlu0 %5818  ;;  %v735_v57 = vpack.c.bf16 %v565_v22, %v489_v25  ;;  %v737_v4 = vpack.c.bf16 %v567_v33, %v491_v47  ;;  %v736_v29 = vpack.c.bf16 %v566_v16, %v490_v32  ;;  %v5776_v25 = vunpack.i.h.bf16 %v7212_v54 }
  0xc3   :  { %v5825_v49 = vunpack.i.l.bf16 %v7284_v41  ;;  %v5821_v28 = vunpack.i.h.bf16 %v5819_v36  ;;  %v5820_v34 = vunpack.i.l.bf16 %v5819_v36  ;;  %v5766_v22 = vunpack.i.h.bf16 %v7198_v63 }
  0xc4   :  { %925 = vmatprep.subr.bf16.mxu0 %v735_v57  ;;  %966 = vmatprep.subr.bf16.mxu1 %v737_v4  ;;  %v5786_v63 = vunpack.i.h.bf16 %v7234_v17  ;;  %v5806_v17 = vunpack.i.h.bf16 %v7256_v9 }
  0xc5   :  { %926 = vmatpush1.bf16.msra.mxu0 %v734_v43  ;;  %967 = vmatpush1.bf16.msra.mxu1 %v736_v29  ;;  %v641_v45 = vsel %vm635_vm7, %v5746_v59, %v5820_v34  ;;  %v643_v1 = vsel %vm635_vm7, %v5821_v28, %v5825_v49  ;;  %v642_v52 = vsel %vm635_vm7, %v5820_v34, %v5821_v28 }
  0xc6   :  { %v7296_v48 = vpop.permute.xlu1 %5833  ;;  %v5829_v50 = vpop.permute.xlu0 %5828  ;;  %v754_v53 = vpack.c.bf16 %v641_v45, %v641_v45  ;;  %v756_v56 = vpack.c.bf16 %v643_v1, %v643_v1  ;;  %v755_v39 = vpack.c.bf16 %v642_v52, %v642_v52  ;;  %v112_v59 = vsel %vm103_vm0, %v5755_v24, %v5756_v61 }
  0xc7   :  { %v5835_v30 = vunpack.i.l.bf16 %v7296_v48  ;;  %v5831_v0 = vunpack.i.h.bf16 %v5829_v50  ;;  %v5830_v55 = vunpack.i.l.bf16 %v5829_v50  ;;  %v681_v14 = vpack.c.bf16 %v112_v59, %v6855_v12 }
  0xc8   :  { %5187 = vmatprep.subr.msk.bf16.mxu0 %vm779_vm8, %v754_v53  ;;  %5189 = vmatprep.subr.msk.bf16.mxu1 %vm779_vm8, %v756_v56  ;;  %v799_v2 = vsel %vm779_vm8, %v755_v39, 0  ;;  %v5796_v52 = vunpack.i.h.bf16 %v7240_v42  ;;  %v340_v42 = vsel %vm331_vm4, %v5785_v35, %v5786_v63 }
  0xc9   :  { %v114_v38 = vsel %vm103_vm0, %v5830_v55, %v5831_v0  ;;  %928 = vmatpush1.bf16.msra.mxu0 %v793_v62  ;;  %969 = vmatpush1.bf16.msra.mxu1 %v799_v2  ;;  %v113_v5 = vsel %vm103_vm0, %v5756_v61, %v5830_v55  ;;  %v115_v24 = vsel %vm103_vm0, %v5831_v0, %v5835_v30 }
  0xca   :  { %v7308_v31 = vpop.permute.xlu1 %5843  ;;  %v5839_v60 = vpop.permute.xlu0 %5838  ;;  %v682_v7 = vpack.c.bf16 %v113_v5, %v6860_v13  ;;  %v683_v32 = vpack.c.bf16 %v114_v38, %v6905_v20  ;;  %v684_v13 = vpack.c.bf16 %v115_v24, %v6910_v21  ;;  %v264_v21 = vsel %vm255_vm1, %v5775_v8, %v5776_v25 }
  0xcb   :  { %v5841_v23 = vunpack.i.h.bf16 %v5839_v60  ;;  %v5840_v11 = vunpack.i.l.bf16 %v5839_v60  ;;  %v5845_v16 = vunpack.i.l.bf16 %v7308_v31  ;;  %v188_v8 = vsel %vm179_vm2, %v5765_v51, %v5766_v22 }
  0xcc   :  { %5188 = vmatmul.mubr.msk.bf16.vlgmr.msra.gmra.mrb[0].mxu0 %vm775_vm9, %v7104_v46  ;;  %5190 = vmatmul.mubr.msk.bf16.vlgmr.msra.gmra.mrb[8].mxu1 %vm775_vm9, %v7104_v46  ;;  %v700_v1 = vpack.c.bf16 %v264_v21, %v188_v8  ;;  %v416_v62 = vsel %vm407_vm3, %v5795_v40, %v5796_v52 }
  0xcd   :  { %1001 = vmatprep.subr.bf16.mxu0 %v682_v7  ;;  %1042 = vmatprep.subr.bf16.mxu1 %v684_v13  ;;  %v190_v57 = vsel %vm179_vm2, %v5840_v11, %v5841_v23  ;;  %v189_v4 = vsel %vm179_vm2, %v5766_v22, %v5840_v11  ;;  %v191_v28 = vsel %vm179_vm2, %v5841_v23, %v5845_v16  ;;  %v5816_v13 = vunpack.i.h.bf16 %v7265_v6 }
  0xce   :  { %1002 = vmatpush1.bf16.msra.mxu0 %v681_v14  ;;  %v7324_v12 = vpop.permute.xlu1 %5853  ;;  %v5849_v20 = vpop.permute.xlu0 %5848  ;;  %1043 = vmatpush1.bf16.msra.mxu1 %v683_v32  ;;  %v719_v11 = vpack.c.bf16 %v416_v62, %v340_v42  ;;  %v5826_v22 = vunpack.i.h.bf16 %v7284_v41 }
  0xcf   :  { %v5855_v47 = vunpack.i.l.bf16 %v7324_v12  ;;  %v5851_v33 = vunpack.i.h.bf16 %v5849_v20  ;;  %v5850_v36 = vunpack.i.l.bf16 %v5849_v20  ;;  %1033 = vmatprep.mubr.bf16.mxu0 %v9545_v10  ;;  %1074 = vmatprep.mubr.bf16.mxu1 %v9545_v10 }
  0xd0   :  { %v644_v8 = vsel %vm635_vm7, %v5825_v49, %v5826_v22 }
  0xd1   :  { %v266_v58 = vsel %vm255_vm1, %v5850_v36, %v5851_v33  ;;  %v265_v29 = vsel %vm255_vm1, %v5776_v25, %v5850_v36  ;;  %v267_v54 = vsel %vm255_vm1, %v5851_v33, %v5855_v47 }
  0xd2   :  { %v7345_v34 = vpop.permute.xlu1 %5863  ;;  %v5859_v43 = vpop.permute.xlu0 %5858  ;;  %v701_v61 = vpack.c.bf16 %v265_v29, %v189_v4  ;;  %v703_v3 = vpack.c.bf16 %v267_v54, %v191_v28  ;;  %v702_v45 = vpack.c.bf16 %v266_v58, %v190_v57  ;;  %v568_v29 = vsel %vm559_vm5, %v5815_v37, %v5816_v13 }
  0xd3   :  { %v5861_v50 = vunpack.i.h.bf16 %v5859_v43  ;;  %v5860_v53 = vunpack.i.l.bf16 %v5859_v43  ;;  %v5865_v56 = vunpack.i.l.bf16 %v7345_v34  ;;  %v492_v37 = vsel %vm483_vm6, %v5805_v15, %v5806_v17 }
  0xd4   :  { %1003 = vmatprep.subr.bf16.mxu0 %v701_v61  ;;  %1044 = vmatprep.subr.bf16.mxu1 %v703_v3 }
  0xd5   :  { %1004 = vmatpush1.bf16.msra.mxu0 %v700_v1  ;;  %1045 = vmatpush1.bf16.msra.mxu1 %v702_v45  ;;  %v342_v2 = vsel %vm331_vm4, %v5860_v53, %v5861_v50  ;;  %v341_v38 = vsel %vm331_vm4, %v5786_v63, %v5860_v53  ;;  %v343_v7 = vsel %vm331_vm4, %v5861_v50, %v5865_v56 }
  0xd6   :  { %v7350_v51 = vpop.permute.xlu1 %5873  ;;  %v5869_v39 = vpop.permute.xlu0 %5868 }
  0xd7   :  { %v5875_v0 = vunpack.i.l.bf16 %v7350_v51  ;;  %v5871_v55 = vunpack.i.h.bf16 %v5869_v39  ;;  %v5870_v59 = vunpack.i.l.bf16 %v5869_v39  ;;  %v738_v39 = vpack.c.bf16 %v568_v29, %v492_v37 }
  0xd9   :  { %v418_v5 = vsel %vm407_vm3, %v5870_v59, %v5871_v55  ;;  %v417_v60 = vsel %vm407_vm3, %v5796_v52, %v5870_v59  ;;  %v419_v24 = vsel %vm407_vm3, %v5871_v55, %v5875_v0  ;;  %v757_v55 = vpack.c.bf16 %v644_v8, %v644_v8 }
  0xda   :  { %v7369_v40 = vpop.permute.xlu1 %5883  ;;  %v5879_v14 = vpop.permute.xlu0 %5878  ;;  %v720_v32 = vpack.c.bf16 %v417_v60, %v341_v38  ;;  %v722_v25 = vpack.c.bf16 %v419_v24, %v343_v7  ;;  %v721_v23 = vpack.c.bf16 %v418_v5, %v342_v2  ;;  %v5836_v59 = vunpack.i.h.bf16 %v7296_v48 }
  0xdb   :  { %v5881_v20 = vunpack.i.h.bf16 %v5879_v14  ;;  %v5880_v33 = vunpack.i.l.bf16 %v5879_v14  ;;  %v5885_v36 = vunpack.i.l.bf16 %v7369_v40 }
  0xdc   :  { %1005 = vmatprep.subr.bf16.mxu0 %v720_v32  ;;  %1046 = vmatprep.subr.bf16.mxu1 %v722_v25  ;;  %v805_v32 = vsel %vm779_vm8, %v757_v55, 0  ;;  %v5876_v55 = vunpack.i.h.bf16 %v7350_v51 }
  0xdd   :  { %1006 = vmatpush1.bf16.msra.mxu0 %v719_v11  ;;  %1047 = vmatpush1.bf16.msra.mxu1 %v721_v23  ;;  %v494_v28 = vsel %vm483_vm6, %v5880_v33, %v5881_v20  ;;  %v493_v54 = vsel %vm483_vm6, %v5806_v17, %v5880_v33  ;;  %v495_v3 = vsel %vm483_vm6, %v5881_v20, %v5885_v36 }
  0xde   :  { %v7375_v35 = vpop.permute.xlu1 %5893  ;;  %v5889_v21 = vpop.permute.xlu0 %5888  ;;  %v116_v23 = vsel %vm103_vm0, %v5835_v30, %v5836_v59 }
  0xdf   :  { %v5895_v57 = vunpack.i.l.bf16 %v7375_v35  ;;  %v5891_v4 = vunpack.i.h.bf16 %v5889_v21  ;;  %v5890_v58 = vunpack.i.l.bf16 %v5889_v21  ;;  %v685_v30 = vpack.c.bf16 %v116_v23, %v6895_v18 }
  0xe1   :  { %v570_v43 = vsel %vm559_vm5, %v5890_v58, %v5891_v4  ;;  %v569_v61 = vsel %vm559_vm5, %v5816_v13, %v5890_v58  ;;  %v571_v6 = vsel %vm559_vm5, %v5891_v4, %v5895_v57  ;;  %v5856_v4 = vunpack.i.h.bf16 %v7324_v12 }
  0xe2   :  { %v7397_v45 = vpop.permute.xlu1 %5903  ;;  %v5899_v41 = vpop.permute.xlu0 %5898  ;;  %v739_v49 = vpack.c.bf16 %v569_v61, %v493_v54  ;;  %v741_v1 = vpack.c.bf16 %v571_v6, %v495_v3  ;;  %v740_v52 = vpack.c.bf16 %v570_v43, %v494_v28  ;;  %v5846_v28 = vunpack.i.h.bf16 %v7308_v31 }
  0xe3   :  { %v5905_v50 = vunpack.i.l.bf16 %v7397_v45  ;;  %v5901_v53 = vunpack.i.h.bf16 %v5899_v41  ;;  %v5900_v63 = vunpack.i.l.bf16 %v5899_v41  ;;  %v268_v43 = vsel %vm255_vm1, %v5855_v47, %v5856_v4 }
  0xe4   :  { %1007 = vmatprep.subr.bf16.mxu0 %v739_v49  ;;  %1048 = vmatprep.subr.bf16.mxu1 %v741_v1  ;;  %v192_v12 = vsel %vm179_vm2, %v5845_v16, %v5846_v28  ;;  %v5866_v16 = vunpack.i.h.bf16 %v7345_v34 }
  0xe5   :  { %1008 = vmatpush1.bf16.msra.mxu0 %v738_v39  ;;  %1049 = vmatpush1.bf16.msra.mxu1 %v740_v52  ;;  %v645_v9 = vsel %vm635_vm7, %v5826_v22, %v5900_v63  ;;  %v647_v15 = vsel %vm635_vm7, %v5901_v53, %v5905_v50  ;;  %v646_v62 = vsel %vm635_vm7, %v5900_v63, %v5901_v53 }
  0xe6   :  { %v7406_v2 = vpop.permute.xlu1 %5913  ;;  %v5909_v38 = vpop.permute.xlu0 %5908  ;;  %v758_v5 = vpack.c.bf16 %v645_v9, %v645_v9  ;;  %v760_v60 = vpack.c.bf16 %v647_v15, %v647_v15  ;;  %v759_v7 = vpack.c.bf16 %v646_v62, %v646_v62  ;;  %v704_v63 = vpack.c.bf16 %v268_v43, %v192_v12 }
  0xe7   :  { %v5915_v24 = vunpack.i.l.bf16 %v7406_v2  ;;  %v5911_v42 = vunpack.i.h.bf16 %v5909_v38  ;;  %v5910_v14 = vunpack.i.l.bf16 %v5909_v38 }
  0xe8   :  { %5191 = vmatprep.subr.msk.bf16.mxu0 %vm779_vm8, %v758_v5  ;;  %5193 = vmatprep.subr.msk.bf16.mxu1 %vm779_vm8, %v760_v60  ;;  %v811_v25 = vsel %vm779_vm8, %v759_v7, 0  ;;  %v420_v7 = vsel %vm407_vm3, %v5875_v0, %v5876_v55  ;;  %v344_v0 = vsel %vm331_vm4, %v5865_v56, %v5866_v16 }
  0xe9   :  { %v118_v11 = vsel %vm103_vm0, %v5910_v14, %v5911_v42  ;;  %1010 = vmatpush1.bf16.msra.mxu0 %v805_v32  ;;  %1051 = vmatpush1.bf16.msra.mxu1 %v811_v25  ;;  %v117_v13 = vsel %vm103_vm0, %v5836_v59, %v5910_v14  ;;  %v119_v17 = vsel %vm103_vm0, %v5911_v42, %v5915_v24  ;;  %v5896_v42 = vunpack.i.h.bf16 %v7375_v35 }
  0xea   :  { %v7418_v22 = vpop.permute.xlu1 %5923  ;;  %v5919_v20 = vpop.permute.xlu0 %5918  ;;  %v686_v33 = vpack.c.bf16 %v117_v13, %v6900_v19  ;;  %v687_v21 = vpack.c.bf16 %v118_v11, %v6941_v26  ;;  %v688_v48 = vpack.c.bf16 %v119_v17, %v6946_v27 }
  0xeb   :  { %v5920_v58 = vunpack.i.l.bf16 %v5919_v20  ;;  %v5925_v19 = vunpack.i.l.bf16 %v7418_v22  ;;  %v5921_v29 = vunpack.i.h.bf16 %v5919_v20  ;;  %v572_v34 = vsel %vm559_vm5, %v5895_v57, %v5896_v42 }
  0xec   :  { %5192 = vmatmul.mubr.msk.bf16.vlgmr.msra.gmra.mrb[4].mxu0 %vm775_vm9, %v7104_v46  ;;  %5194 = vmatmul.mubr.msk.bf16.vlgmr.msra.gmra.mrb[12].mxu1 %vm775_vm9, %v7104_v46 }
  0xed   :  { %1083 = vmatprep.subr.bf16.mxu0 %v686_v33  ;;  %1124 = vmatprep.subr.bf16.mxu1 %v688_v48  ;;  %v193_v61 = vsel %vm179_vm2, %v5846_v28, %v5920_v58  ;;  %v195_v41 = vsel %vm179_vm2, %v5921_v29, %v5925_v19  ;;  %v194_v47 = vsel %vm179_vm2, %v5920_v58, %v5921_v29 }
  0xee   :  { %1084 = vmatpush1.bf16.msra.mxu0 %v685_v30  ;;  %v7433_v26 = vpop.permute.xlu1 %5933  ;;  %1125 = vmatpush1.bf16.msra.mxu1 %v687_v21  ;;  %v5886_v21 = vunpack.i.h.bf16 %v7369_v40  ;;  %v723_v48 = vpack.c.bf16 %v420_v7, %v344_v0  ;;  %v6730_v0 = vld [vmem:[%s9535_s0 + $0x88] sm:$0xff] }
  0xef   :  { %v5935_v54 = vunpack.i.l.bf16 %v7433_v26  ;;  %v5929_v8 = vpop.permute.xlu0 %5928  ;;  %1115 = vmatprep.mubr.bf16.mxu0 %v9545_v10  ;;  %1156 = vmatprep.mubr.bf16.mxu1 %v9545_v10 }
  0xf0   :  { %v5931_v18 = vunpack.i.h.bf16 %v5929_v8  ;;  %v5930_v27 = vunpack.i.l.bf16 %v5929_v8 }
  0xf2   :  { %v270_v3 = vsel %vm255_vm1, %v5930_v27, %v5931_v18  ;;  %v7444_v6 = vpop.permute.xlu1 %5943  ;;  %v269_v37 = vsel %vm255_vm1, %v5856_v4, %v5930_v27  ;;  %v271_v49 = vsel %vm255_vm1, %v5931_v18, %v5935_v54  ;;  %v5906_v4 = vunpack.i.h.bf16 %v7397_v45 }
  0xf3   :  { %v5939_v1 = vpop.permute.xlu0 %5938  ;;  %v705_v52 = vpack.c.bf16 %v269_v37, %v193_v61  ;;  %v707_v53 = vpack.c.bf16 %v271_v49, %v195_v41  ;;  %v706_v39 = vpack.c.bf16 %v270_v3, %v194_v47  ;;  %v5945_v9 = vunpack.i.l.bf16 %v7444_v6 }
  0xf4   :  { %v5940_v59 = vunpack.i.l.bf16 %v5939_v1  ;;  %v5941_v15 = vunpack.i.h.bf16 %v5939_v1  ;;  %v496_v27 = vsel %vm483_vm6, %v5885_v36, %v5886_v21  ;;  %v648_v57 = vsel %vm635_vm7, %v5905_v50, %v5906_v4 }
  0xf5   :  { %1085 = vmatprep.subr.bf16.mxu0 %v705_v52  ;;  %1126 = vmatprep.subr.bf16.mxu1 %v707_v53  ;;  %v742_v3 = vpack.c.bf16 %v572_v34, %v496_v27  ;;  %v5916_v52 = vunpack.i.h.bf16 %v7406_v2  ;;  %v5926_v2 = vunpack.i.h.bf16 %v7418_v22 }
  0xf6   :  { %1086 = vmatpush1.bf16.msra.mxu0 %v704_v63  ;;  %1127 = vmatpush1.bf16.msra.mxu1 %v706_v39  ;;  %v7459_v31 = vpop.permute.xlu1 %5953  ;;  %v345_v14 = vsel %vm331_vm4, %v5866_v16, %v5940_v59  ;;  %v347_v11 = vsel %vm331_vm4, %v5941_v15, %v5945_v9  ;;  %v346_v13 = vsel %vm331_vm4, %v5940_v59, %v5941_v15 }
  0xf7   :  { %v5955_v62 = vunpack.i.l.bf16 %v7459_v31  ;;  %v5949_v38 = vpop.permute.xlu0 %5948  ;;  %v5956_v34 = vunpack.i.h.bf16 %v7459_v31 }
  0xf8   :  { %v5951_v5 = vunpack.i.h.bf16 %v5949_v38  ;;  %v5950_v60 = vunpack.i.l.bf16 %v5949_v38 }
  0xf9   :  { %v424_v22 = vsel %vm407_vm3, %v5955_v62, %v5956_v34 }
  0xfa   :  { %v422_v32 = vsel %vm407_vm3, %v5950_v60, %v5951_v5  ;;  %v7469_v25 = vpop.permute.xlu1 %5963  ;;  %v421_v23 = vsel %vm407_vm3, %v5876_v55, %v5950_v60  ;;  %v423_v51 = vsel %vm407_vm3, %v5951_v5, %v5955_v62  ;;  %v761_v55 = vpack.c.bf16 %v648_v57, %v648_v57 }
  0xfb   :  { %v5959_v20 = vpop.permute.xlu0 %5958  ;;  %v724_v33 = vpack.c.bf16 %v421_v23, %v345_v14  ;;  %v726_v17 = vpack.c.bf16 %v423_v51, %v347_v11  ;;  %v725_v30 = vpack.c.bf16 %v422_v32, %v346_v13  ;;  %v5965_v56 = vunpack.i.l.bf16 %v7469_v25 }
  0xfc   :  { %v5960_v58 = vunpack.i.l.bf16 %v5959_v20  ;;  %v5961_v29 = vunpack.i.h.bf16 %v5959_v20  ;;  %v120_v14 = vsel %vm103_vm0, %v5915_v24, %v5916_v52  ;;  %v5936_v32 = vunpack.i.h.bf16 %v7433_v26 }
  0xfd   :  { %1087 = vmatprep.subr.bf16.mxu0 %v724_v33  ;;  %1128 = vmatprep.subr.bf16.mxu1 %v726_v17  ;;  %v817_v11 = vsel %vm779_vm8, %v761_v55, 0  ;;  %v9543_v33 = vmov 0.0   ;;  %v6731_v17 = vld [vmem:[%s9535_s0 + $0x80] sm:$0xff]  ;;  %v196_v26 = vsel %vm179_vm2, %v5925_v19, %v5926_v2 }
  0xfe   :  { %1088 = vmatpush1.bf16.msra.mxu0 %v723_v48  ;;  %1129 = vmatpush1.bf16.msra.mxu1 %v725_v30  ;;  %v7488_v28 = vpop.permute.xlu1 %5973  ;;  %v497_v35 = vsel %vm483_vm6, %v5886_v21, %v5960_v58  ;;  %v499_v40 = vsel %vm483_vm6, %v5961_v29, %v5965_v56  ;;  %v498_v12 = vsel %vm483_vm6, %v5960_v58, %v5961_v29 }
  0xff   :  { %v5975_v8 = vunpack.i.l.bf16 %v7488_v28  ;;  %v5969_v18 = vpop.permute.xlu0 %5968  ;;  %v689_v21 = vpack.c.bf16 %v120_v14, %v6731_v17  ;;  %v272_v48 = vsel %vm255_vm1, %v5935_v54, %v5936_v32  ;;  %v5946_v54 = vunpack.i.h.bf16 %v7444_v6 }
 0x100   :  { %v5971_v43 = vunpack.i.h.bf16 %v5969_v18  ;;  %v5970_v61 = vunpack.i.l.bf16 %v5969_v18  ;;  %v708_v27 = vpack.c.bf16 %v272_v48, %v196_v26  ;;  %v5976_v19 = vunpack.i.h.bf16 %v7488_v28 }
 0x102   :  { %v574_v37 = vsel %vm559_vm5, %v5970_v61, %v5971_v43  ;;  %v7499_v41 = vpop.permute.xlu1 %5983  ;;  %v573_v49 = vsel %vm559_vm5, %v5896_v42, %v5970_v61  ;;  %v575_v36 = vsel %vm559_vm5, %v5971_v43, %v5975_v8 }
 0x103   :  { %v5985_v45 = vunpack.i.l.bf16 %v7499_v41  ;;  %v5979_v47 = vpop.permute.xlu0 %5978  ;;  %v743_v50 = vpack.c.bf16 %v573_v49, %v497_v35  ;;  %v745_v1 = vpack.c.bf16 %v575_v36, %v499_v40  ;;  %v744_v39 = vpack.c.bf16 %v574_v37, %v498_v12 }
 0x104   :  { %v5981_v53 = vunpack.i.h.bf16 %v5979_v47  ;;  %v5980_v63 = vunpack.i.l.bf16 %v5979_v47  ;;  %v5986_v57 = vunpack.i.h.bf16 %v7499_v41  ;;  %v348_v37 = vsel %vm331_vm4, %v5945_v9, %v5946_v54 }
 0x105   :  { %1089 = vmatprep.subr.bf16.mxu0 %v743_v50  ;;  %1130 = vmatprep.subr.bf16.mxu1 %v745_v1  ;;  %v727_v12 = vpack.c.bf16 %v424_v22, %v348_v37  ;;  %v576_v47 = vsel %vm559_vm5, %v5975_v8, %v5976_v19 }
 0x106   :  { %1090 = vmatpush1.bf16.msra.mxu0 %v742_v3  ;;  %1131 = vmatpush1.bf16.msra.mxu1 %v744_v39  ;;  %v178_v59 = vpop.permute.xlu1 %177  ;;  %v649_v15 = vsel %vm635_vm7, %v5906_v4, %v5980_v63  ;;  %v651_v16 = vsel %vm635_vm7, %v5981_v53, %v5985_v45  ;;  %v650_v38 = vsel %vm635_vm7, %v5980_v63, %v5981_v53  ;;  %v5966_v3 = vunpack.i.h.bf16 %v7469_v25 }
 0x107   :  { %v102_v5 = vpop.permute.xlu0 %101  ;;  %v762_v60 = vpack.c.bf16 %v649_v15, %v649_v15  ;;  %v764_v7 = vpack.c.bf16 %v651_v16, %v651_v16  ;;  %v763_v42 = vpack.c.bf16 %v650_v38, %v650_v38  ;;  %v197_v30 = vsel %vm179_vm2, %v5926_v2, %v178_v59 }
 0x108   :  { %v121_v23 = vsel %vm103_vm0, %v5916_v52, %v102_v5  ;;  %v691_v4 = vpack.c.bf16 %v102_v5, %v7068_v44  ;;  %v652_v9 = vsel %vm635_vm7, %v5985_v45, %v5986_v57  ;;  %v500_v1 = vsel %vm483_vm6, %v5965_v56, %v5966_v3  ;;  %v6732_v56 = vld [vmem:[%s9536_s1] sm:$0xf] }
 0x109   :  { %5195 = vmatprep.subr.msk.bf16.mxu0 %vm779_vm8, %v762_v60  ;;  %5197 = vmatprep.subr.msk.bf16.mxu1 %vm779_vm8, %v764_v7  ;;  %v823_v51 = vsel %vm779_vm8, %v763_v42, 0  ;;  %v690_v13 = vpack.c.bf16 %v121_v23, %v6730_v0  ;;  %v746_v53 = vpack.c.bf16 %v576_v47, %v500_v1  ;;  %v765_v63 = vpack.c.bf16 %v652_v9, %v652_v9 }
 0x10a   :  { %1092 = vmatpush1.bf16.msra.mxu0 %v817_v11  ;;  %1133 = vmatpush1.bf16.msra.mxu1 %v823_v51  ;;  %v330_v24 = vpop.permute.xlu1 %329  ;;  %v1423_v2 = vlaneseq }
 0x10b   :  { %v254_v20 = vpop.permute.xlu0 %253  ;;  %1165 = vmatprep.subr.bf16.mxu0 %v690_v13  ;;  %5580 = vmatprep.subr.bf16.mxu1 %v9543_v33  ;;  %v349_v43 = vsel %vm331_vm4, %v5946_v54, %v330_v24  ;;  %v829_v25 = vsel %vm779_vm8, %v765_v63, 0 }
 0x10c   :  { %v273_v58 = vsel %vm255_vm1, %v5936_v32, %v254_v20  ;;  %v710_v61 = vpack.c.bf16 %v254_v20, %v178_v59 }
 0x10d   :  { %5196 = vmatmul.mubr.msk.bf16.vlgmr.msra.gmra.mrb[8].mxu0 %vm775_vm9, %v7104_v46  ;;  %5198 = vmatmul.mubr.msk.bf16.vlgmr.msra.gmra.mrb[16].mxu1 %vm775_vm9, %v7104_v46  ;;  %v709_v29 = vpack.c.bf16 %v273_v58, %v197_v30  ;;  %v7600_v58 = vshrl.u32 %v1423_v2, 7 }
 0x10e   :  { %1166 = vmatpush1.bf16.msra.mxu0 %v689_v21  ;;  %5581 = vmatpush3.bf16.msra.mxu1 %v691_v4  ;;  %v482_v44 = vpop.permute.xlu1 %481 }
 0x10f   :  { %v406_v18 = vpop.permute.xlu0 %405  ;;  %1167 = vmatprep.subr.bf16.mxu0 %v709_v29  ;;  %5582 = vmatprep.subr.bf16.mxu1 %v9543_v33  ;;  %v501_v31 = vsel %vm483_vm6, %v5966_v3, %v482_v44 }
 0x110   :  { %v425_v46 = vsel %vm407_vm3, %v5956_v34, %v406_v18  ;;  %1197 = vmatprep.mubr.bf16.mxu0 %v9545_v10  ;;  %5590 = vmatprep.mubr.msk.bf16.mxu1 %vm6743_vm10, %v9543_v33  ;;  %v729_v62 = vpack.c.bf16 %v406_v18, %v330_v24  ;;  %v7608_v18 = vld [vmem:[%s9538_s5] sm:$0xff] }
 0x111   :  { %v728_v35 = vpack.c.bf16 %v425_v46, %v349_v43 }
 0x112   :  { %1168 = vmatpush1.bf16.msra.mxu0 %v708_v27  ;;  %5583 = vmatpush3.bf16.msra.mxu1 %v710_v61  ;;  %v634_v49 = vpop.permute.xlu1 %633  ;;  %v7611_v27 = vsub.s32 1, %v7600_v58 }
 0x113   :  { %v558_v40 = vpop.permute.xlu0 %557  ;;  %1169 = vmatprep.subr.bf16.mxu0 %v728_v35  ;;  %5584 = vmatprep.subr.bf16.mxu1 %v9543_v33  ;;  %v653_v6 = vsel %vm635_vm7, %v5986_v57, %v634_v49  ;;  %v767_v52 = vpack.c.bf16 %v634_v49, %v634_v49 }
 0x114   :  { %v577_v36 = vsel %vm559_vm5, %v5976_v19, %v558_v40  ;;  %v748_v28 = vpack.c.bf16 %v558_v40, %v482_v44  ;;  %v766_v8 = vpack.c.bf16 %v653_v6, %v653_v6  ;;  %v7603_v44 = vsub.s32 0, %v7600_v58 }
 0x115   :  { %v747_v50 = vpack.c.bf16 %v577_v36, %v501_v31  ;;  %v835_v41 = vsel %vm779_vm8, %v767_v52, 0  ;;  %v1430_v57 = vrot.slane %v7608_v18, %v7611_v27 }
 0x116   :  { %1170 = vmatpush1.bf16.msra.mxu0 %v727_v12  ;;  %5585 = vmatpush3.bf16.msra.mxu1 %v729_v62  ;;  %9557 = vst [vmem:[#allocation2_spill] sm:$0xff] %v7603_v44  ;;  %v1426_v19 = vrot.slane %v7608_v18, %v7603_v44 }
 0x117   :  { %1171 = vmatprep.subr.bf16.mxu0 %v747_v50  ;;  %5586 = vmatprep.subr.bf16.mxu1 %v9543_v33 }
 0x11a   :  { %1172 = vmatpush1.bf16.msra.mxu0 %v746_v53  ;;  %5587 = vmatpush3.bf16.msra.mxu1 %v748_v28 }
 0x11b   :  { %5199 = vmatprep.subr.msk.bf16.mxu0 %vm779_vm8, %v766_v8  ;;  %5588 = vmatprep.subr.bf16.mxu1 %v9543_v33  ;;  %v7625_v8 = vsub.s32 2, %v7600_v58 }
 0x11e   :  { %1174 = vmatpush1.bf16.msra.mxu0 %v829_v25  ;;  %5589 = vmatpush3.bf16.msra.mxu1 %v835_v41 }
 0x121   :  { %5200 = vmatmul.mubr.msk.bf16.vlgmr.msra.gmra.mrb[12].mxu0 %vm775_vm9, %v6732_v56  ;;  %5591 = vmatmul.mubr.msk.bf16.vlgmr.msra.gmra.mrb[20].mxu1 %vm775_vm9, %v6732_v56 }
 0x122   :  { %2895 = vmatprep.mubr.bf16.mxu0 %v9545_v10  ;;  %2938 = vmatprep.mubr.bf16.mxu1 %v9545_v10 }
 0x124   :  { %v7588_v45 = vpop.permute.xlu0 %772 }
 0x16f   :  { %v871_v39 = vpop.f32.mrb[0].mxu1 }
 0x170   :  { %v872_v55 = vadd.f32 %v871_v39, %v7588_v45  ;;  %v873_v59 = vpop.f32.mrb[1].mxu1 }
 0x171   :  { %v874_v15 = vadd.f32 %v873_v59, %v7588_v45  ;;  %v875_v16 = vpop.f32.mrb[2].mxu1  ;;  %v1437_v59 = vsub.s32 3, %v7600_v58 }
 0x172   :  { %v1265_v38 = vand.u32 2147483647, %v872_v55  ;;  %v876_v5 = vpop.f32.mrb[3].mxu1  ;;  %v1246_v46 = vmax.f32 %v872_v55, 0.0 }
 0x173   :  { %v1266_v60 = vand.u32 2147483647, %v874_v15  ;;  %v1247_v35 = vmax.f32 %v874_v15, 0.0 }
 0x174   :  { %v1284_v7 = vsub.f32 0.0, %v1265_v38 }
 0x175   :  { %v1285_v42 = vsub.f32 0.0, %v1266_v60 }
 0x176   :  { %v1303_v14 = vmul.f32 1.442695, %v1284_v7 }
 0x177   :  { %v1305_v32 = vmul.f32 1.442695, %v1285_v42 }
 0x178   :  { %6540 = vpow2.f32 %v1303_v14 }
 0x179   :  { %6542 = vpow2.f32 %v1305_v32  ;;  %v1434_v32 = vrot.slane %v7608_v18, %v7625_v8 }
 0x182   :  { %v6541_v23 = vpop.eup %6540 }
 0x183   :  { %v6543_v11 = vpop.eup %6542  ;;  %v1341_v51 = vadd.f32 1.0, %v6541_v23 }
 0x184   :  { %v1342_v0 = vadd.f32 1.0, %v6543_v11  ;;  %v912_v13 = vpop.f32.mrb[4].mxu1 }
 0x185   :  { %6544 = vlog2.f32 %v1341_v51  ;;  %v7593_v24 = vadd.f32 %v912_v13, %v7588_v45  ;;  %v914_v20 = vpop.f32.mrb[5].mxu1 }
 0x186   :  { %6546 = vlog2.f32 %v1342_v0  ;;  %v7596_v17 = vadd.f32 %v914_v20, %v7588_v45  ;;  %v916_v21 = vpop.f32.mrb[6].mxu1 }
 0x187   :  { %v1267_v48 = vand.u32 2147483647, %v7593_v24  ;;  %v917_v30 = vpop.f32.mrb[7].mxu1  ;;  %v1248_v5 = vmax.f32 %v7593_v24, 0.0  ;;  %v1438_v24 = vrot.slane %v7608_v18, %v1437_v59 }
 0x188   :  { %v1268_v4 = vand.u32 2147483647, %v7596_v17  ;;  %v1249_v51 = vmax.f32 %v7596_v17, 0.0 }
 0x189   :  { %v1286_v34 = vsub.f32 0.0, %v1267_v48 }
 0x18a   :  { %v1287_v29 = vsub.f32 0.0, %v1268_v4 }
 0x18b   :  { %v1307_v26 = vmul.f32 1.442695, %v1286_v34 }
 0x18c   :  { %v1309_v54 = vmul.f32 1.442695, %v1287_v29 }
 0x18d   :  { %6548 = vpow2.f32 %v1307_v26 }
 0x18e   :  { %6550 = vpow2.f32 %v1309_v54 }
 0x18f   :  { %v6545_v43 = vpop.eup %6544 }
 0x190   :  { %v6547_v61 = vpop.eup %6546  ;;  %v1361_v22 = vmul.f32 0.6931472, %v6545_v43 }
 0x191   :  { %v1363_v3 = vmul.f32 0.6931472, %v6547_v61 }
 0x192   :  { %v1398_v37 = vadd.f32 %v1361_v22, %v1246_v46 }
 0x193   :  { %v1399_v49 = vadd.f32 %v1363_v3, %v1247_v35 }
 0x194   :  { %v1518_v40 = vmul.f32 %v1426_v19, %v1398_v37  ;;  %v1445_v37 = vsub.s32 5, %v7600_v58 }
 0x195   :  { %v1519_v31 = vmul.f32 %v1430_v57, %v1399_v49  ;;  %v1441_v57 = vsub.s32 4, %v7600_v58  ;;  %v1449_v49 = vsub.s32 6, %v7600_v58 }
 0x197   :  { %v6549_v62 = vpop.eup %6548  ;;  %v5988_v36 = vpack.i.bf16 %v1519_v31, %v1518_v40  ;;  %v1453_v40 = vsub.s32 7, %v7600_v58  ;;  %v1419_v58 = vld [vmem:[%s9538_s5 + $0x10] sm:$0x7] }
 0x198   :  { %v6551_v12 = vpop.eup %6550  ;;  %v1343_v47 = vadd.f32 1.0, %v6549_v62 }
 0x199   :  { %v1344_v50 = vadd.f32 1.0, %v6551_v12  ;;  %5989 = vrot.lane.b32.xlu1 %v5988_v36, %s6744_s26  ;;  %v1442_v12 = vrot.slane %v7608_v18, %v1441_v57 }
 0x19a   :  { %6552 = vlog2.f32 %v1343_v47  ;;  %v1446_v47 = vrot.slane %v7608_v18, %v1445_v37 }
 0x19b   :  { %6554 = vlog2.f32 %v1344_v50  ;;  %v1450_v50 = vrot.slane %v7608_v18, %v1449_v49 }
 0x19f   :  { %v953_v6 = vpop.f32.mrb[0].mxu0  ;;  %v994_v9 = vpop.f32.mrb[8].mxu1 }
 0x1a0   :  { %v7619_v1 = vadd.f32 %v953_v6, %v7588_v45  ;;  %v7622_v52 = vadd.f32 %v994_v9, %v7588_v45  ;;  %v955_v28 = vpop.f32.mrb[1].mxu0  ;;  %v996_v53 = vpop.f32.mrb[9].mxu1  ;;  %v1454_v6 = vrot.slane %v7608_v18, %v1453_v40 }
 0x1a1   :  { %v7628_v63 = vadd.f32 %v955_v28, %v7588_v45  ;;  %v7631_v41 = vadd.f32 %v996_v53, %v7588_v45  ;;  %v957_v25 = vpop.f32.mrb[2].mxu0  ;;  %v998_v56 = vpop.f32.mrb[10].mxu1 }
 0x1a2   :  { %v1269_v39 = vand.u32 2147483647, %v7619_v1  ;;  %v1271_v55 = vand.u32 2147483647, %v7622_v52  ;;  %v958_v42 = vpop.f32.mrb[3].mxu0  ;;  %v999_v14 = vpop.f32.mrb[11].mxu1 }
 0x1a3   :  { %v1270_v15 = vand.u32 2147483647, %v7628_v63  ;;  %v1272_v16 = vand.u32 2147483647, %v7631_v41  ;;  %v1250_v28 = vmax.f32 %v7619_v1, 0.0  ;;  %v1251_v14 = vmax.f32 %v7628_v63, 0.0 }
 0x1a4   :  { %v6553_v38 = vpop.eup %6552  ;;  %v1288_v60 = vsub.f32 0.0, %v1269_v39  ;;  %v1290_v7 = vsub.f32 0.0, %v1271_v55 }
 0x1a5   :  { %v6555_v23 = vpop.eup %6554  ;;  %v1365_v11 = vmul.f32 0.6931472, %v6553_v38  ;;  %v1289_v0 = vsub.f32 0.0, %v1270_v15  ;;  %v1291_v13 = vsub.f32 0.0, %v1272_v16  ;;  %v1252_v16 = vmax.f32 %v7622_v52, 0.0 }
 0x1a6   :  { %v1367_v2 = vmul.f32 0.6931472, %v6555_v23  ;;  %v1311_v20 = vmul.f32 1.442695, %v1288_v60  ;;  %v1315_v21 = vmul.f32 1.442695, %v1290_v7 }
 0x1a7   :  { %v1400_v48 = vadd.f32 %v1365_v11, %v1248_v5  ;;  %v1313_v30 = vmul.f32 1.442695, %v1289_v0  ;;  %v1317_v4 = vmul.f32 1.442695, %v1291_v13  ;;  %v1253_v52 = vmax.f32 %v7631_v41, 0.0 }
 0x1a8   :  { %v1401_v34 = vadd.f32 %v1367_v2, %v1249_v51  ;;  %6556 = vpow2.f32 %v1311_v20 }
 0x1a9   :  { %6558 = vpow2.f32 %v1315_v21  ;;  %v1520_v29 = vmul.f32 %v1434_v32, %v1400_v48 }
 0x1aa   :  { %6560 = vpow2.f32 %v1313_v30  ;;  %v1521_v26 = vmul.f32 %v1438_v24, %v1401_v34 }
 0x1ab   :  { %6562 = vpow2.f32 %v1317_v4 }
 0x1ac   :  { %v5998_v17 = vpack.i.bf16 %v1521_v26, %v1520_v29 }
 0x1ae   :  { %5999 = vrot.lane.b32.xlu1 %v5998_v17, %s6744_s26 }
 0x1b2   :  { %v6557_v54 = vpop.eup %6556 }
 0x1b3   :  { %v6559_v43 = vpop.eup %6558  ;;  %v1345_v61 = vadd.f32 1.0, %v6557_v54 }
 0x1b4   :  { %v6561_v46 = vpop.eup %6560  ;;  %v1347_v22 = vadd.f32 1.0, %v6559_v43 }
 0x1b5   :  { %v6563_v19 = vpop.eup %6562  ;;  %6564 = vlog2.f32 %v1345_v61  ;;  %v1346_v35 = vadd.f32 1.0, %v6561_v46 }
 0x1b6   :  { %6566 = vlog2.f32 %v1347_v22  ;;  %v1348_v3 = vadd.f32 1.0, %v6563_v19 }
 0x1b7   :  { %6568 = vlog2.f32 %v1346_v35 }
 0x1b8   :  { %6570 = vlog2.f32 %v1348_v3 }
 0x1bf   :  { %v6565_v31 = vpop.eup %6564  ;;  %v1035_v62 = vpop.f32.mrb[4].mxu0 }
 0x1c0   :  { %v1076_v36 = vpop.f32.mrb[12].mxu1  ;;  %v6567_v9 = vpop.eup %6566  ;;  %v1369_v53 = vmul.f32 0.6931472, %v6565_v31  ;;  %v7664_v25 = vadd.f32 %v1035_v62, %v7588_v45 }
 0x1c1   :  { %v7667_v56 = vadd.f32 %v1076_v36, %v7588_v45  ;;  %v1037_v39 = vpop.f32.mrb[5].mxu0  ;;  %v1078_v55 = vpop.f32.mrb[13].mxu1  ;;  %v1373_v38 = vmul.f32 0.6931472, %v6567_v9 }
 0x1c2   :  { %v6569_v15 = vpop.eup %6568  ;;  %v7671_v5 = vadd.f32 %v1037_v39, %v7588_v45  ;;  %v7674_v18 = vadd.f32 %v1078_v55, %v7588_v45  ;;  %v1039_v1 = vpop.f32.mrb[6].mxu0  ;;  %v1402_v42 = vadd.f32 %v1369_v53, %v1250_v28  ;;  %v1273_v23 = vand.u32 2147483647, %v7664_v25 }
 0x1c3   :  { %v1080_v60 = vpop.f32.mrb[14].mxu1  ;;  %v6571_v7 = vpop.eup %6570  ;;  %v1371_v32 = vmul.f32 0.6931472, %v6569_v15  ;;  %v1404_v51 = vadd.f32 %v1373_v38, %v1252_v16  ;;  %v1275_v13 = vand.u32 2147483647, %v7667_v56  ;;  %v1254_v15 = vmax.f32 %v7664_v25, 0.0 }
 0x1c4   :  { %v1040_v11 = vpop.f32.mrb[7].mxu0  ;;  %v1375_v0 = vmul.f32 0.6931472, %v6571_v7  ;;  %v1081_v2 = vpop.f32.mrb[15].mxu1  ;;  %v1292_v21 = vsub.f32 0.0, %v1273_v23  ;;  %v1522_v29 = vmul.f32 %v1442_v12, %v1402_v42  ;;  %v1256_v38 = vmax.f32 %v7667_v56, 0.0 }
 0x1c5   :  { %v1403_v20 = vadd.f32 %v1371_v32, %v1251_v14  ;;  %v1274_v24 = vand.u32 2147483647, %v7671_v5  ;;  %v1294_v30 = vsub.f32 0.0, %v1275_v13  ;;  %v1276_v4 = vand.u32 2147483647, %v7674_v18 }
 0x1c6   :  { %v1405_v48 = vadd.f32 %v1375_v0, %v1253_v52  ;;  %v1319_v63 = vmul.f32 1.442695, %v1292_v21  ;;  %v1524_v43 = vmul.f32 %v1450_v50, %v1404_v51  ;;  %v1255_v32 = vmax.f32 %v7671_v5, 0.0 }
 0x1c7   :  { %v1293_v34 = vsub.f32 0.0, %v1274_v24  ;;  %v1523_v26 = vmul.f32 %v1446_v47, %v1403_v20  ;;  %v1323_v17 = vmul.f32 1.442695, %v1294_v30  ;;  %v1295_v54 = vsub.f32 0.0, %v1276_v4 }
 0x1c8   :  { %v1525_v41 = vmul.f32 %v1454_v6, %v1405_v48  ;;  %6572 = vpow2.f32 %v1319_v63  ;;  %v7687_v6 = vld [vmem:[%s9538_s5 + $0x8] sm:$0xff]  ;;  %v1257_v21 = vmax.f32 %v7674_v18, 0.0  ;;  %s6745_s5 = smov 122  }
 0x1c9   :  { %v1321_v61 = vmul.f32 1.442695, %v1293_v34  ;;  %v5993_v46 = vpack.i.bf16 %v1523_v26, %v1522_v29  ;;  %6574 = vpow2.f32 %v1323_v17  ;;  %v1325_v22 = vmul.f32 1.442695, %v1295_v54 }
 0x1ca   :  { %v6008_v19 = vpack.i.bf16 %v1525_v41, %v1524_v43  ;;  %v1458_v28 = vrot.slane %v7687_v6, %v7603_v44  ;;  %v1462_v53 = vrot.slane %v7687_v6, %v7611_v27  ;;  %v1466_v39 = vrot.slane %v7687_v6, %v7625_v8 }
 0x1cb   :  { %6576 = vpow2.f32 %v1321_v61  ;;  %5994 = vrot.lane.b32.xlu0 %v5993_v46, %s6744_s26  ;;  %v1470_v7 = vrot.slane %v7687_v6, %v1437_v59 }
 0x1cc   :  { %6578 = vpow2.f32 %v1325_v22  ;;  %6009 = vrot.lane.b32.xlu1 %v6008_v19, %s6744_s26 }
 0x1d2   :  { %v6573_v35 = vpop.eup %6572 }
 0x1d3   :  { %v6575_v3 = vpop.eup %6574  ;;  %v1349_v31 = vadd.f32 1.0, %v6573_v35 }
 0x1d4   :  { %v1351_v36 = vadd.f32 1.0, %v6575_v3 }
 0x1d5   :  { %v6577_v62 = vpop.eup %6576  ;;  %6580 = vlog2.f32 %v1349_v31 }
 0x1d6   :  { %v6579_v12 = vpop.eup %6578  ;;  %v1350_v47 = vadd.f32 1.0, %v6577_v62  ;;  %6582 = vlog2.f32 %v1351_v36 }
 0x1d7   :  { %v1352_v50 = vadd.f32 1.0, %v6579_v12 }
 0x1d8   :  { %6584 = vlog2.f32 %v1350_v47 }
 0x1d9   :  { %6586 = vlog2.f32 %v1352_v50 }
 0x1df   :  { %v6581_v9 = vpop.eup %6580 }
 0x1e0   :  { %v6583_v55 = vpop.eup %6582  ;;  %v1377_v16 = vmul.f32 0.6931472, %v6581_v9  ;;  %v1117_v1 = vpop.f32.mrb[8].mxu0 }
 0x1e1   :  { %v1158_v60 = vpop.f32.mrb[16].mxu1  ;;  %v1381_v14 = vmul.f32 0.6931472, %v6583_v55  ;;  %v7702_v23 = vadd.f32 %v1117_v1, %v7588_v45  ;;  %v1119_v25 = vpop.f32.mrb[9].mxu0 }
 0x1e2   :  { %v6585_v42 = vpop.eup %6584  ;;  %v7705_v11 = vadd.f32 %v1158_v60, %v7588_v45  ;;  %v1160_v51 = vpop.f32.mrb[17].mxu1  ;;  %v1406_v56 = vadd.f32 %v1377_v16, %v1254_v15  ;;  %v7708_v13 = vadd.f32 %v1119_v25, %v7588_v45 }
 0x1e3   :  { %v6587_v52 = vpop.eup %6586  ;;  %v1379_v0 = vmul.f32 0.6931472, %v6585_v42  ;;  %v7711_v59 = vadd.f32 %v1160_v51, %v7588_v45  ;;  %v1121_v2 = vpop.f32.mrb[10].mxu0  ;;  %v1408_v5 = vadd.f32 %v1381_v14, %v1256_v38  ;;  %v1277_v48 = vand.u32 2147483647, %v7702_v23 }
 0x1e4   :  { %v1162_v20 = vpop.f32.mrb[18].mxu1  ;;  %v1383_v24 = vmul.f32 0.6931472, %v6587_v52  ;;  %v1122_v30 = vpop.f32.mrb[11].mxu0  ;;  %v1279_v63 = vand.u32 2147483647, %v7705_v11  ;;  %v1526_v41 = vmul.f32 %v1458_v28, %v1406_v56 }
 0x1e5   :  { %v1407_v4 = vadd.f32 %v1379_v0, %v1255_v32  ;;  %v1163_v34 = vpop.f32.mrb[19].mxu1  ;;  %v1296_v26 = vsub.f32 0.0, %v1277_v48  ;;  %v1278_v17 = vand.u32 2147483647, %v7708_v13  ;;  %v1280_v43 = vand.u32 2147483647, %v7711_v59 }
 0x1e6   :  { %v1409_v29 = vadd.f32 %v1383_v24, %v1257_v21  ;;  %v1298_v54 = vsub.f32 0.0, %v1279_v63  ;;  %v1528_v18 = vmul.f32 %v1466_v39, %v1408_v5  ;;  %v1258_v63 = vmax.f32 %v7702_v23, 0.0 }
 0x1e7   :  { %v1527_v61 = vmul.f32 %v1462_v53, %v1407_v4  ;;  %v1327_v46 = vmul.f32 1.442695, %v1296_v26  ;;  %v1297_v22 = vsub.f32 0.0, %v1278_v17  ;;  %v1299_v3 = vsub.f32 0.0, %v1280_v43 }
 0x1e8   :  { %v1529_v19 = vmul.f32 %v1470_v7, %v1409_v29  ;;  %v1331_v35 = vmul.f32 1.442695, %v1298_v54  ;;  %v1474_v29 = vrot.slane %v7687_v6, %v1441_v57  ;;  %v1260_v17 = vmax.f32 %v7705_v11, 0.0 }
 0x1e9   :  { %v6003_v31 = vpack.i.bf16 %v1527_v61, %v1526_v41  ;;  %6588 = vpow2.f32 %v1327_v46  ;;  %v1329_v62 = vmul.f32 1.442695, %v1297_v22  ;;  %v1333_v12 = vmul.f32 1.442695, %v1299_v3 }
 0x1ea   :  { %v6018_v36 = vpack.i.bf16 %v1529_v19, %v1528_v18  ;;  %6590 = vpow2.f32 %v1331_v35  ;;  %v1482_v43 = vrot.slane %v7687_v6, %v1449_v49  ;;  %v1259_v46 = vmax.f32 %v7708_v13, 0.0 }
 0x1eb   :  { %6004 = vrot.lane.b32.xlu0 %v6003_v31, %s6744_s26  ;;  %6592 = vpow2.f32 %v1329_v62  ;;  %v1478_v23 = vrot.slane %v7687_v6, %v1445_v37  ;;  %v1261_v57 = vmax.f32 %v7711_v59, 0.0  ;;  %v1486_v11 = vrot.slane %v7687_v6, %v1453_v40 }
 0x1ec   :  { %6019 = vrot.lane.b32.xlu1 %v6018_v36, %s6744_s26  ;;  %6594 = vpow2.f32 %v1333_v12 }
 0x1f3   :  { %v6589_v47 = vpop.eup %6588 }
 0x1f4   :  { %v6591_v50 = vpop.eup %6590  ;;  %v1353_v9 = vadd.f32 1.0, %v6589_v47  ;;  %v1199_v28 = vpop.f32.mrb[12].mxu0 }
 0x1f5   :  { %v1240_v53 = vpop.f32.mrb[20].mxu1  ;;  %v6593_v39 = vpop.eup %6592  ;;  %v1355_v55 = vadd.f32 1.0, %v6591_v50  ;;  %v7721_v15 = vadd.f32 %v1199_v28, %v7588_v45 }
 0x1f6   :  { %v7724_v16 = vadd.f32 %v1240_v53, %v7588_v45  ;;  %v1201_v38 = vpop.f32.mrb[13].mxu0  ;;  %v5592_v1 = vpop.f32.mrb[21].mxu1  ;;  %6596 = vlog2.f32 %v1353_v9  ;;  %v1354_v7 = vadd.f32 1.0, %v6593_v39 }
 0x1f7   :  { %v6595_v60 = vpop.eup %6594  ;;  %v7727_v42 = vadd.f32 %v1201_v38, %v7588_v45  ;;  %v1203_v14 = vpop.f32.mrb[14].mxu0  ;;  %6598 = vlog2.f32 %v1355_v55  ;;  %v1281_v51 = vand.u32 2147483647, %v7721_v15  ;;  %v1262_v53 = vmax.f32 %v7721_v15, 0.0 }
 0x1f8   :  { %v1243_v32 = vpop.f32.mrb[22].mxu1  ;;  %v1356_v25 = vadd.f32 1.0, %v6595_v60  ;;  %v1204_v52 = vpop.f32.mrb[15].mxu0  ;;  %6600 = vlog2.f32 %v1354_v7  ;;  %v1283_v0 = vand.u32 2147483647, %v7724_v16  ;;  %v1490_v55 = vrot.slane %v1419_v58, %v7603_v44 }
 0x1f9   :  { %v5593_v56 = vpop.f32.mrb[23].mxu1  ;;  %v1300_v2 = vsub.f32 0.0, %v1281_v51  ;;  %v1282_v20 = vand.u32 2147483647, %v7727_v42  ;;  %v1264_v1 = vmax.f32 %v7724_v16, 0.0  ;;  %v1498_v7 = vrot.slane %v1419_v58, %v7625_v8 }
 0x1fa   :  { %6602 = vlog2.f32 %v1356_v25  ;;  %v1302_v5 = vsub.f32 0.0, %v1283_v0  ;;  %v1263_v32 = vmax.f32 %v7727_v42, 0.0  ;;  %v1494_v52 = vrot.slane %v1419_v58, %v7611_v27 }
 0x1fb   :  { %v1335_v21 = vmul.f32 1.442695, %v1300_v2  ;;  %v1301_v24 = vsub.f32 0.0, %v1282_v20 }
 0x1fc   :  { %v1339_v45 = vmul.f32 1.442695, %v1302_v5 }
 0x1fd   :  { %6604 = vpow2.f32 %v1335_v21  ;;  %v1337_v48 = vmul.f32 1.442695, %v1301_v24 }
 0x1fe   :  { %6606 = vpow2.f32 %v1339_v45 }
 0x1ff   :  { %6608 = vpow2.f32 %v1337_v48 }
 0x200   :  { %v6597_v30 = vpop.eup %6596 }
 0x201   :  { %v6599_v4 = vpop.eup %6598  ;;  %v1385_v34 = vmul.f32 0.6931472, %v6597_v30 }
 0x202   :  { %v6601_v26 = vpop.eup %6600  ;;  %v1389_v54 = vmul.f32 0.6931472, %v6599_v4 }
 0x203   :  { %v1410_v61 = vadd.f32 %v1385_v34, %v1258_v63  ;;  %v1387_v22 = vmul.f32 0.6931472, %v6601_v26 }
 0x204   :  { %v6603_v41 = vpop.eup %6602  ;;  %v1412_v18 = vadd.f32 %v1389_v54, %v1260_v17 }
 0x205   :  { %v1391_v19 = vmul.f32 0.6931472, %v6603_v41  ;;  %v1411_v35 = vadd.f32 %v1387_v22, %v1259_v46  ;;  %v1530_v3 = vmul.f32 %v1474_v29, %v1410_v61 }
 0x206   :  { %v1532_v31 = vmul.f32 %v1482_v43, %v1412_v18 }
 0x207   :  { %v1413_v49 = vadd.f32 %v1391_v19, %v1261_v57  ;;  %v6605_v62 = vpop.eup %6604  ;;  %v1531_v36 = vmul.f32 %v1478_v23, %v1411_v35 }
 0x208   :  { %v6607_v13 = vpop.eup %6606  ;;  %v1357_v12 = vadd.f32 1.0, %v6605_v62 }
 0x209   :  { %v1533_v47 = vmul.f32 %v1486_v11, %v1413_v49  ;;  %v6609_v50 = vpop.eup %6608  ;;  %v1359_v9 = vadd.f32 1.0, %v6607_v13  ;;  %v6013_v37 = vpack.i.bf16 %v1531_v36, %v1530_v3 }
 0x20a   :  { %6610 = vlog2.f32 %v1357_v12  ;;  %v1358_v28 = vadd.f32 1.0, %v6609_v50 }
 0x20b   :  { %v6028_v59 = vpack.i.bf16 %v1533_v47, %v1532_v31  ;;  %6612 = vlog2.f32 %v1359_v9  ;;  %6014 = vrot.lane.b32.xlu0 %v6013_v37, %s6744_s26  ;;  %v5990_v51 = vpop.permute.xlu1 %5989 }
 0x20c   :  { %6614 = vlog2.f32 %v1358_v28  ;;  %v5992_v15 = vunpack.i.h.bf16 %v5990_v51  ;;  %v5991_v20 = vunpack.i.l.bf16 %v5990_v51 }
 0x20d   :  { %6029 = vrot.lane.b32.xlu1 %v6028_v59, %s6744_s26 }
 0x20e   :  { %v7761_v8 = vsel %vm1594_vm11, %v5991_v20, %v5992_v15  ;;  %v7764_v42 = vsel %vm1594_vm11, 0.0, %v5991_v20 }
 0x20f   :  { %v6033_v48 = vpack.i.bf16 %v7761_v8, %v7764_v42 }
 0x214   :  { %v6611_v40 = vpop.eup %6610 }
 0x215   :  { %v6613_v6 = vpop.eup %6612  ;;  %v1393_v39 = vmul.f32 0.6931472, %v6611_v40 }
 0x216   :  { %v6615_v38 = vpop.eup %6614  ;;  %v1397_v60 = vmul.f32 0.6931472, %v6613_v6 }
 0x217   :  { %v1414_v14 = vadd.f32 %v1393_v39, %v1262_v53  ;;  %v1395_v25 = vmul.f32 0.6931472, %v6615_v38 }
 0x218   :  { %v1416_v56 = vadd.f32 %v1397_v60, %v1264_v1 }
 0x219   :  { %v1415_v0 = vadd.f32 %v1395_v25, %v1263_v32  ;;  %v1534_v2 = vmul.f32 %v1490_v55, %v1414_v14 }
 0x21a   :  { %v1536_v5 = vmul.f32 %v1498_v7, %v1416_v56 }
 0x21b   :  { %v1535_v21 = vmul.f32 %v1494_v52, %v1415_v0 }
 0x21c   :  { %1592 = vrot.lane.b32.xlu1 %v1536_v5, %s6744_s26 }
 0x21d   :  { %v6023_v16 = vpack.i.bf16 %v1535_v21, %v1534_v2 }
 0x21f   :  { %6024 = vrot.lane.b32.xlu0 %v6023_v16, %s6744_s26 }
 0x220   :  { %v6000_v27 = vpop.permute.xlu1 %5999 }
 0x221   :  { %v6002_v24 = vunpack.i.h.bf16 %v6000_v27  ;;  %v6001_v45 = vunpack.i.l.bf16 %v6000_v27 }
 0x223   :  { %v7770_v30 = vsel %vm1594_vm11, %v5992_v15, %v6001_v45  ;;  %v7773_v4 = vsel %vm1594_vm11, %v6001_v45, %v6002_v24  ;;  %6034 = vrot.lane.b32.xlu0 %v6033_v48, %s6741_s20 }
 0x224   :  { %v6073_v63 = vpack.i.bf16 %v7764_v42, %v7773_v4  ;;  %v6038_v34 = vpack.i.bf16 %v7770_v30, %v7761_v8  ;;  %v6108_v22 = vpack.i.bf16 %v7773_v4, %v7770_v30 }
 0x226   :  { %6074 = vrot.lane.b32.xlu1 %v6073_v63, %s6734_s10 }
 0x227   :  { %6039 = vrot.lane.b32.xlu0 %v6038_v34, %s6734_s10 }
 0x22a   :  { %6079 = vrot.lane.b32.xlu1 %v6073_v63, %s6733_s9 }
 0x22b   :  { %6044 = vrot.lane.b32.xlu0 %v6038_v34, %s6733_s9 }
 0x22e   :  { %6084 = vrot.lane.b32.xlu1 %v6073_v63, %s6735_s11 }
 0x22f   :  { %6049 = vrot.lane.b32.xlu0 %v6038_v34, %s6735_s11 }
 0x232   :  { %6089 = vrot.lane.b32.xlu1 %v6073_v63, %s6737_s13 }
 0x233   :  { %6054 = vrot.lane.b32.xlu0 %v6038_v34, %s6737_s13 }
 0x236   :  { %6094 = vrot.lane.b32.xlu1 %v6073_v63, %s6736_s12 }
 0x237   :  { %6059 = vrot.lane.b32.xlu0 %v6038_v34, %s6736_s12 }
 0x23a   :  { %6099 = vrot.lane.b32.xlu1 %v6073_v63, %s6739_s15 }
 0x23b   :  { %6064 = vrot.lane.b32.xlu0 %v6038_v34, %s6739_s15 }
 0x23d   :  { %v5995_v29 = vpop.permute.xlu0 %5994 }
 0x23e   :  { %v5997_v26 = vunpack.i.h.bf16 %v5995_v29  ;;  %v5996_v17 = vunpack.i.l.bf16 %v5995_v29  ;;  %v6010_v54 = vpop.permute.xlu1 %6009  ;;  %6104 = vrot.lane.b32.xlu1 %v6073_v63, %s6738_s14 }
 0x23f   :  { %v6012_v43 = vunpack.i.h.bf16 %v6010_v54  ;;  %v6011_v41 = vunpack.i.l.bf16 %v6010_v54  ;;  %6069 = vrot.lane.b32.xlu0 %v6038_v34, %s6738_s14 }
 0x240   :  { %v7794_v61 = vsel %vm1594_vm11, %v6002_v24, %v5996_v17  ;;  %v7797_v46 = vsel %vm1594_vm11, %v5996_v17, %v5997_v26 }
 0x241   :  { %v6113_v23 = vpack.i.bf16 %v7797_v46, %v7794_v61  ;;  %v7805_v18 = vsel %vm1594_vm11, %v6011_v41, %v6012_v43  ;;  %v7808_v57 = vsel %vm1594_vm11, %v5997_v26, %v6011_v41 }
 0x242   :  { %6109 = vrot.lane.b32.xlu1 %v6108_v22, %s6741_s20  ;;  %v6153_v19 = vpack.i.bf16 %v7794_v61, %v7805_v18  ;;  %v6118_v11 = vpack.i.bf16 %v7808_v57, %v7797_v46  ;;  %v6188_v12 = vpack.i.bf16 %v7805_v18, %v7808_v57 }
 0x243   :  { %6114 = vrot.lane.b32.xlu0 %v6113_v23, %s6741_s20 }
 0x246   :  { %6154 = vrot.lane.b32.xlu1 %v6153_v19, %s6734_s10 }
 0x247   :  { %6119 = vrot.lane.b32.xlu0 %v6118_v11, %s6734_s10 }
 0x24a   :  { %6159 = vrot.lane.b32.xlu1 %v6153_v19, %s6733_s9 }
 0x24b   :  { %6124 = vrot.lane.b32.xlu0 %v6118_v11, %s6733_s9 }
 0x24e   :  { %6164 = vrot.lane.b32.xlu1 %v6153_v19, %s6735_s11 }
 0x24f   :  { %6129 = vrot.lane.b32.xlu0 %v6118_v11, %s6735_s11 }
 0x252   :  { %6169 = vrot.lane.b32.xlu1 %v6153_v19, %s6737_s13 }
 0x253   :  { %6134 = vrot.lane.b32.xlu0 %v6118_v11, %s6737_s13 }
 0x256   :  { %6174 = vrot.lane.b32.xlu1 %v6153_v19, %s6736_s12 }
 0x257   :  { %6139 = vrot.lane.b32.xlu0 %v6118_v11, %s6736_s12 }
 0x25a   :  { %6179 = vrot.lane.b32.xlu1 %v6153_v19, %s6739_s15 }
 0x25b   :  { %6144 = vrot.lane.b32.xlu0 %v6118_v11, %s6739_s15 }
 0x25d   :  { %v6005_v35 = vpop.permute.xlu0 %6004 }
 0x25e   :  { %v6007_v3 = vunpack.i.h.bf16 %v6005_v35  ;;  %v6006_v49 = vunpack.i.l.bf16 %v6005_v35  ;;  %v6020_v31 = vpop.permute.xlu1 %6019  ;;  %6184 = vrot.lane.b32.xlu1 %v6153_v19, %s6738_s14 }
 0x25f   :  { %v6021_v62 = vunpack.i.l.bf16 %v6020_v31  ;;  %6149 = vrot.lane.b32.xlu0 %v6118_v11, %s6738_s14  ;;  %v6022_v37 = vunpack.i.h.bf16 %v6020_v31 }
 0x260   :  { %v7830_v36 = vsel %vm1594_vm11, %v6006_v49, %v6007_v3  ;;  %v7839_v47 = vsel %vm1594_vm11, %v6012_v43, %v6006_v49 }
 0x261   :  { %v7834_v13 = vsel %vm1594_vm11, %v6007_v3, %v6021_v62  ;;  %v6193_v9 = vpack.i.bf16 %v7830_v36, %v7839_v47  ;;  %v7852_v28 = vsel %vm1594_vm11, %v6021_v62, %v6022_v37 }
 0x262   :  { %v6198_v50 = vpack.i.bf16 %v7834_v13, %v7830_v36  ;;  %6189 = vrot.lane.b32.xlu1 %v6188_v12, %s6741_s20  ;;  %v6233_v59 = vpack.i.bf16 %v7839_v47, %v7852_v28  ;;  %v6268_v40 = vpack.i.bf16 %v7852_v28, %v7834_v13 }
 0x264   :  { %6199 = vrot.lane.b32.xlu0 %v6198_v50, %s6734_s10 }
 0x266   :  { %6194 = vrot.lane.b32.xlu1 %v6193_v9, %s6741_s20 }
 0x268   :  { %6204 = vrot.lane.b32.xlu0 %v6198_v50, %s6733_s9 }
 0x26a   :  { %6214 = vrot.lane.b32.xlu1 %v6198_v50, %s6737_s13 }
 0x26c   :  { %6209 = vrot.lane.b32.xlu0 %v6198_v50, %s6735_s11 }
 0x26e   :  { %6219 = vrot.lane.b32.xlu1 %v6198_v50, %s6736_s12 }
 0x270   :  { %6224 = vrot.lane.b32.xlu0 %v6198_v50, %s6739_s15 }
 0x272   :  { %6234 = vrot.lane.b32.xlu1 %v6233_v59, %s6734_s10 }
 0x274   :  { %6229 = vrot.lane.b32.xlu0 %v6198_v50, %s6738_s14 }
 0x276   :  { %6239 = vrot.lane.b32.xlu1 %v6233_v59, %s6733_s9 }
 0x278   :  { %6249 = vrot.lane.b32.xlu0 %v6233_v59, %s6737_s13 }
 0x27a   :  { %6244 = vrot.lane.b32.xlu1 %v6233_v59, %s6735_s11 }
 0x27c   :  { %6254 = vrot.lane.b32.xlu0 %v6233_v59, %s6736_s12 }
 0x27d   :  { %v6015_v58 = vpop.permute.xlu0 %6014 }
 0x27e   :  { %v6017_v6 = vunpack.i.h.bf16 %v6015_v58  ;;  %v6016_v53 = vunpack.i.l.bf16 %v6015_v58  ;;  %6259 = vrot.lane.b32.xlu1 %v6233_v59, %s6739_s15 }
 0x27f   :  { %v6030_v39 = vpop.permute.xlu1 %6029 }
 0x280   :  { %v6032_v55 = vunpack.i.h.bf16 %v6030_v39  ;;  %v6031_v38 = vunpack.i.l.bf16 %v6030_v39  ;;  %6269 = vrot.lane.b32.xlu0 %v6268_v40, %s6741_s20  ;;  %v7869_v1 = vsel %vm1594_vm11, %v6022_v37, %v6016_v53  ;;  %v7872_v60 = vsel %vm1594_vm11, %v6016_v53, %v6017_v6 }
 0x281   :  { %v6273_v32 = vpack.i.bf16 %v7872_v60, %v7869_v1 }
 0x282   :  { %v7875_v7 = vsel %vm1594_vm11, %v6031_v38, %v6032_v55  ;;  %6264 = vrot.lane.b32.xlu1 %v6233_v59, %s6738_s14  ;;  %v7884_v25 = vsel %vm1594_vm11, %v6017_v6, %v6031_v38 }
 0x283   :  { %v6313_v14 = vpack.i.bf16 %v7869_v1, %v7875_v7  ;;  %v6278_v51 = vpack.i.bf16 %v7884_v25, %v7872_v60  ;;  %v6348_v27 = vpack.i.bf16 %v7875_v7, %v7884_v25 }
 0x285   :  { %6314 = vrot.lane.b32.xlu0 %v6313_v14, %s6734_s10 }
 0x286   :  { %6274 = vrot.lane.b32.xlu1 %v6273_v32, %s6741_s20 }
 0x289   :  { %6319 = vrot.lane.b32.xlu0 %v6313_v14, %s6733_s9 }
 0x28a   :  { %6279 = vrot.lane.b32.xlu1 %v6278_v51, %s6734_s10 }
 0x28d   :  { %6324 = vrot.lane.b32.xlu0 %v6313_v14, %s6735_s11 }
 0x28e   :  { %6284 = vrot.lane.b32.xlu1 %v6278_v51, %s6733_s9  ;;  %v1593_v56 = vpop.permute.xlu1 %1592 }
 0x291   :  { %6329 = vrot.lane.b32.xlu0 %v6313_v14, %s6737_s13  ;;  %v6025_v52 = vpop.permute.xlu0 %6024 }
 0x292   :  { %6289 = vrot.lane.b32.xlu1 %v6278_v51, %s6735_s11  ;;  %v6027_v20 = vunpack.i.h.bf16 %v6025_v52  ;;  %v6026_v5 = vunpack.i.l.bf16 %v6025_v52 }
 0x294   :  { %v7914_v24 = vsel %vm1594_vm11, %v6032_v55, %v6026_v5  ;;  %v7917_v45 = vsel %vm1594_vm11, %v6026_v5, %v6027_v20  ;;  %v1612_v43 = vsel %vm1594_vm11, %v6027_v20, %v1593_v56 }
 0x295   :  { %6334 = vrot.lane.b32.xlu0 %v6313_v14, %s6736_s12  ;;  %v7896_v0 = vpop.permute.xlu0 %6034  ;;  %v6358_v34 = vpack.i.bf16 %v7917_v45, %v7914_v24  ;;  %v7946_v23 = vsel %vm1633_vm12, %v1612_v43, 0.0 }
 0x296   :  { %6294 = vrot.lane.b32.xlu1 %v6278_v51, %s6737_s13  ;;  %9558 = vst [vmem:[#allocation3_spill] sm:$0xff] %v7946_v23  ;;  %v6037_v5 = vunpack.i.h.bf16 %v7896_v0 }
 0x298   :  { %v7900_v2 = vpop.permute.xlu1 %6074 }
 0x299   :  { %6339 = vrot.lane.b32.xlu0 %v6313_v14, %s6739_s15  ;;  %v7902_v15 = vpop.permute.xlu0 %6039  ;;  %v6077_v50 = vunpack.i.h.bf16 %v7900_v2 }
 0x29a   :  { %6299 = vrot.lane.b32.xlu1 %v6278_v51, %s6736_s12  ;;  %v6041_v9 = vunpack.i.l.bf16 %v7902_v15  ;;  %v6042_v10 = vunpack.i.h.bf16 %v7902_v15 }
 0x29c   :  { %v7906_v21 = vpop.permute.xlu1 %6079  ;;  %v1675_v55 = vsel %vm103_vm0, %v6077_v50, %v6041_v9 }
 0x29d   :  { %6344 = vrot.lane.b32.xlu0 %v6313_v14, %s6738_s14  ;;  %v7908_v16 = vpop.permute.xlu0 %6044  ;;  %v6082_v37 = vunpack.i.h.bf16 %v7906_v21  ;;  %v2237_v33 = vpack.c.bf16 %v1675_v55, %v7764_v42  ;;  %v1676_v55 = vsel %vm103_vm0, %v6041_v9, %v6042_v10 }
 0x29e   :  { %6304 = vrot.lane.b32.xlu1 %v6278_v51, %s6739_s15  ;;  %v6046_v59 = vunpack.i.l.bf16 %v7908_v16  ;;  %v2238_v9 = vpack.c.bf16 %v1676_v55, %v7761_v8 }
 0x2a0   :  { %v7920_v48 = vpop.permute.xlu1 %6084  ;;  %v1750_v38 = vsel %vm179_vm2, %v6082_v37, %v6046_v59 }
 0x2a1   :  { %6349 = vrot.lane.b32.xlu0 %v6348_v27, %s6741_s20  ;;  %v7922_v63 = vpop.permute.xlu0 %6049  ;;  %v6087_v62 = vunpack.i.h.bf16 %v7920_v48 }
 0x2a2   :  { %6309 = vrot.lane.b32.xlu1 %v6278_v51, %s6738_s14  ;;  %v6051_v12 = vunpack.i.l.bf16 %v7922_v63 }
 0x2a4   :  { %v7928_v29 = vpop.permute.xlu1 %6089  ;;  %v1825_v6 = vsel %vm255_vm1, %v6087_v62, %v6051_v12 }
 0x2a5   :  { %6359 = vrot.lane.b32.xlu0 %v6358_v34, %s6733_s9  ;;  %v7930_v26 = vpop.permute.xlu0 %6054  ;;  %v6092_v32 = vunpack.i.h.bf16 %v7928_v29  ;;  %v2256_v27 = vpack.c.bf16 %v1825_v6, %v1750_v38  ;;  %v6052_v38 = vunpack.i.h.bf16 %v7922_v63 }
 0x2a6   :  { %6354 = vrot.lane.b32.xlu1 %v6358_v34, %s6734_s10  ;;  %v6056_v51 = vunpack.i.l.bf16 %v7930_v26 }
 0x2a7   :  { %v1826_v63 = vsel %vm255_vm1, %v6051_v12, %v6052_v38 }
 0x2a8   :  { %v7934_v17 = vpop.permute.xlu1 %6094  ;;  %v1900_v44 = vsel %vm331_vm4, %v6092_v32, %v6056_v51  ;;  %v6047_v32 = vunpack.i.h.bf16 %v7908_v16 }
 0x2a9   :  { %6369 = vrot.lane.b32.xlu0 %v6358_v34, %s6737_s13  ;;  %v7936_v54 = vpop.permute.xlu0 %6059  ;;  %v6097_v53 = vunpack.i.h.bf16 %v7934_v17 }
 0x2aa   :  { %6364 = vrot.lane.b32.xlu1 %v6358_v34, %s6735_s11  ;;  %v6061_v39 = vunpack.i.l.bf16 %v7936_v54  ;;  %v1751_v16 = vsel %vm179_vm2, %v6046_v59, %v6047_v32  ;;  %v6086_v59 = vunpack.i.l.bf16 %v7920_v48 }
 0x2ac   :  { %v7941_v41 = vpop.permute.xlu1 %6099  ;;  %v1975_v43 = vsel %vm407_vm3, %v6097_v53, %v6061_v39 }
 0x2ad   :  { %6384 = vrot.lane.b32.xlu0 %v6358_v34, %s6738_s14  ;;  %v7943_v22 = vpop.permute.xlu0 %6064  ;;  %v6102_v62 = vunpack.i.h.bf16 %v7941_v41  ;;  %v2275_v53 = vpack.c.bf16 %v1975_v43, %v1900_v44 }
 0x2ae   :  { %6374 = vrot.lane.b32.xlu1 %v6358_v34, %s6736_s12  ;;  %v6066_v50 = vunpack.i.l.bf16 %v7943_v22  ;;  %v6067_v43 = vunpack.i.h.bf16 %v7943_v22  ;;  %v6076_v22 = vunpack.i.l.bf16 %v7900_v2 }
 0x2b0   :  { %v7950_v19 = vpop.permute.xlu1 %6104 }
 0x2b1   :  { %1673 = vrot.lane.b32.xlu0 %v7946_v23, %s6734_s10  ;;  %v7952_v11 = vpop.permute.xlu0 %6069  ;;  %v6107_v52 = vunpack.i.h.bf16 %v7950_v19 }
 0x2b2   :  { %6379 = vrot.lane.b32.xlu1 %v6358_v34, %s6739_s15  ;;  %v6071_v56 = vunpack.i.l.bf16 %v7952_v11 }
 0x2b4   :  { %v7957_v35 = vpop.permute.xlu1 %6109  ;;  %v2125_v6 = vsel %vm559_vm5, %v6107_v52, %v6071_v56  ;;  %v6072_v52 = vunpack.i.h.bf16 %v7952_v11  ;;  %v6057_v11 = vunpack.i.h.bf16 %v7930_v26 }
 0x2b5   :  { %1823 = vrot.lane.b32.xlu0 %v7946_v23, %s6735_s11  ;;  %v7959_v3 = vpop.permute.xlu0 %6114 }
 0x2b6   :  { %6389 = vrot.lane.b32.xlu1 %v6358_v34, %s6741_s20  ;;  %v6036_v34 = vunpack.i.l.bf16 %v7896_v0 }
 0x2b8   :  { %v7964_v49 = vpop.permute.xlu1 %6154 }
 0x2b9   :  { %1898 = vrot.lane.b32.xlu0 %v7946_v23, %s6737_s13  ;;  %v7966_v31 = vpop.permute.xlu0 %6119 }
 0x2ba   :  { %1748 = vrot.lane.b32.xlu1 %v7946_v23, %s6733_s9 }
 0x2bc   :  { %v7978_v58 = vpop.permute.xlu1 %6159 }
 0x2bd   :  { %2048 = vrot.lane.b32.xlu0 %v7946_v23, %s6739_s15  ;;  %v7980_v40 = vpop.permute.xlu0 %6124 }
 0x2be   :  { %1973 = vrot.lane.b32.xlu1 %v7946_v23, %s6736_s12 }
 0x2c0   :  { %v7991_v14 = vpop.permute.xlu1 %6164 }
 0x2c1   :  { %2198 = vrot.lane.b32.xlu0 %v7946_v23, %s6741_s20  ;;  %v7997_v20 = vpop.permute.xlu0 %6129 }
 0x2c2   :  { %2123 = vrot.lane.b32.xlu1 %v7946_v23, %s6738_s14  ;;  %v2050_v23 = vsel %vm483_vm6, %v6102_v62, %v6066_v50  ;;  %v2126_v62 = vsel %vm559_vm5, %v6071_v56, %v6072_v52  ;;  %v1901_v56 = vsel %vm331_vm4, %v6056_v51, %v6057_v11  ;;  %v1827_v51 = vsel %vm255_vm1, %v6052_v38, %v6086_v59 }
 0x2c3   :  { %v2294_v15 = vpack.c.bf16 %v2125_v6, %v2050_v23  ;;  %v6111_v6 = vunpack.i.l.bf16 %v7957_v35  ;;  %v6112_v38 = vunpack.i.h.bf16 %v7957_v35  ;;  %v6156_v35 = vunpack.i.l.bf16 %v7964_v49 }
 0x2c4   :  { %v8007_v37 = vpop.permute.xlu1 %6169 }
 0x2c5   :  { %2484 = vrot.lane.b32.xlu0 %v2256_v27, %s6745_s5  ;;  %v8013_v0 = vpop.permute.xlu0 %6134  ;;  %v2200_v27 = vsel %vm635_vm7, %v6036_v34, %v6037_v5  ;;  %v6062_v34 = vunpack.i.h.bf16 %v7936_v54  ;;  %v2257_v54 = vpack.c.bf16 %v1826_v63, %v1751_v16  ;;  %v2201_v55 = vsel %vm635_vm7, %v6037_v5, %v6111_v6 }
 0x2c6   :  { %2446 = vrot.lane.b32.xlu1 %v2237_v33, %s6745_s5  ;;  %v2313_v33 = vpack.c.bf16 %v2200_v27, %v2200_v27  ;;  %v2051_v27 = vsel %vm483_vm6, %v6066_v50, %v6067_v43  ;;  %v6081_v50 = vunpack.i.l.bf16 %v7906_v21  ;;  %v2314_v48 = vpack.c.bf16 %v2201_v55, %v2201_v55 }
 0x2c7   :  { %v1976_v12 = vsel %vm407_vm3, %v6061_v39, %v6062_v34  ;;  %v2295_v26 = vpack.c.bf16 %v2126_v62, %v2051_v27  ;;  %v1677_v39 = vsel %vm103_vm0, %v6042_v10, %v6076_v22  ;;  %v6101_v5 = vunpack.i.l.bf16 %v7941_v41 }
 0x2c8   :  { %v8020_v42 = vpop.permute.xlu1 %6174  ;;  %v2276_v2 = vpack.c.bf16 %v1976_v12, %v1901_v56  ;;  %v2239_v10 = vpack.c.bf16 %v1677_v39, %v7770_v30  ;;  %v1752_v21 = vsel %vm179_vm2, %v6047_v32, %v6081_v50  ;;  %v6091_v62 = vunpack.i.l.bf16 %v7928_v29 }
 0x2c9   :  { %2522 = vrot.lane.b32.xlu0 %v2275_v53, %s6745_s5  ;;  %v8025_v44 = vpop.permute.xlu0 %6139  ;;  %v2258_v12 = vpack.c.bf16 %v1827_v51, %v1752_v21  ;;  %v2052_v30 = vsel %vm483_vm6, %v6067_v43, %v6101_v5  ;;  %v6157_v32 = vunpack.i.h.bf16 %v7964_v49  ;;  %v6121_v56 = vunpack.i.l.bf16 %v7966_v31 }
 0x2ca   :  { %2560 = vrot.lane.b32.xlu1 %v2294_v15, %s6745_s5  ;;  %v2202_v55 = vsel %vm635_vm7, %v6111_v6, %v6112_v38  ;;  %v6167_v39 = vunpack.i.h.bf16 %v7991_v14  ;;  %v6162_v6 = vunpack.i.h.bf16 %v7978_v58 }
 0x2cb   :  { %v1679_v51 = vsel %vm103_vm0, %v6157_v32, %v6121_v56 }
 0x2cc   :  { %v8032_v23 = vpop.permute.xlu1 %6179 }
 0x2cd   :  { %2598 = vrot.lane.b32.xlu0 %v2313_v33, %s6745_s5  ;;  %v8039_v53 = vpop.permute.xlu0 %6144  ;;  %v6106_v33 = vunpack.i.l.bf16 %v7950_v19 }
 0x2ce   :  { %2448 = vrot.lane.b32.xlu1 %v2238_v9, %s6745_s5  ;;  %v6096_v9 = vunpack.i.l.bf16 %v7934_v17 }
 0x2d0   :  { %v8046_v8 = vpop.permute.xlu1 %6184  ;;  %v1977_v27 = vsel %vm407_vm3, %v6062_v34, %v6096_v9 }
 0x2d1   :  { %2486 = vrot.lane.b32.xlu0 %v2257_v54, %s6745_s5  ;;  %v8050_v15 = vpop.permute.xlu0 %6149  ;;  %v2127_v54 = vsel %vm559_vm5, %v6072_v52, %v6106_v33 }
 0x2d2   :  { %2562 = vrot.lane.b32.xlu1 %v2295_v26, %s6745_s5  ;;  %v2296_v52 = vpack.c.bf16 %v2127_v54, %v2052_v30  ;;  %v1902_v26 = vsel %vm331_vm4, %v6057_v11, %v6091_v62  ;;  %v2315_v11 = vpack.c.bf16 %v2202_v55, %v2202_v55  ;;  %v9550_v54 = vunpack.i.l.bf16 %v7980_v40 }
 0x2d3   :  { %v2277_v43 = vpack.c.bf16 %v1977_v27, %v1902_v26  ;;  %v6177_v27 = vunpack.i.h.bf16 %v8020_v42  ;;  %v6141_v55 = vunpack.i.l.bf16 %v8025_v44 }
 0x2d4   :  { %v8058_v63 = vpop.permute.xlu1 %6189 }
 0x2d5   :  { %2524 = vrot.lane.b32.xlu0 %v2276_v2, %s6745_s5  ;;  %v1678_v2 = vsel %vm103_vm0, %v6076_v22, %v6157_v32  ;;  %v2241_v32 = vpack.c.bf16 %v1679_v51, %v7794_v61  ;;  %v6136_v61 = vunpack.i.l.bf16 %v8013_v0 }
 0x2d6   :  { %v8063_v16 = vpop.permute.xlu0 %6199  ;;  %2600 = vrot.lane.b32.xlu1 %v2314_v48, %s6745_s5  ;;  %v2240_v22 = vpack.c.bf16 %v1678_v2, %v7773_v4  ;;  %v6172_v4 = vunpack.i.h.bf16 %v8007_v37  ;;  %v1754_v2 = vsel %vm179_vm2, %v6162_v6, %v9550_v54 }
 0x2d8   :  { %v8074_v17 = vpop.permute.xlu1 %6194 }
 0x2d9   :  { %2450 = vrot.lane.b32.xlu0 %v2239_v10, %s6745_s5  ;;  %v6131_v10 = vunpack.i.l.bf16 %v7997_v20 }
 0x2da   :  { %v8081_v29 = vpop.permute.xlu0 %6204  ;;  %2488 = vrot.lane.b32.xlu1 %v2258_v12, %s6745_s5  ;;  %v1828_v12 = vsel %vm255_vm1, %v6086_v59, %v6167_v39 }
 0x2db   :  { %v1829_v26 = vsel %vm255_vm1, %v6167_v39, %v6131_v10 }
 0x2dc   :  { %v8090_v34 = vpop.permute.xlu1 %6214  ;;  %v2260_v51 = vpack.c.bf16 %v1829_v26, %v1754_v2  ;;  %v6146_v26 = vunpack.i.l.bf16 %v8039_v53 }
 0x2dd   :  { %2564 = vrot.lane.b32.xlu0 %v2296_v52, %s6745_s5  ;;  %v1753_v52 = vsel %vm179_vm2, %v6081_v50, %v6162_v6  ;;  %v1978_v50 = vsel %vm407_vm3, %v6096_v9, %v6177_v27  ;;  %v6151_v6 = vunpack.i.l.bf16 %v8050_v15 }
 0x2de   :  { %v8094_v48 = vpop.permute.xlu0 %6209  ;;  %2526 = vrot.lane.b32.xlu1 %v2277_v43, %s6745_s5  ;;  %v2259_v43 = vpack.c.bf16 %v1828_v12, %v1753_v52  ;;  %v1979_v12 = vsel %vm407_vm3, %v6177_v27, %v6141_v55  ;;  %v6117_v52 = vunpack.i.h.bf16 %v7959_v3 }
 0x2e0   :  { %v8103_v21 = vpop.permute.xlu1 %6219 }
 0x2e1   :  { %2602 = vrot.lane.b32.xlu0 %v2315_v11, %s6745_s5  ;;  %v6187_v11 = vunpack.i.h.bf16 %v8046_v8 }
 0x2e2   :  { %v8109_v30 = vpop.permute.xlu0 %6224  ;;  %2452 = vrot.lane.b32.xlu1 %v2240_v22, %s6745_s5  ;;  %v1903_v22 = vsel %vm331_vm4, %v6091_v62, %v6172_v4  ;;  %v1904_v62 = vsel %vm331_vm4, %v6172_v4, %v6136_v61 }
 0x2e3   :  { %v2278_v54 = vpack.c.bf16 %v1978_v50, %v1903_v22  ;;  %v2128_v27 = vsel %vm559_vm5, %v6106_v33, %v6187_v11  ;;  %v6122_v33 = vunpack.i.h.bf16 %v7966_v31 }
 0x2e4   :  { %v8120_v59 = vpop.permute.xlu1 %6234 }
 0x2e5   :  { %2454 = vrot.lane.b32.xlu0 %v2241_v32, %s6745_s5  ;;  %v6182_v32 = vunpack.i.h.bf16 %v8032_v23 }
 0x2e6   :  { %v8128_v39 = vpop.permute.xlu0 %6229  ;;  %2490 = vrot.lane.b32.xlu1 %v2259_v43, %s6745_s5  ;;  %v6116_v43 = vunpack.i.l.bf16 %v7959_v3  ;;  %v2129_v3 = vsel %vm559_vm5, %v6187_v11, %v6151_v6  ;;  %v6191_v11 = vunpack.i.l.bf16 %v8058_v63 }
 0x2e7   :  { %v2053_v50 = vsel %vm483_vm6, %v6101_v5, %v6182_v32 }
 0x2e8   :  { %v8139_v9 = vpop.permute.xlu1 %6239  ;;  %v2297_v19 = vpack.c.bf16 %v2128_v27, %v2053_v50  ;;  %v2204_v41 = vsel %vm635_vm7, %v6116_v43, %v6117_v52 }
 0x2e9   :  { %2492 = vrot.lane.b32.xlu0 %v2260_v51, %s6745_s5  ;;  %v2279_v51 = vpack.c.bf16 %v1979_v12, %v1904_v62  ;;  %v2203_v12 = vsel %vm635_vm7, %v6112_v38, %v6116_v43  ;;  %v2317_v27 = vpack.c.bf16 %v2204_v41, %v2204_v41  ;;  %v6127_v38 = vunpack.i.h.bf16 %v7980_v40 }
 0x2ea   :  { %v8149_v2 = vpop.permute.xlu0 %6249  ;;  %2528 = vrot.lane.b32.xlu1 %v2278_v54, %s6745_s5  ;;  %v2054_v54 = vsel %vm483_vm6, %v6182_v32, %v6146_v26  ;;  %v1680_v32 = vsel %vm103_vm0, %v6121_v56, %v6122_v33  ;;  %v2205_v43 = vsel %vm635_vm7, %v6117_v52, %v6191_v11  ;;  %v1681_v52 = vsel %vm103_vm0, %v6122_v33, %v6156_v35 }
 0x2eb   :  { %v2298_v5 = vpack.c.bf16 %v2129_v3, %v2054_v54  ;;  %v2316_v3 = vpack.c.bf16 %v2203_v12, %v2203_v12  ;;  %v2242_v31 = vpack.c.bf16 %v1680_v32, %v7797_v46  ;;  %v6142_v54 = vunpack.i.h.bf16 %v8025_v44 }
 0x2ec   :  { %v8159_v4 = vpop.permute.xlu1 %6244  ;;  %v9559_v12 = vunpack.i.l.bf16 %v7980_v40  ;;  %v6166_v46 = vunpack.i.l.bf16 %v7991_v14  ;;  %v6152_v33 = vunpack.i.h.bf16 %v8050_v15  ;;  %v2243_v14 = vpack.c.bf16 %v1681_v52, %v7808_v57 }
 0x2ed   :  { %2530 = vrot.lane.b32.xlu0 %v2279_v51, %s6745_s5  ;;  %v6132_v51 = vunpack.i.h.bf16 %v7997_v20  ;;  %v6137_v20 = vunpack.i.h.bf16 %v8013_v0  ;;  %v6147_v44 = vunpack.i.h.bf16 %v8039_v53  ;;  %v9552_v0 = vunpack.i.h.bf16 %v8058_v63 }
 0x2ee   :  { %v8165_v22 = vpop.permute.xlu0 %6254  ;;  %2566 = vrot.lane.b32.xlu1 %v2297_v19, %s6745_s5  ;;  %v2130_v57 = vsel %vm559_vm5, %v6151_v6, %v6152_v33 }
 0x2ef   :  { %v1830_v56 = vsel %vm255_vm1, %v6131_v10, %v6132_v51  ;;  %v2206_v53 = vsel %vm635_vm7, %v6191_v11, %v9552_v0 }
 0x2f0   :  { %v8174_v62 = vpop.permute.xlu1 %6259 }
 0x2f1   :  { %2568 = vrot.lane.b32.xlu0 %v2298_v5, %s6745_s5  ;;  %v2318_v5 = vpack.c.bf16 %v2205_v43, %v2205_v43  ;;  %v1980_v43 = vsel %vm407_vm3, %v6141_v55, %v6142_v54 }
 0x2f2   :  { %v8180_v50 = vpop.permute.xlu0 %6269  ;;  %2606 = vrot.lane.b32.xlu1 %v2317_v27, %s6745_s5  ;;  %v1755_v27 = vsel %vm179_vm2, %v9559_v12, %v6127_v38 }
 0x2f3   :  { %v2261_v32 = vpack.c.bf16 %v1830_v56, %v1755_v27  ;;  %v1905_v56 = vsel %vm331_vm4, %v6136_v61, %v6137_v20  ;;  %v6171_v27 = vunpack.i.l.bf16 %v8007_v37 }
 0x2f4   :  { %v8187_v19 = vpop.permute.xlu1 %6264 }
 0x2f5   :  { %2604 = vrot.lane.b32.xlu0 %v2316_v3, %s6745_s5  ;;  %v6161_v3 = vunpack.i.l.bf16 %v7978_v58  ;;  %v6176_v58 = vunpack.i.l.bf16 %v8020_v42 }
 0x2f6   :  { %2456 = vrot.lane.b32.xlu1 %v2242_v31, %s6745_s5  ;;  %v1831_v31 = vsel %vm255_vm1, %v6132_v51, %v6166_v46 }
 0x2f7   :  { %v8194_v41 = vpop.permute.xlu0 %6314  ;;  %v1756_v12 = vsel %vm179_vm2, %v6127_v38, %v6161_v3  ;;  %v1981_v52 = vsel %vm407_vm3, %v6142_v54, %v6176_v58  ;;  %v2055_v38 = vsel %vm483_vm6, %v6146_v26, %v6147_v44 }
 0x2f8   :  { %v8206_v10 = vpop.permute.xlu1 %6274  ;;  %v2262_v51 = vpack.c.bf16 %v1831_v31, %v1756_v12  ;;  %v2299_v6 = vpack.c.bf16 %v2130_v57, %v2055_v38  ;;  %v6237_v31 = vunpack.i.h.bf16 %v8120_v59  ;;  %v2319_v12 = vpack.c.bf16 %v2206_v53, %v2206_v53 }
 0x2f9   :  { %2608 = vrot.lane.b32.xlu0 %v2318_v5, %s6745_s5  ;;  %v2280_v5 = vpack.c.bf16 %v1980_v43, %v1905_v56  ;;  %v1906_v43 = vsel %vm331_vm4, %v6137_v20, %v6171_v27  ;;  %v6211_v53 = vunpack.i.l.bf16 %v8094_v48 }
 0x2fa   :  { %2494 = vrot.lane.b32.xlu1 %v2261_v32, %s6745_s5  ;;  %v6186_v32 = vunpack.i.l.bf16 %v8046_v8  ;;  %v2281_v54 = vpack.c.bf16 %v1981_v52, %v1906_v43  ;;  %v1682_v38 = vsel %vm103_vm0, %v6156_v35, %v6237_v31  ;;  %v9553_v35 = vunpack.i.l.bf16 %v8103_v21 }
 0x2fb   :  { %v8213_v40 = vpop.permute.xlu0 %6319  ;;  %v2244_v49 = vpack.c.bf16 %v1682_v38, %v7805_v18  ;;  %v6267_v38 = vunpack.i.h.bf16 %v8187_v19 }
 0x2fc   :  { %v8224_v55 = vpop.permute.xlu1 %6279  ;;  %v2131_v56 = vsel %vm559_vm5, %v6152_v33, %v6186_v32 }
 0x2fd   :  { %2458 = vrot.lane.b32.xlu0 %v2243_v14, %s6745_s5  ;;  %v9554_v14 = vunpack.i.l.bf16 %v8032_v23 }
 0x2fe   :  { %2532 = vrot.lane.b32.xlu1 %v2280_v5, %s6745_s5  ;;  %v9551_v5 = vunpack.i.l.bf16 %v8063_v16 }
 0x2ff   :  { %v8232_v61 = vpop.permute.xlu0 %6324  ;;  %v2056_v11 = vsel %vm483_vm6, %v6147_v44, %v9554_v14  ;;  %v6196_v14 = vunpack.i.l.bf16 %v8074_v17 }
 0x300   :  { %v8243_v15 = vpop.permute.xlu1 %6284  ;;  %v1683_v57 = vsel %vm103_vm0, %v6237_v31, %v9551_v5  ;;  %v2300_v33 = vpack.c.bf16 %v2131_v56, %v2056_v11  ;;  %v6257_v5 = vunpack.i.h.bf16 %v8165_v22  ;;  %v6206_v56 = vunpack.i.l.bf16 %v8081_v29 }
 0x301   :  { %2496 = vrot.lane.b32.xlu0 %v2262_v51, %s6745_s5  ;;  %v6247_v51 = vunpack.i.h.bf16 %v8159_v4  ;;  %v2245_v43 = vpack.c.bf16 %v1683_v57, %v7839_v47  ;;  %v6252_v47 = vunpack.i.h.bf16 %v8149_v2 }
 0x302   :  { %2570 = vrot.lane.b32.xlu1 %v2299_v6, %s6745_s5  ;;  %v6242_v6 = vunpack.i.h.bf16 %v8139_v9  ;;  %v1983_v18 = vsel %vm407_vm3, %v6257_v5, %v9553_v35 }
 0x303   :  { %v8253_v26 = vpop.permute.xlu0 %6329  ;;  %v1833_v11 = vsel %vm255_vm1, %v6247_v51, %v6211_v53 }
 0x304   :  { %v8261_v20 = vpop.permute.xlu1 %6289  ;;  %v1757_v31 = vsel %vm179_vm2, %v6161_v3, %v6242_v6  ;;  %v1758_v0 = vsel %vm179_vm2, %v6242_v6, %v6206_v56  ;;  %v6262_v6 = vunpack.i.h.bf16 %v8174_v62 }
 0x305   :  { %2534 = vrot.lane.b32.xlu0 %v2281_v54, %s6745_s5  ;;  %v1832_v54 = vsel %vm255_vm1, %v6166_v46, %v6247_v51  ;;  %v2264_v51 = vpack.c.bf16 %v1833_v11, %v1758_v0  ;;  %v1907_v0 = vsel %vm331_vm4, %v6171_v27, %v6252_v47 }
 0x306   :  { %2610 = vrot.lane.b32.xlu1 %v2319_v12, %s6745_s5  ;;  %v2263_v57 = vpack.c.bf16 %v1832_v54, %v1757_v31  ;;  %v1982_v54 = vsel %vm407_vm3, %v6176_v58, %v6257_v5  ;;  %v6197_v5 = vunpack.i.h.bf16 %v8074_v17 }
 0x307   :  { %v8270_v52 = vpop.permute.xlu0 %6334  ;;  %v2282_v58 = vpack.c.bf16 %v1982_v54, %v1907_v0  ;;  %v9561_v54 = vunpack.i.h.bf16 %v8058_v63 }
 0x308   :  { %v8278_v44 = vpop.permute.xlu1 %6294 }
 0x309   :  { %2572 = vrot.lane.b32.xlu0 %v2300_v33, %s6745_s5  ;;  %v6216_v33 = vunpack.i.l.bf16 %v8090_v34  ;;  %v2207_v17 = vsel %vm635_vm7, %v9561_v54, %v6196_v14  ;;  %v6236_v54 = vunpack.i.l.bf16 %v8120_v59 }
 0x30a   :  { %2462 = vrot.lane.b32.xlu1 %v2245_v43, %s6745_s5  ;;  %v6231_v43 = vunpack.i.l.bf16 %v8128_v39 }
 0x30b   :  { %v8285_v12 = vpop.permute.xlu0 %6339 }
 0x30c   :  { %v8294_v46 = vpop.permute.xlu1 %6299  ;;  %v2133_v11 = vsel %vm559_vm5, %v6267_v38, %v6231_v43 }
 0x30d   :  { %2460 = vrot.lane.b32.xlu0 %v2244_v49, %s6745_s5  ;;  %v1908_v49 = vsel %vm331_vm4, %v6252_v47, %v6216_v33  ;;  %v6212_v47 = vunpack.i.h.bf16 %v8094_v48  ;;  %v2320_v48 = vpack.c.bf16 %v2207_v17, %v2207_v17 }
 0x30e   :  { %2498 = vrot.lane.b32.xlu1 %v2263_v57, %s6745_s5  ;;  %v2283_v35 = vpack.c.bf16 %v1983_v18, %v1908_v49  ;;  %v6226_v57 = vunpack.i.l.bf16 %v8109_v30  ;;  %v2132_v18 = vsel %vm559_vm5, %v6186_v32, %v6267_v38  ;;  %v9560_v49 = vunpack.i.l.bf16 %v8032_v23 }
 0x30f   :  { %v8302_v3 = vpop.permute.xlu0 %6344  ;;  %v6202_v32 = vunpack.i.h.bf16 %v8063_v16  ;;  %v6207_v38 = vunpack.i.h.bf16 %v8081_v29  ;;  %v1834_v63 = vsel %vm255_vm1, %v6211_v53, %v6212_v47 }
 0x310   :  { %v8312_v31 = vpop.permute.xlu1 %6304 }
 0x311   :  { %2500 = vrot.lane.b32.xlu0 %v2264_v51, %s6745_s5  ;;  %v2058_v51 = vsel %vm483_vm6, %v6262_v6, %v6226_v57 }
 0x312   :  { %2538 = vrot.lane.b32.xlu1 %v2283_v35, %s6745_s5  ;;  %v2302_v27 = vpack.c.bf16 %v2133_v11, %v2058_v51  ;;  %v2057_v35 = vsel %vm483_vm6, %v9560_v49, %v6262_v6  ;;  %v2208_v11 = vsel %vm635_vm7, %v6196_v14, %v6197_v5  ;;  %v6271_v6 = vunpack.i.l.bf16 %v8180_v50 }
 0x313   :  { %v8320_v42 = vpop.permute.xlu0 %6349  ;;  %v2301_v8 = vpack.c.bf16 %v2132_v18, %v2057_v35  ;;  %v2321_v51 = vpack.c.bf16 %v2208_v11, %v2208_v11  ;;  %v9562_v18 = vunpack.i.l.bf16 %v8063_v16  ;;  %v1759_v14 = vsel %vm179_vm2, %v6206_v56, %v6207_v38 }
 0x314   :  { %v8329_v37 = vpop.permute.xlu1 %6309  ;;  %v2265_v53 = vpack.c.bf16 %v1834_v63, %v1759_v14  ;;  %v6217_v35 = vunpack.i.h.bf16 %v8090_v34  ;;  %v2209_v17 = vsel %vm635_vm7, %v6197_v5, %v6271_v6  ;;  %v9563_v56 = vunpack.i.l.bf16 %v8103_v21 }
 0x315   :  { %2536 = vrot.lane.b32.xlu0 %v2282_v58, %s6745_s5  ;;  %v1684_v29 = vsel %vm103_vm0, %v9562_v18, %v6202_v32  ;;  %v2322_v34 = vpack.c.bf16 %v2209_v17, %v2209_v17  ;;  %v6227_v5 = vunpack.i.h.bf16 %v8109_v30  ;;  %v6256_v18 = vunpack.i.l.bf16 %v8165_v22 }
 0x316   :  { %2576 = vrot.lane.b32.xlu1 %v2302_v27, %s6745_s5  ;;  %v6222_v27 = vunpack.i.h.bf16 %v8103_v21  ;;  %v2246_v16 = vpack.c.bf16 %v1684_v29, %v7830_v36  ;;  %v1909_v59 = vsel %vm331_vm4, %v6216_v33, %v6217_v35  ;;  %v6251_v29 = vunpack.i.l.bf16 %v8149_v2 }
 0x317   :  { %v8338_v0 = vpop.permute.xlu0 %6359  ;;  %v6246_v14 = vunpack.i.l.bf16 %v8159_v4  ;;  %v6241_v22 = vunpack.i.l.bf16 %v8139_v9  ;;  %v6266_v17 = vunpack.i.l.bf16 %v8187_v19 }
 0x318   :  { %v8345_v23 = vpop.permute.xlu1 %6354  ;;  %v1984_v11 = vsel %vm407_vm3, %v9563_v56, %v6222_v27  ;;  %v1910_v4 = vsel %vm331_vm4, %v6217_v35, %v6251_v29 }
 0x319   :  { %2574 = vrot.lane.b32.xlu0 %v2301_v8, %s6745_s5  ;;  %v2284_v21 = vpack.c.bf16 %v1984_v11, %v1909_v59  ;;  %v1835_v56 = vsel %vm255_vm1, %v6212_v47, %v6246_v14  ;;  %v1760_v11 = vsel %vm179_vm2, %v6207_v38, %v6241_v22  ;;  %v6317_v59 = vunpack.i.h.bf16 %v8194_v41 }
 0x31a   :  { %2612 = vrot.lane.b32.xlu1 %v2320_v48, %s6745_s5  ;;  %v6232_v48 = vunpack.i.h.bf16 %v8128_v39  ;;  %v2266_v47 = vpack.c.bf16 %v1835_v56, %v1760_v11  ;;  %v9555_v11 = vunpack.i.l.bf16 %v8243_v15 }
 0x31b   :  { %v8349_v58 = vpop.permute.xlu0 %6369 }
 0x31c   :  { %v8358_v49 = vpop.permute.xlu1 %6364  ;;  %v2134_v39 = vsel %vm559_vm5, %v6231_v43, %v6232_v48 }
 0x31d   :  { %2614 = vrot.lane.b32.xlu0 %v2321_v51, %s6745_s5  ;;  %v1685_v51 = vsel %vm103_vm0, %v6202_v32, %v6236_v54  ;;  %v2059_v32 = vsel %vm483_vm6, %v6226_v57, %v6227_v5  ;;  %v6272_v57 = vunpack.i.h.bf16 %v8180_v50 }
 0x31e   :  { %2502 = vrot.lane.b32.xlu1 %v2265_v53, %s6745_s5  ;;  %v2247_v30 = vpack.c.bf16 %v1685_v51, %v7834_v13  ;;  %v1985_v53 = vsel %vm407_vm3, %v6222_v27, %v6256_v18  ;;  %v2303_v43 = vpack.c.bf16 %v2134_v39, %v2059_v32  ;;  %v6261_v13 = vunpack.i.l.bf16 %v8174_v62 }
 0x31f   :  { %v8363_v8 = vpop.permute.xlu0 %6384  ;;  %v2285_v27 = vpack.c.bf16 %v1985_v53, %v1910_v4  ;;  %v2210_v38 = vsel %vm635_vm7, %v6271_v6, %v6272_v57  ;;  %v6327_v32 = vunpack.i.h.bf16 %v8232_v61  ;;  %v9556_v4 = vunpack.i.l.bf16 %v8261_v20 }
 0x320   :  { %v8372_v63 = vpop.permute.xlu1 %6374  ;;  %v2060_v51 = vsel %vm483_vm6, %v6227_v5, %v6261_v13  ;;  %v2323_v5 = vpack.c.bf16 %v2210_v38, %v2210_v38  ;;  %v6332_v38 = vunpack.i.h.bf16 %v8253_v26 }
 0x321   :  { %2464 = vrot.lane.b32.xlu0 %v2246_v16, %s6745_s5 }
 0x322   :  { %2616 = vrot.lane.b32.xlu1 %v2322_v34, %s6745_s5  ;;  %v2135_v34 = vsel %vm559_vm5, %v6232_v48, %v6266_v17 }
 0x323   :  { %v8378_v36 = vpop.permute.xlu0 %1673  ;;  %v2304_v39 = vpack.c.bf16 %v2135_v34, %v2060_v51  ;;  %v6337_v34 = vunpack.i.h.bf16 %v8270_v52 }
 0x324   :  { %v8385_v33 = vpop.permute.xlu1 %6379 }
 0x325   :  { %2540 = vrot.lane.b32.xlu0 %v2284_v21, %s6745_s5  ;;  %v6281_v21 = vunpack.i.l.bf16 %v8224_v55 }
 0x326   :  { %2466 = vrot.lane.b32.xlu1 %v2247_v30, %s6745_s5  ;;  %v1686_v30 = vsel %vm103_vm0, %v6236_v54, %v6317_v59 }
 0x327   :  { %v8392_v16 = vpop.permute.xlu0 %1823  ;;  %v1687_v6 = vsel %vm103_vm0, %v6317_v59, %v6281_v21  ;;  %v2248_v54 = vpack.c.bf16 %v1686_v30, %v7852_v28  ;;  %v1837_v28 = vsel %vm255_vm1, %v6327_v32, %v9556_v4 }
 0x328   :  { %v8402_v9 = vpop.permute.xlu1 %6389  ;;  %v2249_v59 = vpack.c.bf16 %v1687_v6, %v7869_v1  ;;  %v1986_v1 = vsel %vm407_vm3, %v6256_v18, %v6337_v34  ;;  %v6347_v6 = vunpack.i.h.bf16 %v8302_v3  ;;  %v6311_v18 = vunpack.i.l.bf16 %v8329_v37 }
 0x329   :  { %2578 = vrot.lane.b32.xlu0 %v2303_v43, %s6745_s5  ;;  %v6322_v43 = vunpack.i.h.bf16 %v8213_v40 }
 0x32a   :  { %2542 = vrot.lane.b32.xlu1 %v2285_v27, %s6745_s5  ;;  %v1836_v27 = vsel %vm255_vm1, %v6246_v14, %v6327_v32  ;;  %v6301_v14 = vunpack.i.l.bf16 %v8294_v46 }
 0x32b   :  { %v8409_v35 = vpop.permute.xlu0 %1898  ;;  %v1761_v51 = vsel %vm179_vm2, %v6241_v22, %v6322_v43  ;;  %v6296_v22 = vunpack.i.l.bf16 %v8278_v44 }
 0x32c   :  { %v8420_v48 = vpop.permute.xlu1 %1748  ;;  %v2267_v30 = vpack.c.bf16 %v1836_v27, %v1761_v51  ;;  %v6342_v27 = vunpack.i.h.bf16 %v8285_v12  ;;  %v6277_v51 = vunpack.i.h.bf16 %v8206_v10 }
 0x32d   :  { %2504 = vrot.lane.b32.xlu0 %v2266_v47, %s6745_s5  ;;  %v1912_v2 = vsel %vm331_vm4, %v6332_v38, %v6296_v22 }
 0x32e   :  { %2580 = vrot.lane.b32.xlu1 %v2304_v39, %s6745_s5 }
 0x32f   :  { %v8424_v53 = vpop.permute.xlu0 %2048 }
 0x330   :  { %v8433_v56 = vpop.permute.xlu1 %1973 }
 0x331   :  { %2618 = vrot.lane.b32.xlu0 %v2323_v5, %s6745_s5  ;;  %v1762_v5 = vsel %vm179_vm2, %v6322_v43, %v9555_v11  ;;  %v1987_v43 = vsel %vm407_vm3, %v6337_v34, %v6301_v14  ;;  %v6306_v34 = vunpack.i.l.bf16 %v8312_v31 }
 0x332   :  { %2468 = vrot.lane.b32.xlu1 %v2248_v54, %s6745_s5  ;;  %v2268_v32 = vpack.c.bf16 %v1837_v28, %v1762_v5  ;;  %v6276_v28 = vunpack.i.l.bf16 %v8206_v10  ;;  %v2287_v5 = vpack.c.bf16 %v1987_v43, %v1912_v2  ;;  %v2137_v10 = vsel %vm559_vm5, %v6347_v6, %v6311_v18 }
 0x333   :  { %v8439_v47 = vpop.permute.xlu0 %2198 }
 0x334   :  { %v8450_v39 = vpop.permute.xlu1 %2123 }
 0x335   :  { %2470 = vrot.lane.b32.xlu0 %v2249_v59, %s6745_s5  ;;  %v1911_v59 = vsel %vm331_vm4, %v6251_v29, %v6332_v38  ;;  %v2136_v29 = vsel %vm559_vm5, %v6266_v17, %v6347_v6  ;;  %v6282_v38 = vunpack.i.h.bf16 %v8224_v55  ;;  %v6351_v6 = vunpack.i.l.bf16 %v8320_v42 }
 0x336   :  { %2506 = vrot.lane.b32.xlu1 %v2267_v30, %s6745_s5  ;;  %v2286_v4 = vpack.c.bf16 %v1986_v1, %v1911_v59  ;;  %v2061_v1 = vsel %vm483_vm6, %v6261_v13, %v6342_v27  ;;  %v2211_v59 = vsel %vm635_vm7, %v6272_v57, %v6276_v28 }
 0x337   :  { %v8458_v54 = vpop.permute.xlu0 %2484  ;;  %v2305_v17 = vpack.c.bf16 %v2136_v29, %v2061_v1  ;;  %v6292_v29 = vunpack.i.h.bf16 %v8261_v20  ;;  %v2324_v1 = vpack.c.bf16 %v2211_v59, %v2211_v59  ;;  %v2213_v50 = vsel %vm635_vm7, %v6277_v51, %v6351_v6 }
 0x338   :  { %v2447_v11 = vpop.permute.xlu1 %2446  ;;  %v9565_v59 = vunpack.i.l.bf16 %v8243_v15 }
 0x339   :  { %2508 = vrot.lane.b32.xlu0 %v2268_v32, %s6745_s5  ;;  %v2212_v32 = vsel %vm635_vm7, %v6276_v28, %v6277_v51  ;;  %v9564_v28 = vunpack.i.l.bf16 %v8261_v20 }
 0x33a   :  { %2544 = vrot.lane.b32.xlu1 %v2286_v4, %s6745_s5  ;;  %v2062_v4 = vsel %vm483_vm6, %v6342_v27, %v6306_v34  ;;  %v2325_v2 = vpack.c.bf16 %v2212_v32, %v2212_v32  ;;  %v1688_v27 = vsel %vm103_vm0, %v6281_v21, %v6282_v38  ;;  %v6316_v21 = vunpack.i.l.bf16 %v8194_v41 }
 0x33b   :  { %v8479_v30 = vpop.permute.xlu0 %2522  ;;  %v2306_v13 = vpack.c.bf16 %v2137_v10, %v2062_v4  ;;  %v6287_v10 = vunpack.i.h.bf16 %v8243_v15  ;;  %v2250_v55 = vpack.c.bf16 %v1688_v27, %v7872_v60  ;;  %v6302_v4 = vunpack.i.h.bf16 %v8294_v46 }
 0x33c   :  { %v8489_v19 = vpop.permute.xlu1 %2560  ;;  %v1689_v51 = vsel %vm103_vm0, %v6282_v38, %v6316_v21  ;;  %v6321_v15 = vunpack.i.l.bf16 %v8213_v40  ;;  %v8660_v40 = vld [vmem:[%s9539_s3] sm:$0x1f]  }
 0x33d   :  { %2546 = vrot.lane.b32.xlu0 %v2287_v5, %s6745_s5  ;;  %v1763_v60 = vsel %vm179_vm2, %v9565_v59, %v6287_v10 }
 0x33e   :  { %2582 = vrot.lane.b32.xlu1 %v2305_v17, %s6745_s5  ;;  %v1838_v17 = vsel %vm255_vm1, %v9564_v28, %v6292_v29  ;;  %v2251_v28 = vpack.c.bf16 %v1689_v51, %v7884_v25  ;;  %v1764_v59 = vsel %vm179_vm2, %v6287_v10, %v6321_v15 }
 0x33f   :  { %v8496_v62 = vpop.permute.xlu0 %2598  ;;  %v2269_v27 = vpack.c.bf16 %v1838_v17, %v1763_v60 }
 0x340   :  { %v2449_v43 = vpop.permute.xlu1 %2448 }
 0x341   :  { %2584 = vrot.lane.b32.xlu0 %v2306_v13, %s6745_s5  ;;  %v2326_v13 = vpack.c.bf16 %v2213_v50, %v2213_v50  ;;  %v1988_v50 = vsel %vm407_vm3, %v6301_v14, %v6302_v4  ;;  %v6307_v14 = vunpack.i.h.bf16 %v8312_v31  ;;  %v2637_v60 = vsel %vm2636_vm13, %v2447_v11, %v2449_v43 }
 0x342   :  { %2622 = vrot.lane.b32.xlu1 %v2325_v2, %s6745_s5  ;;  %v6297_v2 = vunpack.i.h.bf16 %v8278_v44  ;;  %v6336_v44 = vunpack.i.l.bf16 %v8270_v52  ;;  %v6331_v11 = vunpack.i.l.bf16 %v8253_v26 }
 0x343   :  { %v2487_v5 = vpop.permute.xlu0 %2486 }
 0x344   :  { %v8514_v57 = vpop.permute.xlu1 %2562  ;;  %v1913_v46 = vsel %vm331_vm4, %v6296_v22, %v6297_v2  ;;  %v6352_v22 = vunpack.i.h.bf16 %v8320_v42 }
 0x345   :  { %2620 = vrot.lane.b32.xlu0 %v2324_v1, %s6745_s5  ;;  %v6326_v1 = vunpack.i.l.bf16 %v8232_v61 }
 0x346   :  { %2472 = vrot.lane.b32.xlu1 %v2250_v55, %s6745_s5  ;;  %v6312_v55 = vunpack.i.h.bf16 %v8329_v37  ;;  %v2063_v37 = vsel %vm483_vm6, %v6306_v34, %v6307_v14  ;;  %v2214_v34 = vsel %vm635_vm7, %v6351_v6, %v6352_v22 }
 0x347   :  { %v2525_v32 = vpop.permute.xlu0 %2524  ;;  %v1839_v17 = vsel %vm255_vm1, %v6292_v29, %v6326_v1  ;;  %v2288_v29 = vpack.c.bf16 %v1988_v50, %v1913_v46  ;;  %v1989_v50 = vsel %vm407_vm3, %v6302_v4, %v6336_v44  ;;  %v6356_v4 = vunpack.i.l.bf16 %v8345_v23 }
 0x348   :  { %v8531_v20 = vpop.permute.xlu1 %2600  ;;  %v2138_v51 = vsel %vm559_vm5, %v6311_v18, %v6312_v55  ;;  %v1914_v18 = vsel %vm331_vm4, %v6297_v2, %v6331_v11  ;;  %v6341_v2 = vunpack.i.l.bf16 %v8285_v12 }
 0x349   :  { %2624 = vrot.lane.b32.xlu0 %v2326_v13, %s6745_s5 }
 0x34a   :  { %2510 = vrot.lane.b32.xlu1 %v2269_v27, %s6745_s5  ;;  %v2270_v27 = vpack.c.bf16 %v1839_v17, %v1764_v59  ;;  %v2307_v17 = vpack.c.bf16 %v2138_v51, %v2063_v37  ;;  %v2327_v51 = vpack.c.bf16 %v2214_v34, %v2214_v34  ;;  %v6376_v34 = vunpack.i.l.bf16 %v8372_v63 }
 0x34b   :  { %v2451_v38 = vpop.permute.xlu0 %2450 }
 0x34c   :  { %v2638_v13 = vsel %vm2636_vm13, %v2449_v43, %v2451_v38  ;;  %v8554_v25 = vpop.permute.xlu1 %2488 }
 0x34d   :  { %2474 = vrot.lane.b32.xlu0 %v2251_v28, %s6745_s5  ;;  %2863 = vmatprep.subr.bf16.mxu0 %v2638_v13  ;;  %v2656_v10 = vsel %vm2636_vm13, %v2487_v5, %v8554_v25  ;;  %v2655_v28 = vsel %vm2636_vm13, %v8458_v54, %v2487_v5  ;;  %v6346_v13 = vunpack.i.l.bf16 %v8302_v3  ;;  %v2289_v5 = vpack.c.bf16 %v1989_v50, %v1914_v18 }
 0x34e   :  { %2864 = vmatpush1.bf16.msra.mxu0 %v2637_v60  ;;  %2548 = vrot.lane.b32.xlu1 %v2288_v29, %s6745_s5  ;;  %v6357_v60 = vunpack.i.h.bf16 %v8345_v23  ;;  %v2673_v29 = vsel %vm2636_vm13, %v8479_v30, %v2525_v32  ;;  %v6366_v50 = vunpack.i.l.bf16 %v8358_v49  ;;  %v9567_v23 = vld [vmem:[#allocation3_spill] sm:$0xff] }
 0x34f   :  { %v8564_v43 = vpop.permute.xlu0 %2564  ;;  %2865 = vmatprep.subr.bf16.mxu0 %v2656_v10  ;;  %v2139_v59 = vsel %vm559_vm5, %v6312_v55, %v6346_v13  ;;  %v2064_v10 = vsel %vm483_vm6, %v6307_v14, %v6341_v2  ;;  %v6361_v14 = vunpack.i.l.bf16 %v8338_v0 }
 0x350   :  { %v8579_v46 = vpop.permute.xlu1 %2526  ;;  %v2692_v55 = vsel %vm2636_vm13, %v8514_v57, %v8564_v43  ;;  %v2308_v37 = vpack.c.bf16 %v2139_v59, %v2064_v10  ;;  %v1691_v41 = vsel %vm103_vm0, %v6356_v4, %v6357_v60  ;;  %v6377_v59 = vunpack.i.h.bf16 %v8372_v63 }
 0x351   :  { %2512 = vrot.lane.b32.xlu0 %v2270_v27, %s6745_s5  ;;  %v2674_v31 = vsel %vm2636_vm13, %v2525_v32, %v8579_v46  ;;  %v1690_v27 = vsel %vm103_vm0, %v6316_v21, %v6356_v4  ;;  %v6367_v21 = vunpack.i.h.bf16 %v8358_v49  ;;  %v1840_v4 = vsel %vm255_vm1, %v6326_v1, %v6366_v50 }
 0x352   :  { %2866 = vmatpush1.bf16.msra.mxu0 %v2655_v28  ;;  %2586 = vrot.lane.b32.xlu1 %v2307_v17, %s6745_s5  ;;  %v6362_v28 = vunpack.i.h.bf16 %v8338_v0  ;;  %v2253_v1 = vpack.c.bf16 %v1691_v41, %v7914_v24  ;;  %v1990_v10 = vsel %vm407_vm3, %v6336_v44, %v6376_v34  ;;  %v1991_v52 = vsel %vm407_vm3, %v6376_v34, %v6377_v59 }
 0x353   :  { %v8590_v54 = vpop.permute.xlu0 %2602  ;;  %2867 = vmatprep.subr.bf16.mxu0 %v2674_v31  ;;  %v2252_v31 = vpack.c.bf16 %v1690_v27, %v7875_v7  ;;  %v6381_v27 = vunpack.i.l.bf16 %v8385_v33  ;;  %v6382_v44 = vunpack.i.h.bf16 %v8385_v33  ;;  %v2274_v49 = vpack.c.bf16 %v8392_v16, %v8420_v48 }
 0x354   :  { %v2453_v6 = vpop.permute.xlu1 %2452  ;;  %v2312_v33 = vpack.c.bf16 %v8450_v39, %v8424_v53 }
 0x355   :  { %2550 = vrot.lane.b32.xlu0 %v2289_v5, %s6745_s5  ;;  %v2639_v30 = vsel %vm2636_vm13, %v2451_v38, %v2453_v6  ;;  %v2691_v38 = vsel %vm2636_vm13, %v8489_v19, %v8514_v57  ;;  %v2709_v5 = vsel %vm2636_vm13, %v8496_v62, %v8531_v20  ;;  %v2710_v19 = vsel %vm2636_vm13, %v8531_v20, %v8590_v54 }
 0x356   :  { %2868 = vmatpush1.bf16.msra.mxu0 %v2673_v29  ;;  %2626 = vrot.lane.b32.xlu1 %v2327_v51, %s6745_s5  ;;  %v6371_v57 = vunpack.i.l.bf16 %v8349_v58  ;;  %v1765_v62 = vsel %vm179_vm2, %v6321_v15, %v6361_v14  ;;  %v1841_v20 = vsel %vm255_vm1, %v6366_v50, %v6367_v21  ;;  %v2807_v29 = vsel %vm779_vm8, %v2709_v5, 0 }
 0x357   :  { %2869 = vmatprep.subr.bf16.mxu0 %v2692_v55  ;;  %v8612_v32 = vpop.permute.xlu0 %2454  ;;  %v2271_v24 = vpack.c.bf16 %v1840_v4, %v1765_v62  ;;  %v1766_v15 = vsel %vm179_vm2, %v6361_v14, %v6362_v28  ;;  %v6372_v51 = vunpack.i.h.bf16 %v8349_v58  ;;  %v6386_v55 = vunpack.i.l.bf16 %v8363_v8 }
 0x358   :  { %v2640_v18 = vsel %vm2636_vm13, %v2453_v6, %v8612_v32  ;;  %v2491_v17 = vpop.permute.xlu1 %2490  ;;  %v1915_v50 = vsel %vm331_vm4, %v6331_v11, %v6371_v57  ;;  %v2066_v12 = vsel %vm483_vm6, %v6381_v27, %v6382_v44  ;;  %v2293_v58 = vpack.c.bf16 %v8433_v56, %v8409_v35 }
 0x359   :  { %2588 = vrot.lane.b32.xlu0 %v2308_v37, %s6745_s5  ;;  %2906 = vmatprep.subr.bf16.mxu1 %v2640_v18  ;;  %v2657_v7 = vsel %vm2636_vm13, %v8554_v25, %v2491_v17  ;;  %v2272_v37 = vpack.c.bf16 %v1841_v20, %v1766_v15  ;;  %v2290_v41 = vpack.c.bf16 %v1990_v10, %v1915_v50 }
 0x35a   :  { %2870 = vmatpush1.bf16.msra.mxu0 %v2691_v38  ;;  %2907 = vmatpush1.bf16.msra.mxu1 %v2639_v30  ;;  %v1916_v18 = vsel %vm331_vm4, %v6371_v57, %v6372_v51  ;;  %v6387_v38 = vunpack.i.h.bf16 %v8363_v8  ;;  %v2140_v4 = vsel %vm559_vm5, %v6346_v13, %v6386_v55  ;;  %v1767_v50 = vsel %vm179_vm2, %v6362_v28, %v8420_v48 }
 0x35b   :  { %5203 = vmatprep.subr.msk.bf16.mxu0 %vm779_vm8, %v2710_v19  ;;  %v8642_v61 = vpop.permute.xlu0 %2492  ;;  %2476 = vrot.lane.b32.xlu1 %v2252_v31, %s6745_s5  ;;  %v9566_v31 = vmov 0   ;;  %v2291_v5 = vpack.c.bf16 %v1991_v52, %v1916_v18  ;;  %v1992_v52 = vsel %vm407_vm3, %v6377_v59, %v8433_v56 }
 0x35c   :  { %v2658_v25 = vsel %vm2636_vm13, %v2491_v17, %v8642_v61  ;;  %v2529_v6 = vpop.permute.xlu1 %2528  ;;  %v6391_v17 = vunpack.i.l.bf16 %v8402_v9 }
 0x35d   :  { %2478 = vrot.lane.b32.xlu0 %v2253_v1, %s6745_s5  ;;  %2908 = vmatprep.subr.bf16.mxu1 %v2658_v25  ;;  %v2675_v14 = vsel %vm2636_vm13, %v8579_v46, %v2529_v6  ;;  %v2065_v46 = vsel %vm483_vm6, %v6341_v2, %v6381_v27  ;;  %v6392_v2 = vunpack.i.h.bf16 %v8402_v9 }
 0x35e   :  { %2872 = vmatpush1.bf16.msra.mxu0 %v2807_v29  ;;  %2909 = vmatpush1.bf16.msra.mxu1 %v2657_v7  ;;  %v2309_v57 = vpack.c.bf16 %v2140_v4, %v2065_v46  ;;  %v2141_v7 = vsel %vm559_vm5, %v6386_v55, %v6387_v38  ;;  %v2215_v1 = vsel %vm635_vm7, %v6352_v22, %v6391_v17 }
 0x35f   :  { %v8674_v30 = vpop.permute.xlu0 %2530  ;;  %2514 = vrot.lane.b32.xlu1 %v2271_v24, %s6745_s5  ;;  %v2216_v29 = vsel %vm635_vm7, %v6391_v17, %v6392_v2  ;;  %v2328_v22 = vpack.c.bf16 %v2215_v1, %v2215_v1 }
 0x360   :  { %v2676_v26 = vsel %vm2636_vm13, %v2529_v6, %v8674_v30  ;;  %v2567_v11 = vpop.permute.xlu1 %2566  ;;  %v2329_v15 = vpack.c.bf16 %v2216_v29, %v2216_v29 }
 0x361   :  { %2516 = vrot.lane.b32.xlu0 %v2272_v37, %s6745_s5  ;;  %5204 = vmatmul.mubr.msk.bf16.vlgmr.msra.gmra.mrb[16].mxu0 %vm775_vm9, %v8660_v40  ;;  %v2693_v19 = vsel %vm2636_vm13, %v8564_v43, %v2567_v11  ;;  %v2310_v43 = vpack.c.bf16 %v2141_v7, %v2066_v12 }
 0x362   :  { %2910 = vmatprep.subr.bf16.mxu1 %v2676_v26  ;;  %2981 = vmatprep.mubr.bf16.mxu0 %v9566_v31 }
 0x363   :  { %2911 = vmatpush1.bf16.msra.mxu1 %v2675_v14  ;;  %v8700_v34 = vpop.permute.xlu0 %2568  ;;  %2552 = vrot.lane.b32.xlu1 %v2290_v41, %s6745_s5 }
 0x364   :  { %v2694_v3 = vsel %vm2636_vm13, %v2567_v11, %v8700_v34  ;;  %v8712_v13 = vpop.permute.xlu1 %2606 }
 0x365   :  { %2554 = vrot.lane.b32.xlu0 %v2291_v5, %s6745_s5  ;;  %2912 = vmatprep.subr.bf16.mxu1 %v2694_v3 }
 0x367   :  { %2913 = vmatpush1.bf16.msra.mxu1 %v2693_v19  ;;  %v2605_v62 = vpop.permute.xlu0 %2604  ;;  %2590 = vrot.lane.b32.xlu1 %v2309_v57, %s6745_s5 }
 0x368   :  { %v2711_v20 = vsel %vm2636_vm13, %v8590_v54, %v2605_v62  ;;  %v2712_v25 = vsel %vm2636_vm13, %v2605_v62, %v8712_v13  ;;  %v2457_v42 = vpop.permute.xlu1 %2456  ;;  %v1692_v54 = vsel %vm103_vm0, %v6357_v60, %v8378_v36  ;;  %v2255_v60 = vpack.c.bf16 %v8378_v36, %v9567_v23 }
 0x369   :  { %v2813_v6 = vsel %vm779_vm8, %v2711_v20, 0  ;;  %2592 = vrot.lane.b32.xlu0 %v2310_v43, %s6745_s5  ;;  %5205 = vmatprep.subr.msk.bf16.mxu1 %vm779_vm8, %v2712_v25  ;;  %v2254_v10 = vpack.c.bf16 %v1692_v54, %v7917_v45  ;;  %v1842_v45 = vsel %vm255_vm1, %v6367_v21, %v8392_v16  ;;  %v2641_v28 = vsel %vm2636_vm13, %v8612_v32, %v2457_v42 }
 0x36a   :  { %v2273_v37 = vpack.c.bf16 %v1842_v45, %v1767_v50  ;;  %v1917_v32 = vsel %vm331_vm4, %v6372_v51, %v8409_v35  ;;  %v2142_v16 = vsel %vm559_vm5, %v6387_v38, %v8450_v39  ;;  %v2217_v35 = vsel %vm635_vm7, %v6392_v2, %v8439_v47 }
 0x36b   :  { %2915 = vmatpush1.bf16.msra.mxu1 %v2813_v6  ;;  %v2609_v24 = vpop.permute.xlu0 %2608  ;;  %2628 = vrot.lane.b32.xlu1 %v2328_v22, %s6745_s5  ;;  %v2292_v26 = vpack.c.bf16 %v1992_v52, %v1917_v32  ;;  %v2330_v18 = vpack.c.bf16 %v2217_v35, %v2217_v35 }
 0x36c   :  { %v2495_v27 = vpop.permute.xlu1 %2494  ;;  %v2713_v9 = vsel %vm2636_vm13, %v8712_v13, %v2609_v24 }
 0x36d   :  { %2630 = vrot.lane.b32.xlu0 %v2329_v15, %s6745_s5  ;;  %v2659_v63 = vsel %vm2636_vm13, %v8642_v61, %v2495_v27  ;;  %v2067_v61 = vsel %vm483_vm6, %v6382_v44, %v8424_v53  ;;  %v2331_v53 = vpack.c.bf16 %v8439_v47, %v8439_v47  ;;  %v2819_v5 = vsel %vm779_vm8, %v2713_v9, 0  ;;  %v2334_v47 = vld [vmem:[%s9540_s4] sm:$0xff] }
 0x36e   :  { %5206 = vmatmul.mubr.msk.bf16.vlgmr.msra.gmra.mrb[24].mxu1 %vm775_vm9, %v8660_v40  ;;  %v2311_v11 = vpack.c.bf16 %v2142_v16, %v2067_v61 }
 0x36f   :  { %v2459_v55 = vpop.permute.xlu0 %2458  ;;  %2480 = vrot.lane.b32.xlu1 %v2254_v10, %s6745_s5  ;;  %3024 = vmatprep.mubr.bf16.mxu1 %v9566_v31 }
 0x370   :  { %v2642_v0 = vsel %vm2636_vm13, %v2457_v42, %v2459_v55  ;;  %v2533_v36 = vpop.permute.xlu1 %2532 }
 0x371   :  { %2482 = vrot.lane.b32.xlu0 %v2255_v60, %s6745_s5  ;;  %2949 = vmatprep.subr.bf16.mxu0 %v2642_v0  ;;  %v2677_v8 = vsel %vm2636_vm13, %v8674_v30, %v2533_v36 }
 0x372   :  { %2950 = vmatpush1.bf16.msra.mxu0 %v2641_v28 }
 0x373   :  { %v2497_v21 = vpop.permute.xlu0 %2496  ;;  %2518 = vrot.lane.b32.xlu1 %v2273_v37, %s6745_s5 }
 0x374   :  { %v2660_v14 = vsel %vm2636_vm13, %v2495_v27, %v2497_v21  ;;  %v2571_v59 = vpop.permute.xlu1 %2570 }
 0x375   :  { %2520 = vrot.lane.b32.xlu0 %v2274_v49, %s6745_s5  ;;  %2951 = vmatprep.subr.bf16.mxu0 %v2660_v14  ;;  %v2695_v30 = vsel %vm2636_vm13, %v8700_v34, %v2571_v59  ;;  %v2335_v34 = vld [vmem:[%s9540_s4 + $0x8] sm:$0x1] }
 0x376   :  { %2952 = vmatpush1.bf16.msra.mxu0 %v2659_v63 }
 0x377   :  { %v2535_v48 = vpop.permute.xlu0 %2534  ;;  %2556 = vrot.lane.b32.xlu1 %v2292_v26, %s6745_s5 }
 0x378   :  { %v2678_v51 = vsel %vm2636_vm13, %v2533_v36, %v2535_v48  ;;  %v2611_v41 = vpop.permute.xlu1 %2610 }
 0x379   :  { %2558 = vrot.lane.b32.xlu0 %v2293_v58, %s6745_s5  ;;  %2953 = vmatprep.subr.bf16.mxu0 %v2678_v51  ;;  %v2714_v46 = vsel %vm2636_vm13, %v2609_v24, %v2611_v41 }
 0x37a   :  { %2954 = vmatpush1.bf16.msra.mxu0 %v2677_v8 }
 0x37b   :  { %v2573_v56 = vpop.permute.xlu0 %2572  ;;  %2594 = vrot.lane.b32.xlu1 %v2311_v11, %s6745_s5 }
 0x37c   :  { %v2696_v44 = vsel %vm2636_vm13, %v2571_v59, %v2573_v56  ;;  %v2463_v38 = vpop.permute.xlu1 %2462 }
 0x37d   :  { %2596 = vrot.lane.b32.xlu0 %v2312_v33, %s6745_s5  ;;  %2955 = vmatprep.subr.bf16.mxu0 %v2696_v44 }
 0x37e   :  { %2956 = vmatpush1.bf16.msra.mxu0 %v2695_v30 }
 0x37f   :  { %5207 = vmatprep.subr.msk.bf16.mxu0 %vm779_vm8, %v2714_v46  ;;  %v2461_v39 = vpop.permute.xlu0 %2460  ;;  %2632 = vrot.lane.b32.xlu1 %v2330_v18, %s6745_s5 }
 0x380   :  { %v2643_v17 = vsel %vm2636_vm13, %v2459_v55, %v2461_v39  ;;  %v2644_v4 = vsel %vm2636_vm13, %v2461_v39, %v2463_v38  ;;  %v2499_v12 = vpop.permute.xlu1 %2498 }
 0x381   :  { %2634 = vrot.lane.b32.xlu0 %v2331_v53, %s6745_s5  ;;  %2992 = vmatprep.subr.bf16.mxu1 %v2644_v4  ;;  %v2661_v19 = vsel %vm2636_vm13, %v2497_v21, %v2499_v12 }
 0x382   :  { %2958 = vmatpush1.bf16.msra.mxu0 %v2819_v5  ;;  %2993 = vmatpush1.bf16.msra.mxu1 %v2643_v17 }
 0x383   :  { %v2501_v2 = vpop.permute.xlu0 %2500  ;;  %2343 = vperm.xlu1 %6393, %v2335_v34  }
 0x384   :  { %v2662_v3 = vsel %vm2636_vm13, %v2499_v12, %v2501_v2  ;;  %v2539_v13 = vpop.permute.xlu1 %2538 }
 0x385   :  { %2338 = vperm.xlu0 %5987, %v2334_v47   ;;  %5208 = vmatmul.mubr.msk.bf16.vlgmr.msra.gmra.mrb[20].mxu0 %vm775_vm9, %v8660_v40 }
 0x386   :  { %2994 = vmatprep.subr.bf16.mxu1 %v2662_v3  ;;  %3067 = vmatprep.mubr.bf16.mxu0 %v9566_v31 }
 0x387   :  { %2995 = vmatpush1.bf16.msra.mxu1 %v2661_v19  ;;  %v2537_v57 = vpop.permute.xlu0 %2536 }
 0x388   :  { %v2679_v7 = vsel %vm2636_vm13, %v2535_v48, %v2537_v57  ;;  %v2680_v1 = vsel %vm2636_vm13, %v2537_v57, %v2539_v13  ;;  %v2577_v62 = vpop.permute.xlu1 %2576 }
 0x389   :  { %2996 = vmatprep.subr.bf16.mxu1 %v2680_v1 }
 0x38b   :  { %2997 = vmatpush1.bf16.msra.mxu1 %v2679_v7  ;;  %v2575_v43 = vpop.permute.xlu0 %2574 }
 0x38c   :  { %v2697_v20 = vsel %vm2636_vm13, %v2573_v56, %v2575_v43  ;;  %v2698_v25 = vsel %vm2636_vm13, %v2575_v43, %v2577_v62  ;;  %v2613_v29 = vpop.permute.xlu1 %2612 }
 0x38d   :  { %2998 = vmatprep.subr.bf16.mxu1 %v2698_v25  ;;  %v2715_v6 = vsel %vm2636_vm13, %v2611_v41, %v2613_v29 }
 0x38e   :  { %v2825_v22 = vsel %vm779_vm8, %v2715_v6, 0 }
 0x38f   :  { %2999 = vmatpush1.bf16.msra.mxu1 %v2697_v20  ;;  %v2615_v42 = vpop.permute.xlu0 %2614 }
 0x390   :  { %v2716_v54 = vsel %vm2636_vm13, %v2613_v29, %v2615_v42  ;;  %v2503_v24 = vpop.permute.xlu1 %2502 }
 0x391   :  { %5209 = vmatprep.subr.msk.bf16.mxu1 %vm779_vm8, %v2716_v54  ;;  %v2663_v28 = vsel %vm2636_vm13, %v2501_v2, %v2503_v24 }
 0x393   :  { %3001 = vmatpush1.bf16.msra.mxu1 %v2825_v22  ;;  %v2465_v15 = vpop.permute.xlu0 %2464 }
 0x394   :  { %v2617_v10 = vpop.permute.xlu1 %2616  ;;  %v2645_v60 = vsel %vm2636_vm13, %v2463_v38, %v2465_v15 }
 0x395   :  { %v2717_v48 = vsel %vm2636_vm13, %v2615_v42, %v2617_v10 }
 0x396   :  { %5210 = vmatmul.mubr.msk.bf16.vlgmr.msra.gmra.mrb[28].mxu1 %vm775_vm9, %v8660_v40  ;;  %v2831_v41 = vsel %vm779_vm8, %v2717_v48, 0 }
 0x397   :  { %v2541_v27 = vpop.permute.xlu0 %2540  ;;  %3110 = vmatprep.mubr.bf16.mxu1 %v9566_v31 }
 0x398   :  { %v2467_v50 = vpop.permute.xlu1 %2466  ;;  %v2681_v21 = vsel %vm2636_vm13, %v2539_v13, %v2541_v27 }
 0x399   :  { %v2646_v23 = vsel %vm2636_vm13, %v2465_v15, %v2467_v50 }
 0x39a   :  { %3035 = vmatprep.subr.bf16.mxu0 %v2646_v23 }
 0x39b   :  { %v2579_v55 = vpop.permute.xlu0 %2578  ;;  %3036 = vmatpush1.bf16.msra.mxu0 %v2645_v60 }
 0x39c   :  { %v2543_v45 = vpop.permute.xlu1 %2542  ;;  %v2699_v16 = vsel %vm2636_vm13, %v2577_v62, %v2579_v55 }
 0x39d   :  { %v2682_v52 = vsel %vm2636_vm13, %v2541_v27, %v2543_v45 }
 0x39f   :  { %v2505_v0 = vpop.permute.xlu0 %2504 }
 0x3a0   :  { %v2664_v37 = vsel %vm2636_vm13, %v2503_v24, %v2505_v0  ;;  %v2581_v36 = vpop.permute.xlu1 %2580 }
 0x3a1   :  { %3037 = vmatprep.subr.bf16.mxu0 %v2664_v37  ;;  %v2700_v14 = vsel %vm2636_vm13, %v2579_v55, %v2581_v36 }
 0x3a2   :  { %3038 = vmatpush1.bf16.msra.mxu0 %v2663_v28 }
 0x3a3   :  { %3039 = vmatprep.subr.bf16.mxu0 %v2682_v52  ;;  %v2619_v49 = vpop.permute.xlu0 %2618 }
 0x3a4   :  { %v2469_v32 = vpop.permute.xlu1 %2468  ;;  %v2718_v61 = vsel %vm2636_vm13, %v2617_v10, %v2619_v49 }
 0x3a5   :  { %v2647_v26 = vsel %vm2636_vm13, %v2467_v50, %v2469_v32 }
 0x3a6   :  { %3040 = vmatpush1.bf16.msra.mxu0 %v2681_v21 }
 0x3a7   :  { %3041 = vmatprep.subr.bf16.mxu0 %v2700_v14  ;;  %v2471_v63 = vpop.permute.xlu0 %2470 }
 0x3a8   :  { %v2648_v59 = vsel %vm2636_vm13, %v2469_v32, %v2471_v63  ;;  %v2507_v58 = vpop.permute.xlu1 %2506 }
 0x3a9   :  { %3078 = vmatprep.subr.bf16.mxu1 %v2648_v59  ;;  %v2665_v51 = vsel %vm2636_vm13, %v2505_v0, %v2507_v58 }
 0x3aa   :  { %3042 = vmatpush1.bf16.msra.mxu0 %v2699_v16  ;;  %3079 = vmatpush1.bf16.msra.mxu1 %v2647_v26 }
 0x3ab   :  { %5211 = vmatprep.subr.msk.bf16.mxu0 %vm779_vm8, %v2718_v61  ;;  %v2509_v11 = vpop.permute.xlu0 %2508  ;;  %v9568_v61 = vmov 0.0  }
 0x3ac   :  { %v2666_v8 = vsel %vm2636_vm13, %v2507_v58, %v2509_v11  ;;  %v2545_v35 = vpop.permute.xlu1 %2544 }
 0x3ad   :  { %3080 = vmatprep.subr.bf16.mxu1 %v2666_v8  ;;  %v2683_v33 = vsel %vm2636_vm13, %v2543_v45, %v2545_v35 }
 0x3ae   :  { %3044 = vmatpush1.bf16.msra.mxu0 %v2831_v41  ;;  %3081 = vmatpush1.bf16.msra.mxu1 %v2665_v51 }
 0x3af   :  { %v2547_v56 = vpop.permute.xlu0 %2546 }
 0x3b0   :  { %v2684_v44 = vsel %vm2636_vm13, %v2545_v35, %v2547_v56  ;;  %v2583_v18 = vpop.permute.xlu1 %2582 }
 0x3b1   :  { %5212 = vmatmul.mubr.msk.bf16.vlgmr.msra.gmra.mrb[24].mxu0 %vm775_vm9, %v8660_v40  ;;  %3082 = vmatprep.subr.bf16.mxu1 %v2684_v44  ;;  %v2701_v30 = vsel %vm2636_vm13, %v2581_v36, %v2583_v18 }
 0x3b2   :  { %3083 = vmatpush1.bf16.msra.mxu1 %v2683_v33  ;;  %3153 = vmatprep.mubr.bf16.mxu0 %v9566_v31 }
 0x3b3   :  { %v2585_v38 = vpop.permute.xlu0 %2584 }
 0x3b4   :  { %v2702_v9 = vsel %vm2636_vm13, %v2583_v18, %v2585_v38  ;;  %v2623_v46 = vpop.permute.xlu1 %2622 }
 0x3b5   :  { %3084 = vmatprep.subr.bf16.mxu1 %v2702_v9 }
 0x3b6   :  { %3085 = vmatpush1.bf16.msra.mxu1 %v2701_v30 }
 0x3b7   :  { %v2621_v53 = vpop.permute.xlu0 %2620 }
 0x3b8   :  { %v2719_v39 = vsel %vm2636_vm13, %v2619_v49, %v2621_v53  ;;  %v2720_v17 = vsel %vm2636_vm13, %v2621_v53, %v2623_v46  ;;  %v2473_v34 = vpop.permute.xlu1 %2472 }
 0x3b9   :  { %v2837_v4 = vsel %vm779_vm8, %v2719_v39, 0  ;;  %5213 = vmatprep.subr.msk.bf16.mxu1 %vm779_vm8, %v2720_v17  ;;  %v2649_v19 = vsel %vm2636_vm13, %v2471_v63, %v2473_v34  ;;  %v6395_v17 = vld [vmem:[%s9541_s6 + $0x40] sm:$0xff]  }
 0x3ba   :  { %3087 = vmatpush1.bf16.msra.mxu1 %v2837_v4 }
 0x3bb   :  { %v2625_v5 = vpop.permute.xlu0 %2624 }
 0x3bc   :  { %v2511_v12 = vpop.permute.xlu1 %2510  ;;  %v2721_v54 = vsel %vm2636_vm13, %v2623_v46, %v2625_v5 }
 0x3bd   :  { %5214 = vmatmul.mubr.msk.bf16.vlgmr.msra.gmra.mrb[32].mxu1 %vm775_vm9, %v8660_v40  ;;  %v2667_v7 = vsel %vm2636_vm13, %v2509_v11, %v2511_v12  ;;  %v2843_v50 = vsel %vm779_vm8, %v2721_v54, 0  ;;  %v6407_v54 = vld [vmem:[%s9541_s6 + $0x20] sm:$0xff]  }
 0x3be   :  { %3196 = vmatprep.mubr.bf16.mxu1 %v9566_v31 }
 0x3bf   :  { %v2475_v47 = vpop.permute.xlu0 %2474 }
 0x3c0   :  { %v2650_v2 = vsel %vm2636_vm13, %v2473_v34, %v2475_v47  ;;  %v2549_v3 = vpop.permute.xlu1 %2548 }
 0x3c1   :  { %3121 = vmatprep.subr.bf16.mxu0 %v2650_v2  ;;  %v2685_v20 = vsel %vm2636_vm13, %v2547_v56, %v2549_v3  ;;  %v6396_v2 = vld [vmem:[%s9541_s6] sm:$0xff]  }
 0x3c2   :  { %3122 = vmatpush1.bf16.msra.mxu0 %v2649_v19  ;;  %v6397_v19 = vld [vmem:[%s9541_s6 + $0x48] sm:$0xff]  }
 0x3c3   :  { %v2513_v13 = vpop.permute.xlu0 %2512 }
 0x3c4   :  { %v2668_v57 = vsel %vm2636_vm13, %v2511_v12, %v2513_v13  ;;  %v2587_v1 = vpop.permute.xlu1 %2586 }
 0x3c5   :  { %3123 = vmatprep.subr.bf16.mxu0 %v2668_v57  ;;  %v2703_v42 = vsel %vm2636_vm13, %v2585_v38, %v2587_v1  ;;  %v6398_v57 = vld [vmem:[%s9541_s6 + $0x8] sm:$0xff]  }
 0x3c6   :  { %3124 = vmatpush1.bf16.msra.mxu0 %v2667_v7  ;;  %v6399_v7 = vld [vmem:[%s9541_s6 + $0x50] sm:$0xff]  }
 0x3c7   :  { %v2551_v62 = vpop.permute.xlu0 %2550 }
 0x3c8   :  { %v2686_v43 = vsel %vm2636_vm13, %v2549_v3, %v2551_v62  ;;  %v2627_v25 = vpop.permute.xlu1 %2626  ;;  %v6404_v3 = vld [vmem:[%s9541_s6 + $0x80] sm:$0xff]  }
 0x3c9   :  { %3125 = vmatprep.subr.bf16.mxu0 %v2686_v43  ;;  %v2722_v24 = vsel %vm2636_vm13, %v2625_v5, %v2627_v25  ;;  %v6402_v5 = vld [vmem:[%s9541_s6 + $0xc0] sm:$0xff]   ;;  %v6401_v43 = vld [vmem:[%s9541_s6 + $0x58] sm:$0xff]  }
 0x3ca   :  { %3126 = vmatpush1.bf16.msra.mxu0 %v2685_v20  ;;  %v6412_v20 = vld [vmem:[%s9541_s6 + $0x90] sm:$0xff]  }
 0x3cb   :  { %v2589_v29 = vpop.permute.xlu0 %2588 }
 0x3cc   :  { %v2704_v6 = vsel %vm2636_vm13, %v2587_v1, %v2589_v29  ;;  %v6408_v1 = vld [vmem:[%s9541_s6 + $0x88] sm:$0xff]  }
 0x3cd   :  { %3127 = vmatprep.subr.bf16.mxu0 %v2704_v6  ;;  %v2477_v22 = vpop.permute.xlu1 %2476  ;;  %v6405_v6 = vld [vmem:[%s9541_s6 + $0x60] sm:$0xff]  }
 0x3ce   :  { %3128 = vmatpush1.bf16.msra.mxu0 %v2703_v42  ;;  %v2651_v15 = vsel %vm2636_vm13, %v2475_v47, %v2477_v22  ;;  %v6416_v42 = vld [vmem:[%s9541_s6 + $0x98] sm:$0xff]  }
 0x3cf   :  { %5215 = vmatprep.subr.msk.bf16.mxu0 %vm779_vm8, %v2722_v24  ;;  %v2479_v10 = vpop.permute.xlu0 %2478  ;;  %v6409_v24 = vld [vmem:[%s9541_s6 + $0x68] sm:$0xff]  }
 0x3d0   :  { %v2652_v27 = vsel %vm2636_vm13, %v2477_v22, %v2479_v10  ;;  %v6418_v22 = vld [vmem:[%s9541_s6 + $0xe0] sm:$0xff]  }
 0x3d1   :  { %3164 = vmatprep.subr.bf16.mxu1 %v2652_v27  ;;  %v2515_v23 = vpop.permute.xlu1 %2514  ;;  %v6411_v27 = vld [vmem:[%s9541_s6 + $0x28] sm:$0xff]  }
 0x3d2   :  { %3130 = vmatpush1.bf16.msra.mxu0 %v2843_v50  ;;  %3165 = vmatpush1.bf16.msra.mxu1 %v2651_v15  ;;  %v2669_v60 = vsel %vm2636_vm13, %v2513_v13, %v2515_v23  ;;  %v6406_v13 = vld [vmem:[%s9541_s6 + $0xc8] sm:$0xff]   ;;  %v6420_v15 = vld [vmem:[%s9541_s6 + $0xa0] sm:$0xff]   ;;  %v6413_v50 = vld [vmem:[%s9541_s6 + $0x70] sm:$0xff]  }
 0x3d3   :  { %v2517_v55 = vpop.permute.xlu0 %2516 }
 0x3d4   :  { %v2670_v45 = vsel %vm2636_vm13, %v2515_v23, %v2517_v55  ;;  %v6422_v23 = vld [vmem:[%s9541_s6 + $0xa8] sm:$0xff]  }
 0x3d5   :  { %5216 = vmatmul.mubr.msk.bf16.vlgmr.msra.gmra.mrb[28].mxu0 %vm775_vm9, %v8660_v40  ;;  %3166 = vmatprep.subr.bf16.mxu1 %v2670_v45  ;;  %v2553_v0 = vpop.permute.xlu1 %2552  ;;  %v6417_v45 = vld [vmem:[%s9541_s6 + $0x78] sm:$0xff]  }
 0x3d6   :  { %3167 = vmatpush1.bf16.msra.mxu1 %v2669_v60  ;;  %3239 = vmatprep.mubr.bf16.mxu0 %v9566_v31  ;;  %v2687_v37 = vsel %vm2636_vm13, %v2551_v62, %v2553_v0  ;;  %v6410_v62 = vld [vmem:[%s9541_s6 + $0xd0] sm:$0xff]  }
 0x3d7   :  { %v2555_v28 = vpop.permute.xlu0 %2554  ;;  %v6423_v60 = vld [vmem:[%s9541_s6 + $0xf0] sm:$0xff]  }
 0x3d8   :  { %v2688_v36 = vsel %vm2636_vm13, %v2553_v0, %v2555_v28  ;;  %v6425_v0 = vld [vmem:[%s9541_s6 + $0xb0] sm:$0xff]  }
 0x3d9   :  { %3168 = vmatprep.subr.bf16.mxu1 %v2688_v36  ;;  %v2591_v52 = vpop.permute.xlu1 %2590  ;;  %v6424_v36 = vld [vmem:[%s9541_s6 + $0x140] sm:$0xff]  }
 0x3da   :  { %3169 = vmatpush1.bf16.msra.mxu1 %v2687_v37  ;;  %v2705_v49 = vsel %vm2636_vm13, %v2589_v29, %v2591_v52  ;;  %v6403_v29 = vld [vmem:[%s9541_s6 + $0x18] sm:$0xff]  }
 0x3db   :  { %v2593_v21 = vpop.permute.xlu0 %2592  ;;  %v6427_v37 = vld [vmem:[%s9541_s6 + $0xf8] sm:$0xff]  }
 0x3dc   :  { %v2706_v32 = vsel %vm2636_vm13, %v2591_v52, %v2593_v21  ;;  %v6429_v52 = vld [vmem:[%s9541_s6 + $0xb8] sm:$0xff]  }
 0x3dd   :  { %3170 = vmatprep.subr.bf16.mxu1 %v2706_v32  ;;  %v2629_v14 = vpop.permute.xlu1 %2628 }
 0x3de   :  { %3171 = vmatpush1.bf16.msra.mxu1 %v2705_v49  ;;  %v2723_v26 = vsel %vm2636_vm13, %v2627_v25, %v2629_v14  ;;  %v6414_v25 = vld [vmem:[%s9541_s6 + $0xd8] sm:$0xff]   ;;  %v6436_v49 = vld [vmem:[%s9541_s6 + $0x1c0] sm:$0xff]  }
 0x3df   :  { %v2849_v31 = vsel %vm779_vm8, %v2723_v26, 0  ;;  %v2631_v63 = vpop.permute.xlu0 %2630 }
 0x3e0   :  { %v2724_v59 = vsel %vm2636_vm13, %v2629_v14, %v2631_v63 }
 0x3e1   :  { %5217 = vmatprep.subr.msk.bf16.mxu1 %vm779_vm8, %v2724_v59  ;;  %v2481_v16 = vpop.permute.xlu1 %2480 }
 0x3e2   :  { %3173 = vmatpush1.bf16.msra.mxu1 %v2849_v31  ;;  %v2653_v58 = vsel %vm2636_vm13, %v2479_v10, %v2481_v16  ;;  %v6421_v10 = vld [vmem:[%s9541_s6 + $0xe8] sm:$0xff]  }
 0x3e3   :  { %v2483_v48 = vpop.permute.xlu0 %2482  ;;  %5594 = vmatprep.subr.bf16.mxu1 %v9568_v61 }
 0x3e4   :  { %v2654_v51 = vsel %vm2636_vm13, %v2481_v16, %v2483_v48 }
 0x3e5   :  { %5218 = vmatmul.mubr.msk.bf16.vlgmr.msra.gmra.mrb[36].mxu1 %vm775_vm9, %v8660_v40  ;;  %3207 = vmatprep.subr.bf16.mxu0 %v2654_v51  ;;  %v2519_v11 = vpop.permute.xlu1 %2518 }
 0x3e6   :  { %3208 = vmatpush1.bf16.msra.mxu0 %v2653_v58  ;;  %5595 = vmatpush3.bf16.msra.mxu1 %v2483_v48  ;;  %v2671_v8 = vsel %vm2636_vm13, %v2517_v55, %v2519_v11  ;;  %v6415_v55 = vld [vmem:[%s9541_s6 + $0x30] sm:$0xff]  }
 0x3e7   :  { %v2521_v41 = vpop.permute.xlu0 %2520  ;;  %5596 = vmatprep.subr.bf16.mxu1 %v9568_v61  ;;  %5604 = vmatprep.mubr.msk.bf16.mxu1 %vm6743_vm10, %v9568_v61 }
 0x3e8   :  { %v2672_v35 = vsel %vm2636_vm13, %v2519_v11, %v2521_v41 }
 0x3e9   :  { %3209 = vmatprep.subr.bf16.mxu0 %v2672_v35  ;;  %v2557_v33 = vpop.permute.xlu1 %2556 }
 0x3ea   :  { %3210 = vmatpush1.bf16.msra.mxu0 %v2671_v8  ;;  %5597 = vmatpush3.bf16.msra.mxu1 %v2521_v41  ;;  %v2689_v56 = vsel %vm2636_vm13, %v2555_v28, %v2557_v33  ;;  %v6419_v28 = vld [vmem:[%s9541_s6 + $0x38] sm:$0xff]  }
 0x3eb   :  { %v2559_v44 = vpop.permute.xlu0 %2558  ;;  %5598 = vmatprep.subr.bf16.mxu1 %v9568_v61 }
 0x3ec   :  { %v2690_v18 = vsel %vm2636_vm13, %v2557_v33, %v2559_v44 }
 0x3ed   :  { %3211 = vmatprep.subr.bf16.mxu0 %v2690_v18  ;;  %v2595_v30 = vpop.permute.xlu1 %2594 }
 0x3ee   :  { %3212 = vmatpush1.bf16.msra.mxu0 %v2689_v56  ;;  %5599 = vmatpush3.bf16.msra.mxu1 %v2559_v44  ;;  %v2707_v38 = vsel %vm2636_vm13, %v2593_v21, %v2595_v30 }
 0x3ef   :  { %v2597_v9 = vpop.permute.xlu0 %2596  ;;  %5600 = vmatprep.subr.bf16.mxu1 %v9568_v61 }
 0x3f0   :  { %v2708_v46 = vsel %vm2636_vm13, %v2595_v30, %v2597_v9 }
 0x3f1   :  { %3213 = vmatprep.subr.bf16.mxu0 %v2708_v46  ;;  %v2633_v53 = vpop.permute.xlu1 %2632 }
 0x3f2   :  { %3214 = vmatpush1.bf16.msra.mxu0 %v2707_v38  ;;  %5601 = vmatpush3.bf16.msra.mxu1 %v2597_v9  ;;  %v2725_v39 = vsel %vm2636_vm13, %v2631_v63, %v2633_v53 }
 0x3f3   :  { %v2855_v4 = vsel %vm779_vm8, %v2725_v39, 0  ;;  %v2635_v34 = vpop.permute.xlu0 %2634  ;;  %5602 = vmatprep.subr.bf16.mxu1 %v9568_v61 }
 0x3f4   :  { %v2726_v12 = vsel %vm2636_vm13, %v2633_v53, %v2635_v34  ;;  %v2861_v47 = vsel %vm779_vm8, %v2635_v34, 0 }
 0x3f5   :  { %5219 = vmatprep.subr.msk.bf16.mxu0 %vm779_vm8, %v2726_v12 }
 0x3f6   :  { %3216 = vmatpush1.bf16.msra.mxu0 %v2855_v4  ;;  %5603 = vmatpush3.bf16.msra.mxu1 %v2861_v47 }
 0x3f7   :  { %5380 = vmatprep.subr.bf16.mxu0 %v6395_v17  ;;  %5402 = vmatprep.subr.bf16.mxu1 %v6402_v5 }
 0x3f9   :  { %5220 = vmatmul.mubr.msk.bf16.vlgmr.msra.gmra.mrb[32].mxu0 %vm775_vm9, %v8660_v40  ;;  %5605 = vmatmul.mubr.msk.bf16.vlgmr.msra.gmra.mrb[40].mxu1 %vm775_vm9, %v8660_v40  ;;  %v6400_v40 = vld [vmem:[%s9541_s6 + $0x10] sm:$0xff]  }
 0x3fa   :  { %5381 = vmatpush3.bf16.msra.mxu0 %v6396_v2  ;;  %5403 = vmatpush3.bf16.msra.mxu1 %v6404_v3 }
 0x3fb   :  { %5382 = vmatprep.subr.bf16.mxu0 %v6397_v19  ;;  %5404 = vmatprep.subr.bf16.mxu1 %v6406_v13 }
 0x3fe   :  { %5383 = vmatpush3.bf16.msra.mxu0 %v6398_v57  ;;  %5405 = vmatpush3.bf16.msra.mxu1 %v6408_v1 }
 0x3ff   :  { %5384 = vmatprep.subr.bf16.mxu0 %v6399_v7  ;;  %5406 = vmatprep.subr.bf16.mxu1 %v6410_v62 }
 0x402   :  { %5385 = vmatpush3.bf16.msra.mxu0 %v6400_v40  ;;  %5407 = vmatpush3.bf16.msra.mxu1 %v6412_v20  ;;  %v9017_v32 = vpop.permute.xlu1 %2343 }
 0x403   :  { %5386 = vmatprep.subr.bf16.mxu0 %v6401_v43  ;;  %5408 = vmatprep.subr.bf16.mxu1 %v6414_v25 }
 0x406   :  { %5387 = vmatpush3.bf16.msra.mxu0 %v6403_v29  ;;  %5409 = vmatpush3.bf16.msra.mxu1 %v6416_v42 }
 0x407   :  { %5388 = vmatprep.subr.bf16.mxu0 %v6405_v6  ;;  %5410 = vmatprep.subr.bf16.mxu1 %v6418_v22 }
 0x40a   :  { %5389 = vmatpush3.bf16.msra.mxu0 %v6407_v54  ;;  %5411 = vmatpush3.bf16.msra.mxu1 %v6420_v15 }
 0x40b   :  { %5390 = vmatprep.subr.bf16.mxu0 %v6409_v24  ;;  %5412 = vmatprep.subr.bf16.mxu1 %v6421_v10 }
 0x40e   :  { %5391 = vmatpush3.bf16.msra.mxu0 %v6411_v27  ;;  %5413 = vmatpush3.bf16.msra.mxu1 %v6422_v23 }
 0x40f   :  { %5392 = vmatprep.subr.bf16.mxu0 %v6413_v50  ;;  %5414 = vmatprep.subr.bf16.mxu1 %v6423_v60 }
 0x412   :  { %5393 = vmatpush3.bf16.msra.mxu0 %v6415_v55  ;;  %5415 = vmatpush3.bf16.msra.mxu1 %v6425_v0 }
 0x413   :  { %5394 = vmatprep.subr.bf16.mxu0 %v6417_v45  ;;  %5416 = vmatprep.subr.bf16.mxu1 %v6427_v37 }
 0x416   :  { %5395 = vmatpush3.bf16.msra.mxu0 %v6419_v28  ;;  %5417 = vmatpush3.bf16.msra.mxu1 %v6429_v52 }
 0x417   :  { %5424 = vmatprep.subr.bf16.mxu0 %v6424_v36  ;;  %5446 = vmatprep.subr.bf16.mxu1 %v6436_v49  ;;  %v9041_v36 = vpop.permute.xlu0 %2338 }
 0x434   :  { %v9015_v21 = vpop.f32.mrb[16].mxu0 }
 0x435   :  { %v9019_v14 = vpop.f32.mrb[17].mxu0 }
 0x436   :  { %v2901_v26 = vpop.f32.mrb[18].mxu0 }
 0x437   :  { %v2902_v31 = vadd.f32 %v2901_v26, %v9017_v32  ;;  %v2903_v63 = vpop.f32.mrb[19].mxu0 }
 0x438   :  { %v2904_v59 = vadd.f32 %v2903_v63, %v9017_v32 }
 0x439   :  { %v3310_v16 = vand.u32 2147483647, %v2902_v31  ;;  %v3291_v47 = vmax.f32 %v2902_v31, 0.0  ;;  %v2898_v31 = vadd.f32 %v9015_v21, %v9041_v36 }
 0x43a   :  { %v3311_v58 = vand.u32 2147483647, %v2904_v59  ;;  %v3292_v13 = vmax.f32 %v2904_v59, 0.0  ;;  %v9569_v59 = vld [vmem:[#allocation2_spill] sm:$0xff] }
 0x43b   :  { %v3329_v48 = vsub.f32 0.0, %v3310_v16 }
 0x43c   :  { %v3330_v51 = vsub.f32 0.0, %v3311_v58  ;;  %v2900_v58 = vadd.f32 %v9019_v14, %v9041_v36 }
 0x43d   :  { %v3348_v11 = vmul.f32 1.442695, %v3329_v48 }
 0x43e   :  { %v3350_v8 = vmul.f32 1.442695, %v3330_v51 }
 0x43f   :  { %6616 = vpow2.f32 %v3348_v11 }
 0x440   :  { %6618 = vpow2.f32 %v3350_v8 }
 0x441   :  { %v9023_v41 = vpop.f32.mrb[24].mxu1 }
 0x442   :  { %v9025_v35 = vpop.f32.mrb[25].mxu1 }
 0x443   :  { %v2944_v33 = vpop.f32.mrb[26].mxu1 }
 0x444   :  { %v2945_v56 = vadd.f32 %v2944_v33, %v9017_v32  ;;  %v2946_v44 = vpop.f32.mrb[27].mxu1 }
 0x445   :  { %v2947_v18 = vadd.f32 %v2946_v44, %v9017_v32 }
 0x446   :  { %v3312_v30 = vand.u32 2147483647, %v2945_v56  ;;  %v3293_v0 = vmax.f32 %v2945_v56, 0.0 }
 0x447   :  { %v3313_v38 = vand.u32 2147483647, %v2947_v18  ;;  %v3294_v52 = vmax.f32 %v2947_v18, 0.0 }
 0x448   :  { %v3331_v9 = vsub.f32 0.0, %v3312_v30 }
 0x449   :  { %v6617_v46 = vpop.eup %6616  ;;  %v3332_v53 = vsub.f32 0.0, %v3313_v38 }
 0x44a   :  { %v6619_v39 = vpop.eup %6618  ;;  %v3386_v17 = vadd.f32 1.0, %v6617_v46  ;;  %v3352_v4 = vmul.f32 1.442695, %v3331_v9 }
 0x44b   :  { %v3387_v34 = vadd.f32 1.0, %v6619_v39  ;;  %v3354_v5 = vmul.f32 1.442695, %v3332_v53  ;;  %v6426_v53 = vld [vmem:[%s9541_s6 + $0x100] sm:$0xff]  }
 0x44c   :  { %6620 = vlog2.f32 %v3386_v17 }
 0x44d   :  { %6622 = vlog2.f32 %v3387_v34 }
 0x44e   :  { %6624 = vpow2.f32 %v3352_v4 }
 0x44f   :  { %6626 = vpow2.f32 %v3354_v5  ;;  %v6428_v5 = vld [vmem:[%s9541_s6 + $0x148] sm:$0xff]  }
 0x456   :  { %v6621_v12 = vpop.eup %6620 }
 0x457   :  { %v6623_v2 = vpop.eup %6622  ;;  %v3406_v19 = vmul.f32 0.6931472, %v6621_v12 }
 0x458   :  { %v6625_v3 = vpop.eup %6624  ;;  %v3408_v57 = vmul.f32 0.6931472, %v6623_v2  ;;  %v9029_v7 = vpop.f32.mrb[20].mxu0 }
 0x459   :  { %v6627_v1 = vpop.eup %6626  ;;  %v3443_v62 = vadd.f32 %v3406_v19, %v3291_v47  ;;  %v3388_v40 = vadd.f32 1.0, %v6625_v3  ;;  %v9031_v43 = vpop.f32.mrb[21].mxu0  ;;  %v6430_v3 = vld [vmem:[%s9541_s6 + $0x108] sm:$0xff]  }
 0x45a   :  { %v3444_v20 = vadd.f32 %v3408_v57, %v3292_v13  ;;  %v3389_v25 = vadd.f32 1.0, %v6627_v1  ;;  %v2987_v29 = vpop.f32.mrb[22].mxu0  ;;  %v6431_v57 = vld [vmem:[%s9541_s6 + $0x150] sm:$0xff]  }
 0x45b   :  { %v3462_v6 = vadd.f32 1.0, %v3443_v62  ;;  %6628 = vlog2.f32 %v3388_v40  ;;  %v9034_v42 = vadd.f32 %v2987_v29, %v9017_v32  ;;  %v2989_v22 = vpop.f32.mrb[23].mxu0  ;;  %v6432_v62 = vld [vmem:[%s9541_s6 + $0x110] sm:$0xff]   ;;  %v2941_v29 = vadd.f32 %v9023_v41, %v9041_v36  ;;  %v6435_v41 = vld [vmem:[%s9541_s6 + $0x160] sm:$0xff]  }
 0x45c   :  { %v3463_v54 = vadd.f32 1.0, %v3444_v20  ;;  %6630 = vlog2.f32 %v3389_v25  ;;  %v9037_v24 = vadd.f32 %v2989_v22, %v9017_v32  ;;  %v6433_v20 = vld [vmem:[%s9541_s6 + $0x158] sm:$0xff]   ;;  %v2943_v22 = vadd.f32 %v9025_v35, %v9041_v36 }
 0x45d   :  { %6632 = vrcp.f32 %v3462_v6  ;;  %v3314_v15 = vand.u32 2147483647, %v9034_v42 }
 0x45e   :  { %6634 = vrcp.f32 %v3463_v54  ;;  %v3315_v10 = vand.u32 2147483647, %v9037_v24  ;;  %v3296_v35 = vmax.f32 %v9037_v24, 0.0  ;;  %v6439_v24 = vld [vmem:[%s9541_s6 + $0x168] sm:$0xff]  }
 0x45f   :  { %v3333_v27 = vsub.f32 0.0, %v3314_v15 }
 0x460   :  { %v3334_v50 = vsub.f32 0.0, %v3315_v10  ;;  %v6434_v10 = vld [vmem:[%s9541_s6 + $0x118] sm:$0xff]  }
 0x461   :  { %v3356_v23 = vmul.f32 1.442695, %v3333_v27 }
 0x462   :  { %v3358_v60 = vmul.f32 1.442695, %v3334_v50 }
 0x463   :  { %6636 = vpow2.f32 %v3356_v23 }
 0x464   :  { %6638 = vpow2.f32 %v3358_v60  ;;  %v3295_v60 = vmax.f32 %v9034_v42, 0.0  ;;  %v6440_v42 = vld [vmem:[%s9541_s6 + $0x1c8] sm:$0xff]  }
 0x465   :  { %v6629_v55 = vpop.eup %6628 }
 0x466   :  { %v6631_v45 = vpop.eup %6630  ;;  %v3410_v37 = vmul.f32 0.6931472, %v6629_v55 }
 0x467   :  { %v6633_v28 = vpop.eup %6632  ;;  %v3412_v49 = vmul.f32 0.6931472, %v6631_v45 }
 0x468   :  { %v6635_v26 = vpop.eup %6634  ;;  %v3445_v63 = vadd.f32 %v3410_v37, %v3293_v0  ;;  %v3503_v16 = vrot.slane %v6633_v28, %v9569_v59  ;;  %v6438_v37 = vld [vmem:[%s9541_s6 + $0x180] sm:$0xff]  }
 0x469   :  { %v3446_v48 = vadd.f32 %v3412_v49, %v3294_v52  ;;  %v9048_v51 = vpop.f32.mrb[28].mxu1  ;;  %v3507_v11 = vrot.slane %v6635_v26, %v9569_v59  ;;  %v6437_v49 = vld [vmem:[%s9541_s6 + $0x120] sm:$0xff]  }
 0x46a   :  { %v3464_v8 = vadd.f32 1.0, %v3445_v63  ;;  %v9051_v33 = vpop.f32.mrb[29].mxu1  ;;  %v3576_v56 = vmul.f32 %v3503_v16, %v2898_v31 }
 0x46b   :  { %v3465_v44 = vadd.f32 1.0, %v3446_v48  ;;  %v3030_v18 = vpop.f32.mrb[30].mxu1  ;;  %v3577_v30 = vmul.f32 %v3507_v11, %v2900_v58 }
 0x46c   :  { %6640 = vrcp.f32 %v3464_v8  ;;  %v9054_v21 = vadd.f32 %v3030_v18, %v9017_v32  ;;  %v3032_v38 = vpop.f32.mrb[31].mxu1  ;;  %v3595_v34 = vpack.c.bf16 %v3576_v56, %v3576_v56  ;;  %v6442_v8 = vld [vmem:[%s9541_s6 + $0x188] sm:$0xff]   ;;  %v6443_v18 = vld [vmem:[%s9541_s6 + $0x170] sm:$0xff]  }
 0x46d   :  { %v6637_v9 = vpop.eup %6636  ;;  %6642 = vrcp.f32 %v3465_v44  ;;  %v9057_v14 = vadd.f32 %v3032_v38, %v9017_v32  ;;  %v3596_v46 = vpack.c.bf16 %v3577_v30, %v3577_v30  ;;  %v6441_v56 = vld [vmem:[%s9541_s6 + $0x128] sm:$0xff]   ;;  %v6444_v44 = vld [vmem:[%s9541_s6 + $0x1d0] sm:$0xff]  }
 0x46e   :  { %v6639_v39 = vpop.eup %6638  ;;  %v3390_v17 = vadd.f32 1.0, %v6637_v9  ;;  %v3316_v4 = vand.u32 2147483647, %v9054_v21  ;;  %v6446_v38 = vld [vmem:[%s9541_s6 + $0x190] sm:$0xff]  }
 0x46f   :  { %v3391_v12 = vadd.f32 1.0, %v6639_v39  ;;  %v3317_v47 = vand.u32 2147483647, %v9057_v14  ;;  %4809 = vmatprep.mubr.bf16.mxu0 %v3596_v46  ;;  %v6445_v46 = vld [vmem:[%s9541_s6 + $0x130] sm:$0xff]  }
 0x470   :  { %6644 = vlog2.f32 %v3390_v17  ;;  %v3335_v2 = vsub.f32 0.0, %v3316_v4  ;;  %4810 = vmatmul.mubr.bf16.vlgmr.msra.gmra.mrb[36].mxu0 %v3595_v34  ;;  %v6447_v17 = vld [vmem:[%s9541_s6 + $0x178] sm:$0xff]  }
 0x471   :  { %6646 = vlog2.f32 %v3391_v12  ;;  %v3336_v19 = vsub.f32 0.0, %v3317_v47  ;;  %5425 = vmatpush3.bf16.msra.mxu0 %v6426_v53  ;;  %v6448_v53 = vld [vmem:[%s9541_s6 + $0x1d8] sm:$0xff]  }
 0x472   :  { %v3360_v13 = vmul.f32 1.442695, %v3335_v2  ;;  %5426 = vmatprep.subr.bf16.mxu0 %v6428_v5  ;;  %v6450_v12 = vld [vmem:[%s9541_s6 + $0x198] sm:$0xff]  }
 0x473   :  { %v3362_v1 = vmul.f32 1.442695, %v3336_v19  ;;  %v6449_v2 = vld [vmem:[%s9541_s6 + $0x138] sm:$0xff]   ;;  %v6451_v19 = vld [vmem:[%s9541_s6 + $0x1e0] sm:$0xff]  }
 0x474   :  { %6648 = vpow2.f32 %v3360_v13  ;;  %v6458_v13 = vld [vmem:[%s9541_s6 + $0x240] sm:$0xff]  }
 0x475   :  { %6650 = vpow2.f32 %v3362_v1  ;;  %5427 = vmatpush3.bf16.msra.mxu0 %v6430_v3 }
 0x476   :  { %v6641_v40 = vpop.eup %6640  ;;  %5428 = vmatprep.subr.bf16.mxu0 %v6431_v57 }
 0x477   :  { %v6643_v25 = vpop.eup %6642  ;;  %v3511_v6 = vrot.slane %v6641_v40, %v9569_v59  ;;  %v2984_v40 = vadd.f32 %v9029_v7, %v9041_v36  ;;  %v6453_v7 = vld [vmem:[%s9541_s6 + $0x1e8] sm:$0xff]  }
 0x478   :  { %v3515_v54 = vrot.slane %v6643_v25, %v9569_v59 }
 0x479   :  { %v3578_v15 = vmul.f32 %v3511_v6, %v2941_v29  ;;  %5429 = vmatpush3.bf16.msra.mxu0 %v6432_v62  ;;  %v6452_v29 = vld [vmem:[%s9541_s6 + $0x1a0] sm:$0xff]  }
 0x47a   :  { %v6645_v27 = vpop.eup %6644  ;;  %v3579_v50 = vmul.f32 %v3515_v54, %v2943_v22  ;;  %5430 = vmatprep.subr.bf16.mxu0 %v6433_v20  ;;  %v2986_v22 = vadd.f32 %v9031_v43, %v9041_v36 }
 0x47b   :  { %v6647_v23 = vpop.eup %6646  ;;  %v3414_v55 = vmul.f32 0.6931472, %v6645_v27  ;;  %v3597_v52 = vpack.c.bf16 %v3578_v15, %v3578_v15  ;;  %v3297_v27 = vmax.f32 %v9054_v21, 0.0 }
 0x47c   :  { %v3416_v45 = vmul.f32 0.6931472, %v6647_v23  ;;  %v3598_v0 = vpack.c.bf16 %v3579_v50, %v3579_v50 }
 0x47d   :  { %v3447_v28 = vadd.f32 %v3414_v55, %v3295_v60  ;;  %5431 = vmatpush3.bf16.msra.mxu0 %v6434_v10  ;;  %v3298_v60 = vmax.f32 %v9057_v14, 0.0  ;;  %v6455_v14 = vld [vmem:[%s9541_s6 + $0x1f0] sm:$0xff]  }
 0x47e   :  { %v6649_v26 = vpop.eup %6648  ;;  %v3448_v31 = vadd.f32 %v3416_v45, %v3296_v35  ;;  %4849 = vmatprep.mubr.bf16.mxu1 %v3598_v0  ;;  %5432 = vmatprep.subr.bf16.mxu0 %v6435_v41  ;;  %v6454_v0 = vld [vmem:[%s9541_s6 + $0x1a8] sm:$0xff]  }
 0x47f   :  { %v6651_v63 = vpop.eup %6650  ;;  %v3466_v16 = vadd.f32 1.0, %v3447_v28  ;;  %v3392_v58 = vadd.f32 1.0, %v6649_v26  ;;  %4850 = vmatmul.mubr.bf16.vlgmr.msra.gmra.mrb[44].mxu1 %v3597_v52  ;;  %v6460_v52 = vld [vmem:[%s9541_s6 + $0x200] sm:$0xff]  }
 0x480   :  { %v3467_v48 = vadd.f32 1.0, %v3448_v31  ;;  %v3393_v11 = vadd.f32 1.0, %v6651_v63  ;;  %5447 = vmatpush3.bf16.msra.mxu1 %v6438_v37  ;;  %v6461_v31 = vld [vmem:[%s9541_s6 + $0x248] sm:$0xff]  }
 0x481   :  { %6652 = vrcp.f32 %v3466_v16  ;;  %5433 = vmatpush3.bf16.msra.mxu0 %v6437_v49  ;;  %5448 = vmatprep.subr.bf16.mxu1 %v6440_v42 }
 0x482   :  { %6654 = vrcp.f32 %v3467_v48  ;;  %5434 = vmatprep.subr.bf16.mxu0 %v6439_v24  ;;  %v6456_v48 = vld [vmem:[%s9541_s6 + $0x1b0] sm:$0xff]  }
 0x483   :  { %6656 = vlog2.f32 %v3392_v58 }
 0x484   :  { %6658 = vlog2.f32 %v3393_v11  ;;  %v9117_v30 = vpop.f32.mrb[24].mxu0  ;;  %5449 = vmatpush3.bf16.msra.mxu1 %v6442_v8  ;;  %v6457_v8 = vld [vmem:[%s9541_s6 + $0x1f8] sm:$0xff]  }
 0x485   :  { %v9122_v9 = vpop.f32.mrb[25].mxu0  ;;  %5435 = vmatpush3.bf16.msra.mxu0 %v6441_v56  ;;  %5450 = vmatprep.subr.bf16.mxu1 %v6444_v44  ;;  %v6462_v56 = vld [vmem:[%s9541_s6 + $0x208] sm:$0xff]  }
 0x486   :  { %v3073_v39 = vpop.f32.mrb[26].mxu0  ;;  %5436 = vmatprep.subr.bf16.mxu0 %v6443_v18  ;;  %v6463_v18 = vld [vmem:[%s9541_s6 + $0x250] sm:$0xff]  }
 0x487   :  { %v9134_v4 = vadd.f32 %v3073_v39, %v9017_v32  ;;  %v3075_v34 = vpop.f32.mrb[27].mxu0 }
 0x488   :  { %v9137_v5 = vadd.f32 %v3075_v34, %v9017_v32  ;;  %5451 = vmatpush3.bf16.msra.mxu1 %v6446_v38  ;;  %v6464_v34 = vld [vmem:[%s9541_s6 + $0x210] sm:$0xff]  }
 0x489   :  { %v3318_v47 = vand.u32 2147483647, %v9134_v4  ;;  %5437 = vmatpush3.bf16.msra.mxu0 %v6445_v46  ;;  %5452 = vmatprep.subr.bf16.mxu1 %v6448_v53  ;;  %v6459_v53 = vld [vmem:[%s9541_s6 + $0x1b8] sm:$0xff]  }
 0x48a   :  { %v3319_v3 = vand.u32 2147483647, %v9137_v5  ;;  %5438 = vmatprep.subr.bf16.mxu0 %v6447_v17 }
 0x48b   :  { %v6653_v57 = vpop.eup %6652  ;;  %v3337_v1 = vsub.f32 0.0, %v3318_v47 }
 0x48c   :  { %v6655_v62 = vpop.eup %6654  ;;  %v3338_v20 = vsub.f32 0.0, %v3319_v3  ;;  %5453 = vmatpush3.bf16.msra.mxu1 %v6450_v12  ;;  %v3519_v25 = vrot.slane %v6653_v57, %v9569_v59  ;;  %v6466_v12 = vld [vmem:[%s9541_s6 + $0x2c0] sm:$0xff]   ;;  %v6465_v3 = vld [vmem:[%s9541_s6 + $0x258] sm:$0xff]  }
 0x48d   :  { %v6657_v6 = vpop.eup %6656  ;;  %v3364_v54 = vmul.f32 1.442695, %v3337_v1  ;;  %5439 = vmatpush3.bf16.msra.mxu0 %v6449_v2  ;;  %v3523_v15 = vrot.slane %v6655_v62, %v9569_v59  ;;  %5454 = vmatprep.subr.bf16.mxu1 %v6451_v19  ;;  %v6467_v57 = vld [vmem:[%s9541_s6 + $0x218] sm:$0xff]   ;;  %v6469_v62 = vld [vmem:[%s9541_s6 + $0x260] sm:$0xff]  }
 0x48e   :  { %v6659_v10 = vpop.eup %6658  ;;  %v3418_v50 = vmul.f32 0.6931472, %v6657_v6  ;;  %v3366_v41 = vmul.f32 1.442695, %v3338_v20  ;;  %v3580_v23 = vmul.f32 %v3519_v25, %v2984_v40  ;;  %5468 = vmatprep.subr.bf16.mxu0 %v6458_v13  ;;  %v3027_v20 = vadd.f32 %v9048_v51, %v9041_v36 }
 0x48f   :  { %v3420_v55 = vmul.f32 0.6931472, %v6659_v10  ;;  %6660 = vpow2.f32 %v3364_v54  ;;  %v3581_v43 = vmul.f32 %v3523_v15, %v2986_v22  ;;  %v6471_v54 = vld [vmem:[%s9541_s6 + $0x220] sm:$0xff]  }
 0x490   :  { %v3449_v35 = vadd.f32 %v3418_v50, %v3297_v27  ;;  %6662 = vpow2.f32 %v3366_v41  ;;  %v9167_v45 = vpop.f32.mrb[32].mxu1  ;;  %5455 = vmatpush3.bf16.msra.mxu1 %v6452_v29  ;;  %v3599_v26 = vpack.c.bf16 %v3580_v23, %v3580_v23  ;;  %v3029_v29 = vadd.f32 %v9051_v33, %v9041_v36  ;;  %v6468_v10 = vld [vmem:[%s9541_s6 + $0x280] sm:$0xff]   ;;  %v6470_v50 = vld [vmem:[%s9541_s6 + $0x2c8] sm:$0xff]  }
 0x491   :  { %v3450_v37 = vadd.f32 %v3420_v55, %v3298_v60  ;;  %v9172_v21 = vpop.f32.mrb[33].mxu1  ;;  %v3600_v28 = vpack.c.bf16 %v3581_v43, %v3581_v43  ;;  %5456 = vmatprep.subr.bf16.mxu1 %v6453_v7  ;;  %v6473_v7 = vld [vmem:[%s9541_s6 + $0x268] sm:$0xff]   ;;  %v6477_v55 = vld [vmem:[%s9541_s6 + $0x270] sm:$0xff]  }
 0x492   :  { %v3468_v49 = vadd.f32 1.0, %v3449_v35  ;;  %v3116_v42 = vpop.f32.mrb[34].mxu1  ;;  %v6475_v41 = vld [vmem:[%s9541_s6 + $0x228] sm:$0xff]   ;;  %v3299_v35 = vmax.f32 %v9134_v4, 0.0  ;;  %v6474_v4 = vld [vmem:[%s9541_s6 + $0x2d0] sm:$0xff]  }
 0x493   :  { %v3469_v24 = vadd.f32 1.0, %v3450_v37  ;;  %v9184_v63 = vadd.f32 %v3116_v42, %v9017_v32  ;;  %v3118_v16 = vpop.f32.mrb[35].mxu1  ;;  %4889 = vmatprep.mubr.bf16.mxu0 %v3600_v28  ;;  %v3300_v28 = vmax.f32 %v9137_v5, 0.0  ;;  %v6479_v5 = vld [vmem:[%s9541_s6 + $0x230] sm:$0xff]  }
 0x494   :  { %6664 = vrcp.f32 %v3468_v49  ;;  %v9187_v58 = vadd.f32 %v3118_v16, %v9017_v32  ;;  %4890 = vmatmul.mubr.bf16.vlgmr.msra.gmra.mrb[40].mxu0 %v3599_v26  ;;  %5457 = vmatpush3.bf16.msra.mxu1 %v6454_v0  ;;  %v6472_v49 = vld [vmem:[%s9541_s6 + $0x288] sm:$0xff]  }
 0x495   :  { %6666 = vrcp.f32 %v3469_v24  ;;  %v3320_v11 = vand.u32 2147483647, %v9184_v63  ;;  %5458 = vmatprep.subr.bf16.mxu1 %v6455_v14  ;;  %5469 = vmatpush3.bf16.msra.mxu0 %v6460_v52 }
 0x496   :  { %v3321_v44 = vand.u32 2147483647, %v9187_v58  ;;  %5470 = vmatprep.subr.bf16.mxu0 %v6461_v31 }
 0x497   :  { %v3339_v38 = vsub.f32 0.0, %v3320_v11 }
 0x498   :  { %v3340_v46 = vsub.f32 0.0, %v3321_v44  ;;  %5459 = vmatpush3.bf16.msra.mxu1 %v6456_v48  ;;  %v6481_v48 = vld [vmem:[%s9541_s6 + $0x278] sm:$0xff]  }
 0x499   :  { %v6661_v39 = vpop.eup %6660  ;;  %v3368_v17 = vmul.f32 1.442695, %v3339_v38  ;;  %5460 = vmatprep.subr.bf16.mxu1 %v6457_v8  ;;  %5471 = vmatpush3.bf16.msra.mxu0 %v6462_v56  ;;  %v6476_v38 = vld [vmem:[%s9541_s6 + $0x290] sm:$0xff]  }
 0x49a   :  { %v6663_v47 = vpop.eup %6662  ;;  %v3394_v2 = vadd.f32 1.0, %v6661_v39  ;;  %v3370_v19 = vmul.f32 1.442695, %v3340_v46  ;;  %5472 = vmatprep.subr.bf16.mxu0 %v6463_v18  ;;  %v6483_v39 = vld [vmem:[%s9541_s6 + $0x238] sm:$0xff]  }
 0x49b   :  { %v3395_v13 = vadd.f32 1.0, %v6663_v47  ;;  %6668 = vpow2.f32 %v3368_v17 }
 0x49c   :  { %6670 = vlog2.f32 %v3394_v2  ;;  %5461 = vmatpush3.bf16.msra.mxu1 %v6459_v53  ;;  %v6478_v53 = vld [vmem:[%s9541_s6 + $0x2d8] sm:$0xff]  }
 0x49d   :  { %6672 = vlog2.f32 %v3395_v13  ;;  %5473 = vmatpush3.bf16.msra.mxu0 %v6464_v34  ;;  %5490 = vmatprep.subr.bf16.mxu1 %v6466_v12  ;;  %v6488_v34 = vld [vmem:[%s9541_s6 + $0x340] sm:$0xff]   ;;  %v6480_v2 = vld [vmem:[%s9541_s6 + $0x298] sm:$0xff]  }
 0x49e   :  { %v6665_v1 = vpop.eup %6664  ;;  %6674 = vpow2.f32 %v3370_v19  ;;  %5474 = vmatprep.subr.bf16.mxu0 %v6465_v3  ;;  %v6482_v3 = vld [vmem:[%s9541_s6 + $0x2e0] sm:$0xff]  }
 0x49f   :  { %v6667_v40 = vpop.eup %6666  ;;  %v3527_v25 = vrot.slane %v6665_v1, %v9569_v59  ;;  %v3301_v1 = vmax.f32 %v9184_v63, 0.0 }
 0x4a0   :  { %v3531_v6 = vrot.slane %v6667_v40, %v9569_v59  ;;  %v6484_v40 = vld [vmem:[%s9541_s6 + $0x2a0] sm:$0xff]  }
 0x4a1   :  { %v3582_v22 = vmul.f32 %v3527_v25, %v3027_v20  ;;  %5475 = vmatpush3.bf16.msra.mxu0 %v6467_v57 }
 0x4a2   :  { %v3583_v15 = vmul.f32 %v3531_v6, %v3029_v29  ;;  %5476 = vmatprep.subr.bf16.mxu0 %v6469_v62  ;;  %v6485_v29 = vld [vmem:[%s9541_s6 + $0x2e8] sm:$0xff]   ;;  %v3302_v6 = vmax.f32 %v9187_v58, 0.0  ;;  %v3072_v58 = vadd.f32 %v9122_v9, %v9041_v36 }
 0x4a3   :  { %v3601_v27 = vpack.c.bf16 %v3582_v22, %v3582_v22 }
 0x4a4   :  { %v3602_v51 = vpack.c.bf16 %v3583_v15, %v3583_v15 }
 0x4a5   :  { %v6669_v33 = vpop.eup %6668  ;;  %5477 = vmatpush3.bf16.msra.mxu0 %v6471_v54 }
 0x4a6   :  { %v6671_v23 = vpop.eup %6670  ;;  %v3396_v60 = vadd.f32 1.0, %v6669_v33  ;;  %4929 = vmatprep.mubr.bf16.mxu1 %v3602_v51  ;;  %5478 = vmatprep.subr.bf16.mxu0 %v6473_v7  ;;  %v3070_v7 = vadd.f32 %v9117_v30, %v9041_v36  ;;  %v6487_v30 = vld [vmem:[%s9541_s6 + $0x2f0] sm:$0xff]  }
 0x4a7   :  { %v6673_v43 = vpop.eup %6672  ;;  %v3422_v0 = vmul.f32 0.6931472, %v6671_v23  ;;  %4930 = vmatmul.mubr.bf16.vlgmr.msra.gmra.mrb[48].mxu1 %v3601_v27  ;;  %v6486_v27 = vld [vmem:[%s9541_s6 + $0x2a8] sm:$0xff]  }
 0x4a8   :  { %v6675_v37 = vpop.eup %6674  ;;  %v3424_v14 = vmul.f32 0.6931472, %v6673_v43  ;;  %6676 = vlog2.f32 %v3396_v60  ;;  %v9247_v52 = vpop.f32.mrb[28].mxu0  ;;  %5491 = vmatpush3.bf16.msra.mxu1 %v6468_v10 }
 0x4a9   :  { %v3451_v42 = vadd.f32 %v3422_v0, %v3299_v35  ;;  %v3397_v26 = vadd.f32 1.0, %v6675_v37  ;;  %v9252_v31 = vpop.f32.mrb[29].mxu0  ;;  %5492 = vmatprep.subr.bf16.mxu1 %v6470_v50  ;;  %5479 = vmatpush3.bf16.msra.mxu0 %v6475_v41  ;;  %v6489_v37 = vld [vmem:[%s9541_s6 + $0x2b0] sm:$0xff]  }
 0x4aa   :  { %v3452_v24 = vadd.f32 %v3424_v14, %v3300_v28  ;;  %v3159_v16 = vpop.f32.mrb[30].mxu0  ;;  %5480 = vmatprep.subr.bf16.mxu0 %v6477_v55 }
 0x4ab   :  { %v3470_v11 = vadd.f32 1.0, %v3451_v42  ;;  %6678 = vlog2.f32 %v3397_v26  ;;  %v9264_v8 = vadd.f32 %v3159_v16, %v9017_v32  ;;  %v3161_v56 = vpop.f32.mrb[31].mxu0  ;;  %v6490_v42 = vld [vmem:[%s9541_s6 + $0x300] sm:$0xff]   ;;  %v6491_v26 = vld [vmem:[%s9541_s6 + $0x2f8] sm:$0xff]  }
 0x4ac   :  { %v3471_v44 = vadd.f32 1.0, %v3452_v24  ;;  %v9267_v18 = vadd.f32 %v3161_v56, %v9017_v32  ;;  %5493 = vmatpush3.bf16.msra.mxu1 %v6472_v49 }
 0x4ad   :  { %6680 = vrcp.f32 %v3470_v11  ;;  %v3322_v46 = vand.u32 2147483647, %v9264_v8  ;;  %5494 = vmatprep.subr.bf16.mxu1 %v6474_v4  ;;  %5481 = vmatpush3.bf16.msra.mxu0 %v6479_v5 }
 0x4ae   :  { %6682 = vrcp.f32 %v3471_v44  ;;  %v3323_v17 = vand.u32 2147483647, %v9267_v18  ;;  %5482 = vmatprep.subr.bf16.mxu0 %v6481_v48  ;;  %v6492_v48 = vld [vmem:[%s9541_s6 + $0x348] sm:$0xff]  }
 0x4af   :  { %v3341_v12 = vsub.f32 0.0, %v3322_v46 }
 0x4b0   :  { %v3342_v47 = vsub.f32 0.0, %v3323_v17  ;;  %5495 = vmatpush3.bf16.msra.mxu1 %v6476_v38  ;;  %v6493_v38 = vld [vmem:[%s9541_s6 + $0x2b8] sm:$0xff]  }
 0x4b1   :  { %v3372_v19 = vmul.f32 1.442695, %v3341_v12  ;;  %5496 = vmatprep.subr.bf16.mxu1 %v6478_v53  ;;  %5483 = vmatpush3.bf16.msra.mxu0 %v6483_v39  ;;  %v6494_v53 = vld [vmem:[%s9541_s6 + $0x308] sm:$0xff]   ;;  %v6500_v39 = vld [vmem:[%s9541_s6 + $0x3c0] sm:$0xff]  }
 0x4b2   :  { %v6677_v13 = vpop.eup %6676  ;;  %v3374_v57 = vmul.f32 1.442695, %v3342_v47  ;;  %5512 = vmatprep.subr.bf16.mxu0 %v6488_v34  ;;  %v6495_v34 = vld [vmem:[%s9541_s6 + $0x350] sm:$0xff]   ;;  %v3113_v47 = vadd.f32 %v9167_v45, %v9041_v36  ;;  %v3115_v45 = vadd.f32 %v9172_v21, %v9041_v36  ;;  %v6502_v21 = vld [vmem:[%s9541_s6 + $0x380] sm:$0xff]  }
 0x4b3   :  { %v3426_v62 = vmul.f32 0.6931472, %v6677_v13  ;;  %6684 = vpow2.f32 %v3372_v19  ;;  %v6496_v19 = vld [vmem:[%s9541_s6 + $0x310] sm:$0xff]  }
 0x4b4   :  { %6686 = vpow2.f32 %v3374_v57  ;;  %5497 = vmatpush3.bf16.msra.mxu1 %v6480_v2  ;;  %v6497_v57 = vld [vmem:[%s9541_s6 + $0x358] sm:$0xff]  }
 0x4b5   :  { %v6679_v20 = vpop.eup %6678  ;;  %v3453_v25 = vadd.f32 %v3426_v62, %v3301_v1  ;;  %5498 = vmatprep.subr.bf16.mxu1 %v6482_v3 }
 0x4b6   :  { %v3428_v22 = vmul.f32 0.6931472, %v6679_v20 }
 0x4b7   :  { %v6681_v54 = vpop.eup %6680  ;;  %v3472_v63 = vadd.f32 1.0, %v3453_v25  ;;  %v6499_v25 = vld [vmem:[%s9541_s6 + $0x360] sm:$0xff]  }
 0x4b8   :  { %v6683_v15 = vpop.eup %6682  ;;  %v3454_v51 = vadd.f32 %v3428_v22, %v3302_v6  ;;  %v9299_v10 = vpop.f32.mrb[36].mxu1  ;;  %5499 = vmatpush3.bf16.msra.mxu1 %v6484_v40  ;;  %v3535_v33 = vrot.slane %v6681_v54, %v9569_v59  ;;  %v6498_v40 = vld [vmem:[%s9541_s6 + $0x318] sm:$0xff]   ;;  %v3303_v6 = vmax.f32 %v9264_v8, 0.0 }
 0x4b9   :  { %6688 = vrcp.f32 %v3472_v63  ;;  %v9307_v50 = vpop.f32.mrb[37].mxu1  ;;  %v3539_v41 = vrot.slane %v6683_v15, %v9569_v59  ;;  %5500 = vmatprep.subr.bf16.mxu1 %v6485_v29  ;;  %v3304_v63 = vmax.f32 %v9267_v18, 0.0  ;;  %v6501_v18 = vld [vmem:[%s9541_s6 + $0x320] sm:$0xff]  }
 0x4ba   :  { %v3473_v23 = vadd.f32 1.0, %v3454_v51  ;;  %v3202_v60 = vpop.f32.mrb[38].mxu1  ;;  %v3584_v55 = vmul.f32 %v3535_v33, %v3070_v7 }
 0x4bb   :  { %v9314_v43 = vadd.f32 %v3202_v60, %v9017_v32  ;;  %v3204_v35 = vpop.f32.mrb[39].mxu1  ;;  %v3585_v0 = vmul.f32 %v3539_v41, %v3072_v58 }
 0x4bc   :  { %6690 = vrcp.f32 %v3473_v23  ;;  %v9317_v9 = vadd.f32 %v3204_v35, %v9017_v32  ;;  %5501 = vmatpush3.bf16.msra.mxu1 %v6486_v27  ;;  %v3603_v16 = vpack.c.bf16 %v3584_v55, %v3584_v55  ;;  %v6504_v27 = vld [vmem:[%s9541_s6 + $0x3c8] sm:$0xff]  }
 0x4bd   :  { %v6685_v28 = vpop.eup %6684  ;;  %v3324_v14 = vand.u32 2147483647, %v9314_v43  ;;  %v3604_v49 = vpack.c.bf16 %v3585_v0, %v3585_v0  ;;  %5502 = vmatprep.subr.bf16.mxu1 %v6487_v30 }
 0x4be   :  { %v6687_v4 = vpop.eup %6686  ;;  %v3398_v5 = vadd.f32 1.0, %v6685_v28  ;;  %v3325_v24 = vand.u32 2147483647, %v9317_v9 }
 0x4bf   :  { %v3399_v11 = vadd.f32 1.0, %v6687_v4  ;;  %v3343_v56 = vsub.f32 0.0, %v3324_v14  ;;  %4969 = vmatprep.mubr.bf16.mxu0 %v3604_v49 }
 0x4c0   :  { %6692 = vlog2.f32 %v3398_v5  ;;  %v3344_v44 = vsub.f32 0.0, %v3325_v24  ;;  %4970 = vmatmul.mubr.bf16.vlgmr.msra.gmra.mrb[44].mxu0 %v3603_v16  ;;  %5503 = vmatpush3.bf16.msra.mxu1 %v6489_v37  ;;  %v6503_v37 = vld [vmem:[%s9541_s6 + $0x368] sm:$0xff]  }
 0x4c1   :  { %6694 = vlog2.f32 %v3399_v11  ;;  %v3376_v46 = vmul.f32 1.442695, %v3343_v56  ;;  %5513 = vmatpush3.bf16.msra.mxu0 %v6490_v42  ;;  %5504 = vmatprep.subr.bf16.mxu1 %v6491_v26  ;;  %v6506_v5 = vld [vmem:[%s9541_s6 + $0x388] sm:$0xff]  }
 0x4c2   :  { %v3378_v17 = vmul.f32 1.442695, %v3344_v44  ;;  %5514 = vmatprep.subr.bf16.mxu0 %v6492_v48  ;;  %v6508_v48 = vld [vmem:[%s9541_s6 + $0x3d0] sm:$0xff]   ;;  %v6505_v56 = vld [vmem:[%s9541_s6 + $0x328] sm:$0xff]  }
 0x4c3   :  { %v6689_v12 = vpop.eup %6688  ;;  %6696 = vpow2.f32 %v3376_v46 }
 0x4c4   :  { %6698 = vpow2.f32 %v3378_v17  ;;  %5505 = vmatpush3.bf16.msra.mxu1 %v6493_v38  ;;  %v3543_v2 = vrot.slane %v6689_v12, %v9569_v59 }
 0x4c5   :  { %5515 = vmatpush3.bf16.msra.mxu0 %v6494_v53  ;;  %5534 = vmatprep.subr.bf16.mxu1 %v6500_v39  ;;  %v6510_v53 = vld [vmem:[%s9541_s6 + $0x390] sm:$0xff]  }
 0x4c6   :  { %v6691_v3 = vpop.eup %6690  ;;  %v3586_v13 = vmul.f32 %v3543_v2, %v3113_v47  ;;  %5516 = vmatprep.subr.bf16.mxu0 %v6495_v34  ;;  %v6512_v34 = vld [vmem:[%s9541_s6 + $0x3d8] sm:$0xff]   ;;  %v6509_v47 = vld [vmem:[%s9541_s6 + $0x330] sm:$0xff]  }
 0x4c7   :  { %v3547_v1 = vrot.slane %v6691_v3, %v9569_v59  ;;  %v6511_v3 = vld [vmem:[%s9541_s6 + $0x378] sm:$0xff]  }
 0x4c8   :  { %v3605_v33 = vpack.c.bf16 %v3586_v13, %v3586_v13  ;;  %v6514_v13 = vld [vmem:[%s9541_s6 + $0x398] sm:$0xff]  }
 0x4c9   :  { %v3587_v62 = vmul.f32 %v3547_v1, %v3115_v45  ;;  %5517 = vmatpush3.bf16.msra.mxu0 %v6496_v19  ;;  %v6513_v45 = vld [vmem:[%s9541_s6 + $0x338] sm:$0xff]  }
 0x4ca   :  { %v6693_v20 = vpop.eup %6692  ;;  %5518 = vmatprep.subr.bf16.mxu0 %v6497_v57  ;;  %v6515_v57 = vld [vmem:[%s9541_s6 + $0x3e0] sm:$0xff]  }
 0x4cb   :  { %v6695_v29 = vpop.eup %6694  ;;  %v3430_v22 = vmul.f32 0.6931472, %v6693_v20  ;;  %v3606_v54 = vpack.c.bf16 %v3587_v62, %v3587_v62  ;;  %v6517_v62 = vld [vmem:[%s9541_s6 + $0x440] sm:$0xff]   ;;  %v3305_v20 = vmax.f32 %v9314_v43, 0.0  ;;  %v3158_v43 = vadd.f32 %v9252_v31, %v9041_v36  ;;  %v6522_v31 = vld [vmem:[%s9541_s6 + $0x3f0] sm:$0xff]  }
 0x4cc   :  { %v3432_v15 = vmul.f32 0.6931472, %v6695_v29  ;;  %v9368_v7 = vpop.f32.mrb[32].mxu0  ;;  %v9370_v51 = vpop.f32.mrb[40].mxu1  ;;  %v6516_v29 = vld [vmem:[%s9541_s6 + $0x3a0] sm:$0xff]  }
 0x4cd   :  { %v6697_v58 = vpop.eup %6696  ;;  %v3455_v8 = vadd.f32 %v3430_v22, %v3303_v6  ;;  %5009 = vmatprep.mubr.bf16.mxu1 %v3606_v54  ;;  %v9375_v41 = vpop.f32.mrb[33].mxu0  ;;  %5519 = vmatpush3.bf16.msra.mxu0 %v6498_v40  ;;  %v3156_v22 = vadd.f32 %v9247_v52, %v9041_v36 }
 0x4ce   :  { %v5606_v30 = vpop.f32.mrb[41].mxu1  ;;  %v6699_v23 = vpop.eup %6698  ;;  %v3456_v60 = vadd.f32 %v3432_v15, %v3304_v63  ;;  %v3400_v55 = vadd.f32 1.0, %v6697_v58  ;;  %5010 = vmatmul.mubr.bf16.vlgmr.msra.gmra.mrb[52].mxu1 %v3605_v33  ;;  %5520 = vmatprep.subr.bf16.mxu0 %v6499_v25 }
 0x4cf   :  { %v3245_v35 = vpop.f32.mrb[34].mxu0  ;;  %v3287_v0 = vpop.f32.mrb[42].mxu1  ;;  %v3474_v28 = vadd.f32 1.0, %v3455_v8  ;;  %v3401_v14 = vadd.f32 1.0, %v6699_v23  ;;  %5535 = vmatpush3.bf16.msra.mxu1 %v6502_v21  ;;  %v6518_v21 = vld [vmem:[%s9541_s6 + $0x3e8] sm:$0xff]  }
 0x4d0   :  { %v9384_v49 = vadd.f32 %v3245_v35, %v9017_v32  ;;  %v9387_v42 = vadd.f32 %v3287_v0, %v9017_v32  ;;  %v3247_v26 = vpop.f32.mrb[35].mxu0  ;;  %v5607_v4 = vpop.f32.mrb[43].mxu1  ;;  %v3475_v24 = vadd.f32 1.0, %v3456_v60  ;;  %6700 = vlog2.f32 %v3400_v55  ;;  %5536 = vmatprep.subr.bf16.mxu1 %v6504_v27 }
 0x4d1   :  { %v9393_v16 = vadd.f32 %v3247_v26, %v9017_v32  ;;  %6702 = vrcp.f32 %v3474_v28  ;;  %5521 = vmatpush3.bf16.msra.mxu0 %v6501_v18  ;;  %v6507_v32 = vld [vmem:[%s9541_s6 + $0x370] sm:$0xff]   ;;  %v3306_v27 = vmax.f32 %v9317_v9, 0.0  ;;  %v6520_v18 = vld [vmem:[%s9541_s6 + $0x3a8] sm:$0xff]   ;;  %v6519_v9 = vld [vmem:[%s9541_s6 + $0x400] sm:$0xff]  }
 0x4d2   :  { %v3326_v11 = vand.u32 2147483647, %v9384_v49  ;;  %6704 = vrcp.f32 %v3475_v24  ;;  %v3328_v44 = vand.u32 2147483647, %v9387_v42  ;;  %5522 = vmatprep.subr.bf16.mxu0 %v6503_v37 }
 0x4d3   :  { %v3327_v38 = vand.u32 2147483647, %v9393_v16  ;;  %6706 = vlog2.f32 %v3401_v14  ;;  %5537 = vmatpush3.bf16.msra.mxu1 %v6506_v5  ;;  %v6521_v14 = vld [vmem:[%s9541_s6 + $0x448] sm:$0xff]   ;;  %v6524_v5 = vld [vmem:[%s9541_s6 + $0x3b0] sm:$0xff]  }
 0x4d4   :  { %v3345_v46 = vsub.f32 0.0, %v3326_v11  ;;  %v3347_v39 = vsub.f32 0.0, %v3328_v44  ;;  %5538 = vmatprep.subr.bf16.mxu1 %v6508_v48  ;;  %v6526_v48 = vld [vmem:[%s9541_s6 + $0x3f8] sm:$0xff]   ;;  %v6523_v11 = vld [vmem:[%s9541_s6 + $0x408] sm:$0xff]  }
 0x4d5   :  { %v3346_v17 = vsub.f32 0.0, %v3327_v38  ;;  %5523 = vmatpush3.bf16.msra.mxu0 %v6505_v56  ;;  %v6525_v56 = vld [vmem:[%s9541_s6 + $0x450] sm:$0xff]   ;;  %v6528_v44 = vld [vmem:[%s9541_s6 + $0x3b8] sm:$0xff]  }
 0x4d6   :  { %v3380_v12 = vmul.f32 1.442695, %v3345_v46  ;;  %v3384_v2 = vmul.f32 1.442695, %v3347_v39  ;;  %5524 = vmatprep.subr.bf16.mxu0 %v6507_v32  ;;  %v6527_v38 = vld [vmem:[%s9541_s6 + $0x410] sm:$0xff]   ;;  %v6529_v32 = vld [vmem:[%s9541_s6 + $0x458] sm:$0xff]  }
 0x4d7   :  { %v3382_v19 = vmul.f32 1.442695, %v3346_v17  ;;  %5539 = vmatpush3.bf16.msra.mxu1 %v6510_v53  ;;  %v3199_v53 = vadd.f32 %v9299_v10, %v9041_v36  ;;  %v6530_v17 = vld [vmem:[%s9541_s6 + $0x418] sm:$0xff]  }
 0x4d8   :  { %6708 = vpow2.f32 %v3380_v12  ;;  %5540 = vmatprep.subr.bf16.mxu1 %v6512_v34 }
 0x4d9   :  { %6710 = vpow2.f32 %v3384_v2  ;;  %5525 = vmatpush3.bf16.msra.mxu0 %v6509_v47  ;;  %v6531_v47 = vld [vmem:[%s9541_s6 + $0x460] sm:$0xff]  }
 0x4da   :  { %6712 = vpow2.f32 %v3382_v19  ;;  %v6701_v1 = vpop.eup %6700  ;;  %5526 = vmatprep.subr.bf16.mxu0 %v6511_v3  ;;  %v3201_v19 = vadd.f32 %v9307_v50, %v9041_v36 }
 0x4db   :  { %v6703_v40 = vpop.eup %6702  ;;  %v3434_v25 = vmul.f32 0.6931472, %v6701_v1  ;;  %5541 = vmatpush3.bf16.msra.mxu1 %v6514_v13  ;;  %v3307_v13 = vmax.f32 %v9384_v49, 0.0  ;;  %v3309_v1 = vmax.f32 %v9387_v42, 0.0  ;;  %v6533_v49 = vld [vmem:[%s9541_s6 + $0x468] sm:$0xff]  }
 0x4dc   :  { %v6705_v6 = vpop.eup %6704  ;;  %v3551_v54 = vrot.slane %v6703_v40, %v9569_v59  ;;  %5542 = vmatprep.subr.bf16.mxu1 %v6515_v57 }
 0x4dd   :  { %v6707_v63 = vpop.eup %6706  ;;  %v3457_v15 = vadd.f32 %v3434_v25, %v3305_v20  ;;  %5527 = vmatpush3.bf16.msra.mxu0 %v6513_v45  ;;  %v3555_v33 = vrot.slane %v6705_v6, %v9569_v59  ;;  %v6532_v20 = vld [vmem:[%s9541_s6 + $0x420] sm:$0xff]  }
 0x4de   :  { %v3436_v58 = vmul.f32 0.6931472, %v6707_v63  ;;  %v3588_v8 = vmul.f32 %v3551_v54, %v3156_v22  ;;  %5556 = vmatprep.subr.bf16.mxu0 %v6517_v62 }
 0x4df   :  { %v3476_v52 = vadd.f32 1.0, %v3457_v15  ;;  %v3589_v30 = vmul.f32 %v3555_v33, %v3158_v43  ;;  %5543 = vmatpush3.bf16.msra.mxu1 %v6516_v29  ;;  %v3308_v29 = vmax.f32 %v9393_v16, 0.0  ;;  %v6534_v43 = vld [vmem:[%s9541_s6 + $0x428] sm:$0xff]   ;;  %v6535_v15 = vld [vmem:[%s9541_s6 + $0x470] sm:$0xff]  }
 0x4e0   :  { %v3458_v23 = vadd.f32 %v3436_v58, %v3306_v27  ;;  %5544 = vmatprep.subr.bf16.mxu1 %v6518_v21  ;;  %v3607_v28 = vpack.c.bf16 %v3588_v8, %v3588_v8  ;;  %v6536_v33 = vld [vmem:[%s9541_s6 + $0x430] sm:$0xff]   ;;  %v6537_v27 = vld [vmem:[%s9541_s6 + $0x478] sm:$0xff]  }
 0x4e1   :  { %6714 = vrcp.f32 %v3476_v52  ;;  %v3608_v55 = vpack.c.bf16 %v3589_v30, %v3589_v30  ;;  %v6538_v58 = vld [vmem:[%s9541_s6 + $0x438] sm:$0xff]   ;;  %v3242_v30 = vadd.f32 %v9368_v7, %v9041_v36  ;;  %v6539_v7 = vld [vmem:[%s9541_s6 + $0x480] ss:$0 sps:$4 sm:$0xff]  }
 0x4e2   :  { %v6709_v60 = vpop.eup %6708  ;;  %v3477_v0 = vadd.f32 1.0, %v3458_v23 }
 0x4e3   :  { %v6711_v35 = vpop.eup %6710  ;;  %v3402_v37 = vadd.f32 1.0, %v6709_v60  ;;  %5049 = vmatprep.mubr.bf16.mxu0 %v3608_v55  ;;  %5545 = vmatpush3.bf16.msra.mxu1 %v6520_v18  ;;  %v3244_v55 = vadd.f32 %v9375_v41, %v9041_v36 }
 0x4e4   :  { %v6713_v26 = vpop.eup %6712  ;;  %v3404_v4 = vadd.f32 1.0, %v6711_v35  ;;  %6716 = vrcp.f32 %v3477_v0  ;;  %5050 = vmatmul.mubr.bf16.vlgmr.msra.gmra.mrb[48].mxu0 %v3607_v28  ;;  %5546 = vmatprep.subr.bf16.mxu1 %v6522_v31  ;;  %v3285_v31 = vadd.f32 %v9370_v51, %v9041_v36  ;;  %v4775_v51 = vsel %vm779_vm8, %v6539_v7, 0 }
 0x4e5   :  { %v3403_v24 = vadd.f32 1.0, %v6713_v26  ;;  %6718 = vlog2.f32 %v3402_v37  ;;  %5557 = vmatpush3.bf16.msra.mxu0 %v6519_v9 }
 0x4e6   :  { %6720 = vlog2.f32 %v3404_v4  ;;  %5558 = vmatprep.subr.bf16.mxu0 %v6521_v14 }
 0x4e7   :  { %6722 = vlog2.f32 %v3403_v24  ;;  %5547 = vmatpush3.bf16.msra.mxu1 %v6524_v5 }
 0x4e8   :  { %5548 = vmatprep.subr.bf16.mxu1 %v6526_v48 }
 0x4e9   :  { %5559 = vmatpush3.bf16.msra.mxu0 %v6523_v11 }
 0x4ea   :  { %5560 = vmatprep.subr.bf16.mxu0 %v6525_v56 }
 0x4eb   :  { %v6715_v46 = vpop.eup %6714  ;;  %5549 = vmatpush3.bf16.msra.mxu1 %v6528_v44 }
 0x4ec   :  { %v3559_v39 = vrot.slane %v6715_v46, %v9569_v59 }
 0x4ed   :  { %5561 = vmatpush3.bf16.msra.mxu0 %v6527_v38 }
 0x4ee   :  { %v6717_v34 = vpop.eup %6716  ;;  %5562 = vmatprep.subr.bf16.mxu0 %v6529_v32  ;;  %v3590_v12 = vmul.f32 %v3559_v39, %v3199_v53 }
 0x4ef   :  { %v6719_v2 = vpop.eup %6718  ;;  %v3563_v10 = vrot.slane %v6717_v34, %v9569_v59 }
 0x4f0   :  { %v6721_v3 = vpop.eup %6720  ;;  %v3438_v57 = vmul.f32 0.6931472, %v6719_v2  ;;  %v3609_v21 = vpack.c.bf16 %v3590_v12, %v3590_v12 }
 0x4f1   :  { %v6723_v45 = vpop.eup %6722  ;;  %v3442_v62 = vmul.f32 0.6931472, %v6721_v3  ;;  %v3591_v40 = vmul.f32 %v3563_v10, %v3201_v19  ;;  %5563 = vmatpush3.bf16.msra.mxu0 %v6530_v17 }
 0x4f2   :  { %v3459_v25 = vadd.f32 %v3438_v57, %v3307_v13  ;;  %v3440_v50 = vmul.f32 0.6931472, %v6723_v45  ;;  %5564 = vmatprep.subr.bf16.mxu0 %v6531_v47 }
 0x4f3   :  { %v3461_v6 = vadd.f32 %v3442_v62, %v3309_v1  ;;  %v3610_v22 = vpack.c.bf16 %v3591_v40, %v3591_v40 }
 0x4f4   :  { %v3478_v54 = vadd.f32 1.0, %v3459_v25  ;;  %v3460_v42 = vadd.f32 %v3440_v50, %v3308_v29 }
 0x4f5   :  { %v3480_v63 = vadd.f32 1.0, %v3461_v6  ;;  %5089 = vmatprep.mubr.bf16.mxu1 %v3610_v22  ;;  %5565 = vmatpush3.bf16.msra.mxu0 %v6532_v20 }
 0x4f6   :  { %6724 = vrcp.f32 %v3478_v54  ;;  %v3479_v16 = vadd.f32 1.0, %v3460_v42  ;;  %5090 = vmatmul.mubr.bf16.vlgmr.msra.gmra.mrb[56].mxu1 %v3609_v21  ;;  %5566 = vmatprep.subr.bf16.mxu0 %v6533_v49 }
 0x4f7   :  { %6726 = vrcp.f32 %v3480_v63 }
 0x4f8   :  { %6728 = vrcp.f32 %v3479_v16 }
 0x4f9   :  { %5567 = vmatpush3.bf16.msra.mxu0 %v6534_v43 }
 0x4fa   :  { %5568 = vmatprep.subr.bf16.mxu0 %v6535_v15 }
 0x4fd   :  { %5569 = vmatpush3.bf16.msra.mxu0 %v6536_v33 }
 0x4fe   :  { %5570 = vmatprep.subr.bf16.mxu0 %v6537_v27 }
 0x500   :  { %v6725_v8 = vpop.eup %6724 }
 0x501   :  { %v6727_v52 = vpop.eup %6726  ;;  %5571 = vmatpush3.bf16.msra.mxu0 %v6538_v58  ;;  %v3567_v18 = vrot.slane %v6725_v8, %v9569_v59 }
 0x502   :  { %v6729_v23 = vpop.eup %6728  ;;  %5608 = vmatprep.subr.bf16.mxu0 %v9568_v61  ;;  %v3575_v60 = vrot.slane %v6727_v52, %v9569_v59 }
 0x503   :  { %v3571_v9 = vrot.slane %v6729_v23, %v9569_v59  ;;  %v3592_v35 = vmul.f32 %v3567_v18, %v3242_v30 }
 0x504   :  { %v3594_v0 = vmul.f32 %v3575_v60, %v3285_v31 }
 0x505   :  { %v3593_v37 = vmul.f32 %v3571_v9, %v3244_v55  ;;  %v3611_v14 = vpack.c.bf16 %v3592_v35, %v3592_v35 }
 0x506   :  { %v3613_v36 = vpack.c.bf16 %v3594_v0, %v3594_v0 }
 0x507   :  { %v3612_v28 = vpack.c.bf16 %v3593_v37, %v3593_v37 }
 0x509   :  { %5129 = vmatprep.mubr.bf16.mxu0 %v3612_v28 }
 0x50a   :  { %5130 = vmatmul.mubr.bf16.vlgmr.msra.gmra.mrb[52].mxu0 %v3611_v14 }
 0x50b   :  { %5609 = vmatpush3.bf16.msra.mxu0 %v4775_v51  ;;  %5610 = vmatprep.mubr.msk.bf16.mxu0 %vm6743_vm10, %v9568_v61 }
 0x512   :  { %5611 = vmatmul.mubr.msk.bf16.vlgmr.msra.gmra.mrb[56].mxu0 %vm4770_vm14, %v3613_v36 }
 0x543   :  { %v5396_v59 = vpop.f32.mrb[36].mxu0 }
 0x544   :  { %v5397_v41 = vpop.f32.mrb[37].mxu0 }
 0x545   :  { %v5398_v26 = vadd.f32 %v5397_v41, %v5396_v59  ;;  %v5399_v4 = vpop.f32.mrb[38].mxu0 }
 0x546   :  { %v5400_v5 = vpop.f32.mrb[39].mxu0 }
 0x552   :  { %v5418_v24 = vpop.f32.mrb[44].mxu1 }
 0x553   :  { %v5419_v48 = vpop.f32.mrb[45].mxu1 }
 0x554   :  { %v5420_v11 = vadd.f32 %v5419_v48, %v5418_v24  ;;  %v5421_v56 = vpop.f32.mrb[46].mxu1 }
 0x555   :  { %v5422_v44 = vpop.f32.mrb[47].mxu1 }
 0x556   :  { %v4852_v38 = vadd.f32 %v5420_v11, %v5398_v26 }
 0x567   :  { %v5440_v32 = vpop.f32.mrb[40].mxu0 }
 0x568   :  { %v5441_v46 = vpop.f32.mrb[41].mxu0 }
 0x569   :  { %v5442_v53 = vadd.f32 %v5441_v46, %v5440_v32  ;;  %v5443_v39 = vpop.f32.mrb[42].mxu0 }
 0x56a   :  { %v5444_v61 = vpop.f32.mrb[43].mxu0 }
 0x56b   :  { %v4892_v17 = vadd.f32 %v5442_v53, %v4852_v38 }
 0x57a   :  { %v5462_v34 = vpop.f32.mrb[48].mxu1 }
 0x57b   :  { %v5463_v12 = vpop.f32.mrb[49].mxu1 }
 0x57c   :  { %v5464_v47 = vadd.f32 %v5463_v12, %v5462_v34  ;;  %v5465_v2 = vpop.f32.mrb[50].mxu1 }
 0x57d   :  { %v5466_v19 = vpop.f32.mrb[51].mxu1 }
 0x57e   :  { %v4932_v10 = vadd.f32 %v5464_v47, %v4892_v17 }
 0x593   :  { %v5484_v3 = vpop.f32.mrb[44].mxu0 }
 0x594   :  { %v5485_v13 = vpop.f32.mrb[45].mxu0 }
 0x595   :  { %v5486_v57 = vadd.f32 %v5485_v13, %v5484_v3  ;;  %v5487_v45 = vpop.f32.mrb[46].mxu0 }
 0x596   :  { %v5488_v1 = vpop.f32.mrb[47].mxu0 }
 0x597   :  { %v4972_v62 = vadd.f32 %v5486_v57, %v4932_v10 }
 0x5a1   :  { %v5506_v40 = vpop.f32.mrb[52].mxu1 }
 0x5a2   :  { %v5507_v20 = vpop.f32.mrb[53].mxu1 }
 0x5a3   :  { %v5508_v25 = vadd.f32 %v5507_v20, %v5506_v40  ;;  %v5509_v29 = vpop.f32.mrb[54].mxu1 }
 0x5a4   :  { %v5510_v50 = vpop.f32.mrb[55].mxu1 }
 0x5a5   :  { %v5012_v49 = vadd.f32 %v5508_v25, %v4972_v62 }
 0x5b7   :  { %v5528_v6 = vpop.f32.mrb[48].mxu0 }
 0x5b8   :  { %v5529_v22 = vpop.f32.mrb[49].mxu0 }
 0x5b9   :  { %v5530_v54 = vadd.f32 %v5529_v22, %v5528_v6  ;;  %v5531_v42 = vpop.f32.mrb[50].mxu0 }
 0x5ba   :  { %v5532_v21 = vpop.f32.mrb[51].mxu0 }
 0x5bb   :  { %v5052_v63 = vadd.f32 %v5530_v54, %v5012_v49 }
 0x5c9   :  { %v5550_v43 = vpop.f32.mrb[56].mxu1 }
 0x5ca   :  { %v5551_v16 = vpop.f32.mrb[57].mxu1 }
 0x5cb   :  { %v5552_v15 = vadd.f32 %v5551_v16, %v5550_v43  ;;  %v5553_v33 = vpop.f32.mrb[58].mxu1 }
 0x5cc   :  { %v5554_v27 = vpop.f32.mrb[59].mxu1 }
 0x5cd   :  { %v5092_v58 = vadd.f32 %v5552_v15, %v5052_v63 }
 0x5dd   :  { %v5572_v8 = vpop.f32.mrb[52].mxu0 }
 0x5de   :  { %v5573_v52 = vpop.f32.mrb[53].mxu0 }
 0x5df   :  { %v5574_v30 = vadd.f32 %v5573_v52, %v5572_v8  ;;  %v5575_v18 = vpop.f32.mrb[54].mxu0 }
 0x5e0   :  { %v5576_v23 = vpop.f32.mrb[55].mxu0 }
 0x5e1   :  { %v5132_v31 = vadd.f32 %v5574_v30, %v5092_v58 }
 0x5e5   :  { %v5171_v60 = vpop.f32.mrb[56].mxu0 }
 0x5e6   :  { %v5172_v55 = vadd.f32 %v5171_v60, %v5132_v31  ;;  %v5612_v9 = vpop.f32.mrb[57].mxu0 }
 0x5e7   :  { %v5174_v35 = vpop.f32.mrb[58].mxu0 }
 0x5e8   :  { %v5177_v7 = vmul.f32 0.00591716, %v5172_v55  ;;  %v5613_v0 = vpop.f32.mrb[59].mxu0 }
 0x5ea   :  { %5178 = vst.msk [vmem:[%s9542_s7] sm:$0xff] %vm4770_vm14, %v5177_v7 }

</bundles_post_ra>
